<compile_context>
chip_gen: v5e
topology: v5e:2x2
jax: 0.10.0
libtpu: 0.0.40
codegen_flags: <defaults>
</compile_context>

<pallas_src>
import math

import jax
import jax.numpy as jnp
from jax import lax
from jax.experimental import pallas as pl
from jax.experimental.pallas import tpu as pltpu

# ---------------- "args" / "tokenizer" configuration (synthetic) ----------------
KEYWORD_THRESHOLD = 0.5        # args.keyword_threshold (< 1 -> ratio of length)
THRESHOLD_GAP = 1              # args.threshold_gap
TRANSFORMER_POOL = "mean"      # args.transformer_pool  ('mean' or 'max')
PAD_ID = 0                     # tokenizer.pad_id

# ---------------- synthetic transformer dims ----------------
VOCAB = 50
MAX_POS = 64
D_MODEL = 32
NUM_HEADS = 2
HEAD_DIM = D_MODEL // NUM_HEADS
D_FF = 4 * D_MODEL
LN_EPS = 1e-5

LANE = 128                     # lane width; loss output padded to this (lane-dense store)
MASK_NEG = -1e30


# ============================= Pallas kernel =============================
def encoder_block_kernel(x_ref, valid_ref, thr_ref, maskb_ref, seg_ref,
                         ln1_g, ln1_b, wqkv, bqkv, wproj, bproj,
                         ln2_g, ln2_b, wfc, bfc, wout, bout,
                         lnf_g, lnf_b,
                         scores_ref, loss_ref):
    """One grid step: TB samples flattened to [TB*Lp, D] so every matmul has >=128 rows."""
    TBL, D = x_ref.shape
    H = NUM_HEADS
    HD = D // H
    inv_d = 1.0 / D

    x = x_ref[...]                                                   # [TBL, D] embeddings

    def layer_norm(v, g, b):
        mu = jnp.sum(v, axis=-1, keepdims=True) * inv_d
        c = v - mu
        var = jnp.sum(c * c, axis=-1, keepdims=True) * inv_d
        return c * lax.rsqrt(var + LN_EPS) * g + b

    # ---- attention sub-block (precomputed block-diagonal+causal additive mask) ----
    h1 = layer_norm(x, ln1_g[...], ln1_b[...])
    qkv = jnp.dot(h1, wqkv[...], preferred_element_type=jnp.float32) + bqkv[...]  # [TBL, 3D]

    mask_bias = maskb_ref[...]                       # [TBL, TBL], 0 where allowed / -1e30
    scale = 1.0 / math.sqrt(HD)
    dn_qkt = (((1,), (1,)), ((), ()))                # contract last dims:  q @ k^T
    wproj_v = wproj[...]                             # [D, D], loaded once
    attn_proj = None
    # TODO(synk): for long sequences (Lp >= 32) switch to per-sample batched dot_general
    # ([TB, Lp, HD]) so exp/softmax only runs over Lp keys instead of the dense TBL block.
    for h in range(H):
        qh = qkv[:, h * HD:(h + 1) * HD]
        kh = qkv[:, D + h * HD:D + (h + 1) * HD]
        vh = qkv[:, 2 * D + h * HD:2 * D + (h + 1) * HD]
        s = lax.dot_general(qh, kh, dn_qkt, preferred_element_type=jnp.float32) * scale
        s = s + mask_bias                            # single vadd replaces iota/cmp/select
        s = s - jnp.max(s, axis=-1, keepdims=True)
        p = jnp.exp(s)
        p = p * pl.reciprocal(jnp.sum(p, axis=-1, keepdims=True), approx=True)
        oh = jnp.dot(p, vh, preferred_element_type=jnp.float32)                    # [TBL, HD]
        # fold the head directly into the wproj contraction — no concatenate
        ph = jnp.dot(oh, wproj_v[h * HD:(h + 1) * HD, :],
                     preferred_element_type=jnp.float32)
        attn_proj = ph if attn_proj is None else attn_proj + ph
    x = x + attn_proj + bproj[...]

    # ---- MLP sub-block ----
    h2 = layer_norm(x, ln2_g[...], ln2_b[...])
    m = jnp.dot(h2, wfc[...], preferred_element_type=jnp.float32) + bfc[...]
    m = jax.nn.gelu(m, approximate=True)
    x = x + jnp.dot(m, wout[...], preferred_element_type=jnp.float32) + bout[...]

    # ---- final LN + aggregate over hidden dim + sigmoid (lane-dense row layout) ----
    hf = layer_norm(x, lnf_g[...], lnf_b[...])
    if TRANSFORMER_POOL == "mean":
        ones_row = jnp.ones((1, D), jnp.float32)
        agg_row = lax.dot_general(ones_row, hf, (((1,), (1,)), ((), ())),
                                  preferred_element_type=jnp.float32) * inv_d       # [1, TBL]
    else:
        # TODO(synk): dead at the default config; if enabled, replace the XLU transpose
        # with a lane-dense selection-matrix path like the 'mean' branch.
        agg_row = jnp.max(hf, axis=-1, keepdims=True).T                             # [1, TBL]
    sc_row = jax.nn.sigmoid(agg_row)                                                # [1, TBL]

    # per-sample length masking via the precomputed 0/1 validity row
    sc_row = sc_row * valid_ref[0]
    scores_ref[...] = sc_row.reshape(1, 1, TBL)          # lane-dense store (last dim = TBL)

    # score regularization loss: sqrt(scores).sum(-1) / threshold - 1   (per sample),
    # written into the first TB lanes of a lane-dense [1, 1, 128] block.
    ssum = jnp.dot(jnp.sqrt(sc_row), seg_ref[...], preferred_element_type=jnp.float32)  # [1, 128]
    loss_ref[...] = (ssum / thr_ref[0] - 1.0).reshape(1, 1, -1)


# ============================= wrapper =============================
def _choose_tb(B, Lp):
    # batch enough samples per grid step that the flattened matmul M-dim (TB*Lp)
    # reaches ~128 rows; keep TB a multiple of 8 for sublane alignment.
    tb = -(-128 // Lp)
    tb = max(8, ((tb + 7) // 8) * 8)
    # v7x: cap TB so the batch grid has >= 2 steps whenever the batch is big enough,
    # so dimension_semantics=("parallel",) can shard work across both TensorCores.
    if B >= 16:
        half = (((B + 1) // 2 + 7) // 8) * 8           # ceil(B/2) rounded up to mult of 8
        tb = min(tb, half)
    return tb


def _const_spec(shape):
    """BlockSpec for a grid-invariant (constant block index) input."""
    nd = len(shape)
    index_map = lambda g: (0,) * nd
    if 4 * math.prod(shape) >= (1 << 20):
        # Grid-invariant inputs are DMA'd once but still double-buffered by default.
        # Single-buffer the big ones so they cost 1x their size in VMEM at realistic
        # dims (v7x has only 64 MiB of VMEM / 32 MiB default scoped limit).
        return pl.BlockSpec(shape, index_map, pipeline_mode=pl.Buffered(1))
    return pl.BlockSpec(shape, index_map)


def run_encoder_kernel(sent, lens, thr, params):
    B, Lp = sent.shape
    D = D_MODEL
    TB = _choose_tb(B, Lp)
    B_pad = -(-B // TB) * TB
    G = B_pad // TB
    TBL = TB * Lp
    pad = B_pad - B

    sent_p = jnp.pad(sent.astype(jnp.int32), ((0, pad), (0, 0)), constant_values=PAD_ID)
    lens_p = jnp.pad(lens.astype(jnp.int32), (0, pad))                  # pad rows -> len 0
    # NOTE: thr can be 0 for real samples with lens <= 1 (original module divides by it
    # too -> inf); only the padding rows are guarded here to keep semantics identical.
    thr_p = jnp.pad(thr.astype(jnp.int32), (0, pad), constant_values=1)

    # ---- embedding gather in plain JAX; kernel consumes a pipelined [TBL, D] block ----
    # TODO(synk): at a realistic vocab, if the XLA gather shows up in profiles, move this
    # back into the kernel as a per-row DMA gather (not the old one-hot matmul).
    x = params['wte'][sent_p] + params['wpe'][:Lp][None, :, :]          # [B_pad, Lp, D]
    x_flat = x.reshape(B_pad * Lp, D).astype(jnp.float32)

    # ---- host-precomputed grid-invariant constants (hoisted out of the kernel) ----
    r = jnp.arange(TBL)
    same_sample = (r[:, None] // Lp) == (r[None, :] // Lp)
    causal = r[None, :] <= r[:, None]
    mask_bias = jnp.where(same_sample & causal, 0.0, MASK_NEG).astype(jnp.float32)  # [TBL,TBL]
    seg = ((r[:, None] // Lp) == jnp.arange(LANE)[None, :]).astype(jnp.float32)     # [TBL,128]

    valid = (jnp.arange(Lp)[None, :] < lens_p[:, None]).astype(jnp.float32)         # [B_pad,Lp]
    valid = valid.reshape(G, 1, TBL)

    thr_row = jnp.ones((G, 1, LANE), jnp.float32)                                   # lane-dense
    thr_row = thr_row.at[:, 0, :TB].set(thr_p.astype(jnp.float32).reshape(G, TB))

    weights = [params[k] for k in ('ln1_g', 'ln1_b', 'wqkv', 'bqkv', 'wproj', 'bproj',
                                   'ln2_g', 'ln2_b', 'wfc', 'bfc', 'wout', 'bout',
                                   'lnf_g', 'lnf_b')]

    grid_spec = pltpu.PrefetchScalarGridSpec(
        num_scalar_prefetch=0,
        grid=(G,),
        in_specs=[pl.BlockSpec((TBL, D), lambda g: (g, 0)),           # activations
                  pl.BlockSpec((1, 1, TBL), lambda g: (g, 0, 0)),     # 0/1 length validity
                  pl.BlockSpec((1, 1, LANE), lambda g: (g, 0, 0)),    # thresholds (lane-dense)
                  _const_spec(mask_bias.shape),                       # additive attn mask
                  _const_spec(seg.shape)]                             # per-sample segment mat
                 + [_const_spec(w.shape) for w in weights],
        out_specs=[pl.BlockSpec((1, 1, TBL), lambda g: (g, 0, 0)),    # lane-dense scores
                   pl.BlockSpec((1, 1, LANE), lambda g: (g, 0, 0))],  # lane-dense reg loss
    )
    scores3, loss3 = pl.pallas_call(
        encoder_block_kernel,
        out_shape=(jax.ShapeDtypeStruct((G, 1, TBL), jnp.float32),
                   jax.ShapeDtypeStruct((G, 1, LANE), jnp.float32)),
        grid_spec=grid_spec,
        # batch blocks are independent -> shard across v7x's two TensorCores
        compiler_params=pltpu.CompilerParams(
            dimension_semantics=("parallel",),
            vmem_limit_bytes=32 * 1024 * 1024),
    )(x_flat, valid, thr_row, mask_bias, seg, *weights)

    scores = scores3.reshape(B_pad, Lp)[:B]
    loss = loss3[:, 0, :TB].reshape(B_pad)[:B]
    return scores, loss


# ============================= plain-JAX glue =============================
def get_threshold(lens, threshold):
    if threshold >= 1:
        return jnp.full_like(lens, int(math.floor(threshold)))
    return jnp.floor(lens.astype(jnp.float32) * threshold).astype(jnp.int32)


def gather_with_idx(idx, t):
    g = jnp.take_along_axis(t, idx, axis=-1)
    return g * (idx != 0).astype(t.dtype)


def encoder_forward(sentence, lengths, params):
    # matches Encoder.forward
    sent = sentence[:, 1:]
    lens = (lengths - 1).astype(jnp.int32)
    B, Lp = sent.shape
    thr = get_threshold(lens, KEYWORD_THRESHOLD)

    # hot path in Pallas: transformer block + aggregate + sigmoid + length mask + reg loss
    scores, loss = run_encoder_kernel(sent, lens, thr, params)

    # TODO(synk): argsort / gather / dynamic trim are done in plain JAX
    # (data-dependent sort/gather has no clean Pallas TPU equivalent).
    sorted_idx = jnp.argsort(-scores, axis=-1)
    scores_g = gather_with_idx(sorted_idx, scores)
    pos = jnp.arange(Lp)[None, :]
    keep = pos < (thr + THRESHOLD_GAP)[:, None]
    scores_g = jnp.where(keep, scores_g, 0.0)

    keywords = gather_with_idx(sorted_idx, sent)
    keywords = jnp.where(keep, keywords, PAD_ID)
    kw_lens = (keywords != PAD_ID).sum(-1)
    max_kw = int(kw_lens.max())                     # dynamic trim (eager, host-side)
    return (keywords[:, :max_kw], kw_lens, scores_g[:, :max_kw], loss,
            (scores, lens, thr))


# ============================= reference (pure JAX) =============================
def ref_scores_and_loss(sent, lens, thr, p):
    B, L = sent.shape
    D = D_MODEL
    x = p['wte'][sent] + p['wpe'][:L][None, :, :]

    def ln(v, g, bb):
        mu = v.mean(-1, keepdims=True)
        var = ((v - mu) ** 2).mean(-1, keepdims=True)
        return (v - mu) * lax.rsqrt(var + LN_EPS) * g + bb

    h1 = ln(x, p['ln1_g'], p['ln1_b'])
    qkv = h1 @ p['wqkv'] + p['bqkv']
    q, k, v = qkv[..., :D], qkv[..., D:2 * D], qkv[..., 2 * D:]
    causal = jnp.tril(jnp.ones((L, L), bool))
    outs = []
    for hh in range(NUM_HEADS):
        sl = slice(hh * HEAD_DIM, (hh + 1) * HEAD_DIM)
        att = jnp.einsum('bqd,bkd->bqk', q[..., sl], k[..., sl]) * (1.0 / math.sqrt(HEAD_DIM))
        att = jnp.where(causal, att, -1e30)
        att = jax.nn.softmax(att, axis=-1)
        outs.append(jnp.einsum('bqk,bkd->bqd', att, v[..., sl]))
    x = x + jnp.concatenate(outs, -1) @ p['wproj'] + p['bproj']
    h2 = ln(x, p['ln2_g'], p['ln2_b'])
    m = jax.nn.gelu(h2 @ p['wfc'] + p['bfc'], approximate=True)
    x = x + m @ p['wout'] + p['bout']
    hf = ln(x, p['lnf_g'], p['lnf_b'])
    agg = hf.mean(-1) if TRANSFORMER_POOL == "mean" else hf.max(-1)
    sc = jax.nn.sigmoid(agg)
    sc = jnp.where(jnp.arange(L)[None, :] < lens[:, None], sc, 0.0)
    loss = jnp.sqrt(sc).sum(-1) / thr.astype(jnp.float32) - 1.0
    return sc, loss


# ============================= params =============================
def make_params(key):
    ks = jax.random.split(key, 6)
    init = lambda k, shape: (0.02 * jax.random.normal(k, shape, jnp.float32))
    return dict(
        wte=init(ks[0], (VOCAB, D_MODEL)),
        wpe=init(ks[1], (MAX_POS, D_MODEL)),
        ln1_g=jnp.ones((1, D_MODEL), jnp.float32), ln1_b=jnp.zeros((1, D_MODEL), jnp.float32),
        wqkv=init(ks[2], (D_MODEL, 3 * D_MODEL)), bqkv=jnp.zeros((1, 3 * D_MODEL), jnp.float32),
        wproj=init(ks[3], (D_MODEL, D_MODEL)), bproj=jnp.zeros((1, D_MODEL), jnp.float32),
        ln2_g=jnp.ones((1, D_MODEL), jnp.float32), ln2_b=jnp.zeros((1, D_MODEL), jnp.float32),
        wfc=init(ks[4], (D_MODEL, D_FF)), bfc=jnp.zeros((1, D_FF), jnp.float32),
        wout=init(ks[5], (D_FF, D_MODEL)), bout=jnp.zeros((1, D_MODEL), jnp.float32),
        lnf_g=jnp.ones((1, D_MODEL), jnp.float32), lnf_b=jnp.zeros((1, D_MODEL), jnp.float32),
    )


if __name__ == "__main__":
    key = jax.random.PRNGKey(0)
    kp, kt = jax.random.split(key)
    params = make_params(kp)

    B, L0 = 2, 9
    lengths = jnp.array([9, 6], jnp.int32)
    tokens = jax.random.randint(kt, (B, L0), 2, VOCAB, dtype=jnp.int32)
    posr = jnp.arange(L0)[None, :]
    sentence = jnp.where(posr < lengths[:, None], tokens, PAD_ID).astype(jnp.int32)
    sentence = sentence.at[:, 0].set(1)   # leading BOS-like token (dropped by forward)

    keywords, kw_lens, scores_srt, reg_loss, (raw_scores, lens, thr) = \
        encoder_forward(sentence, lengths, params)
    jax.block_until_ready((keywords, kw_lens, scores_srt, reg_loss, raw_scores))

    # correctness check of the Pallas hot path against a pure-JAX reference
    ref_sc, ref_loss = ref_scores_and_loss(sentence[:, 1:], lens, thr, params)
    assert jnp.allclose(raw_scores, ref_sc, atol=5e-3, rtol=5e-3), "scores mismatch"
    assert jnp.allclose(reg_loss, ref_loss, atol=5e-3, rtol=5e-3), "loss mismatch"

    print("KERNEL_OK")
</pallas_src>

<mosaic_0001>
module attributes {stable_mosaic.version = 11 : i64} {
  func.func @encoder_block_kernel(%arg0: i32, %arg1: memref<128x32xf32, #tpu.memory_space<vmem>>, %arg2: memref<1x1x128xf32, #tpu.memory_space<vmem>>, %arg3: memref<1x1x128xf32, #tpu.memory_space<vmem>>, %arg4: memref<128x128xf32, #tpu.memory_space<vmem>>, %arg5: memref<128x128xf32, #tpu.memory_space<vmem>>, %arg6: memref<1x32xf32, #tpu.memory_space<vmem>>, %arg7: memref<1x32xf32, #tpu.memory_space<vmem>>, %arg8: memref<32x96xf32, #tpu.memory_space<vmem>>, %arg9: memref<1x96xf32, #tpu.memory_space<vmem>>, %arg10: memref<32x32xf32, #tpu.memory_space<vmem>>, %arg11: memref<1x32xf32, #tpu.memory_space<vmem>>, %arg12: memref<1x32xf32, #tpu.memory_space<vmem>>, %arg13: memref<1x32xf32, #tpu.memory_space<vmem>>, %arg14: memref<32x128xf32, #tpu.memory_space<vmem>>, %arg15: memref<1x128xf32, #tpu.memory_space<vmem>>, %arg16: memref<128x32xf32, #tpu.memory_space<vmem>>, %arg17: memref<1x32xf32, #tpu.memory_space<vmem>>, %arg18: memref<1x32xf32, #tpu.memory_space<vmem>>, %arg19: memref<1x32xf32, #tpu.memory_space<vmem>>, %arg20: memref<1x1x128xf32, #tpu.memory_space<vmem>>, %arg21: memref<1x1x128xf32, #tpu.memory_space<vmem>>) attributes {dimension_semantics = [#tpu.dimension_semantics<parallel>], iteration_bounds = array<i64: 1>, scalar_prefetch = 0 : i64, scratch_operands = 0 : i64, tpu.core_type = #tpu.core_type<tc>, window_params = [{transform_indices = @transform_0, window_bounds = array<i64: 128, 32>}, {transform_indices = @transform_1, window_bounds = array<i64: 1, 1, 128>}, {transform_indices = @transform_2, window_bounds = array<i64: 1, 1, 128>}, {pipeline_mode = #tpu.pipeline_mode<synchronous>, transform_indices = @transform_3, window_bounds = array<i64: 128, 128>}, {pipeline_mode = #tpu.pipeline_mode<synchronous>, transform_indices = @transform_4, window_bounds = array<i64: 128, 128>}, {pipeline_mode = #tpu.pipeline_mode<synchronous>, transform_indices = @transform_5, window_bounds = array<i64: 1, 32>}, {pipeline_mode = #tpu.pipeline_mode<synchronous>, transform_indices = @transform_6, window_bounds = array<i64: 1, 32>}, {pipeline_mode = #tpu.pipeline_mode<synchronous>, transform_indices = @transform_7, window_bounds = array<i64: 32, 96>}, {pipeline_mode = #tpu.pipeline_mode<synchronous>, transform_indices = @transform_8, window_bounds = array<i64: 1, 96>}, {pipeline_mode = #tpu.pipeline_mode<synchronous>, transform_indices = @transform_9, window_bounds = array<i64: 32, 32>}, {pipeline_mode = #tpu.pipeline_mode<synchronous>, transform_indices = @transform_10, window_bounds = array<i64: 1, 32>}, {pipeline_mode = #tpu.pipeline_mode<synchronous>, transform_indices = @transform_11, window_bounds = array<i64: 1, 32>}, {pipeline_mode = #tpu.pipeline_mode<synchronous>, transform_indices = @transform_12, window_bounds = array<i64: 1, 32>}, {pipeline_mode = #tpu.pipeline_mode<synchronous>, transform_indices = @transform_13, window_bounds = array<i64: 32, 128>}, {pipeline_mode = #tpu.pipeline_mode<synchronous>, transform_indices = @transform_14, window_bounds = array<i64: 1, 128>}, {pipeline_mode = #tpu.pipeline_mode<synchronous>, transform_indices = @transform_15, window_bounds = array<i64: 128, 32>}, {pipeline_mode = #tpu.pipeline_mode<synchronous>, transform_indices = @transform_16, window_bounds = array<i64: 1, 32>}, {pipeline_mode = #tpu.pipeline_mode<synchronous>, transform_indices = @transform_17, window_bounds = array<i64: 1, 32>}, {pipeline_mode = #tpu.pipeline_mode<synchronous>, transform_indices = @transform_18, window_bounds = array<i64: 1, 32>}, {transform_indices = @transform_19, window_bounds = array<i64: 1, 1, 128>}, {transform_indices = @transform_20, window_bounds = array<i64: 1, 1, 128>}]} {
    %c0 = arith.constant 0 : index
    %c0_0 = arith.constant 0 : index
    %0 = vector.load %arg1[%c0, %c0_0] : memref<128x32xf32, #tpu.memory_space<vmem>>, vector<128x32xf32>
    %c0_1 = arith.constant 0 : index
    %c0_2 = arith.constant 0 : index
    %1 = vector.load %arg6[%c0_1, %c0_2] : memref<1x32xf32, #tpu.memory_space<vmem>>, vector<1x32xf32>
    %c0_3 = arith.constant 0 : index
    %c0_4 = arith.constant 0 : index
    %2 = vector.load %arg7[%c0_3, %c0_4] : memref<1x32xf32, #tpu.memory_space<vmem>>, vector<1x32xf32>
    %cst = arith.constant dense<0.000000e+00> : vector<128xf32>
    %3 = vector.multi_reduction <add>, %0, %cst [1] : vector<128x32xf32> to vector<128xf32>
    %4 = vector.shape_cast %3 : vector<128xf32> to vector<128x1xf32>
    %cst_5 = arith.constant 3.125000e-02 : f32
    %5 = vector.broadcast %cst_5 : f32 to vector<128x1xf32>
    %6 = arith.mulf %4, %5 : vector<128x1xf32>
    %7 = vector.broadcast %6 : vector<128x1xf32> to vector<128x32xf32>
    %8 = arith.subf %0, %7 : vector<128x32xf32>
    %9 = arith.mulf %8, %8 : vector<128x32xf32>
    %cst_6 = arith.constant dense<0.000000e+00> : vector<128xf32>
    %10 = vector.multi_reduction <add>, %9, %cst_6 [1] : vector<128x32xf32> to vector<128xf32>
    %11 = vector.shape_cast %10 : vector<128xf32> to vector<128x1xf32>
    %cst_7 = arith.constant 3.125000e-02 : f32
    %12 = vector.broadcast %cst_7 : f32 to vector<128x1xf32>
    %13 = arith.mulf %11, %12 : vector<128x1xf32>
    %cst_8 = arith.constant 9.99999974E-6 : f32
    %14 = vector.broadcast %cst_8 : f32 to vector<128x1xf32>
    %15 = arith.addf %13, %14 : vector<128x1xf32>
    %16 = math.rsqrt %15 : vector<128x1xf32>
    %17 = vector.broadcast %16 : vector<128x1xf32> to vector<128x32xf32>
    %18 = arith.mulf %8, %17 : vector<128x32xf32>
    %19 = vector.broadcast %1 : vector<1x32xf32> to vector<128x32xf32>
    %20 = arith.mulf %18, %19 : vector<128x32xf32>
    %21 = vector.broadcast %2 : vector<1x32xf32> to vector<128x32xf32>
    %22 = arith.addf %20, %21 : vector<128x32xf32>
    %c0_9 = arith.constant 0 : index
    %c0_10 = arith.constant 0 : index
    %23 = vector.load %arg8[%c0_9, %c0_10] : memref<32x96xf32, #tpu.memory_space<vmem>>, vector<32x96xf32>
    %cst_11 = arith.constant dense<0.000000e+00> : vector<128x96xf32>
    %24 = tpu.matmul %22, %23, %cst_11 {dimension_numbers = #tpu.dot_dimension_numbers<[1], [0], [0], [1], [0, 0, 1, 1], [], []>} : vector<128x32xf32>, vector<32x96xf32>, vector<128x96xf32> -> vector<128x96xf32>
    %c0_12 = arith.constant 0 : index
    %c0_13 = arith.constant 0 : index
    %25 = vector.load %arg9[%c0_12, %c0_13] : memref<1x96xf32, #tpu.memory_space<vmem>>, vector<1x96xf32>
    %26 = vector.broadcast %25 : vector<1x96xf32> to vector<128x96xf32>
    %27 = arith.addf %24, %26 : vector<128x96xf32>
    %c0_14 = arith.constant 0 : index
    %c0_15 = arith.constant 0 : index
    %28 = vector.load %arg4[%c0_14, %c0_15] : memref<128x128xf32, #tpu.memory_space<vmem>>, vector<128x128xf32>
    %c0_16 = arith.constant 0 : index
    %c0_17 = arith.constant 0 : index
    %29 = vector.load %arg10[%c0_16, %c0_17] : memref<32x32xf32, #tpu.memory_space<vmem>>, vector<32x32xf32>
    %30 = vector.extract_strided_slice %27 {offsets = [0, 0], sizes = [128, 16], strides = [1, 1]} : vector<128x96xf32> to vector<128x16xf32>
    %31 = vector.extract_strided_slice %27 {offsets = [0, 32], sizes = [128, 16], strides = [1, 1]} : vector<128x96xf32> to vector<128x16xf32>
    %32 = vector.extract_strided_slice %27 {offsets = [0, 64], sizes = [128, 16], strides = [1, 1]} : vector<128x96xf32> to vector<128x16xf32>
    %cst_18 = arith.constant dense<0.000000e+00> : vector<128x128xf32>
    %33 = tpu.matmul %30, %31, %cst_18 {dimension_numbers = #tpu.dot_dimension_numbers<[1], [1], [0], [0], [0, 0, 1, 0], [], []>} : vector<128x16xf32>, vector<128x16xf32>, vector<128x128xf32> -> vector<128x128xf32>
    %cst_19 = arith.constant 2.500000e-01 : f32
    %34 = vector.broadcast %cst_19 : f32 to vector<128x128xf32>
    %35 = arith.mulf %33, %34 : vector<128x128xf32>
    %36 = arith.addf %35, %28 : vector<128x128xf32>
    %cst_20 = arith.constant dense<0xFF800000> : vector<128xf32>
    %37 = vector.multi_reduction <maximumf>, %36, %cst_20 [1] : vector<128x128xf32> to vector<128xf32>
    %38 = vector.shape_cast %37 : vector<128xf32> to vector<128x1xf32>
    %39 = vector.broadcast %38 : vector<128x1xf32> to vector<128x128xf32>
    %40 = arith.subf %36, %39 : vector<128x128xf32>
    %41 = math.exp %40 : vector<128x128xf32>
    %cst_21 = arith.constant dense<0.000000e+00> : vector<128xf32>
    %42 = vector.multi_reduction <add>, %41, %cst_21 [1] : vector<128x128xf32> to vector<128xf32>
    %43 = vector.shape_cast %42 : vector<128xf32> to vector<128x1xf32>
    %44 = tpu.reciprocal %43 {approx = true} : vector<128x1xf32> -> vector<128x1xf32>
    %45 = vector.broadcast %44 : vector<128x1xf32> to vector<128x128xf32>
    %46 = arith.mulf %41, %45 : vector<128x128xf32>
    %cst_22 = arith.constant dense<0.000000e+00> : vector<128x16xf32>
    %47 = tpu.matmul %46, %32, %cst_22 {dimension_numbers = #tpu.dot_dimension_numbers<[1], [0], [0], [1], [0, 0, 1, 1], [], []>} : vector<128x128xf32>, vector<128x16xf32>, vector<128x16xf32> -> vector<128x16xf32>
    %48 = vector.extract_strided_slice %29 {offsets = [0, 0], sizes = [16, 32], strides = [1, 1]} : vector<32x32xf32> to vector<16x32xf32>
    %cst_23 = arith.constant dense<0.000000e+00> : vector<128x32xf32>
    %49 = tpu.matmul %47, %48, %cst_23 {dimension_numbers = #tpu.dot_dimension_numbers<[1], [0], [0], [1], [0, 0, 1, 1], [], []>} : vector<128x16xf32>, vector<16x32xf32>, vector<128x32xf32> -> vector<128x32xf32>
    %50 = vector.extract_strided_slice %27 {offsets = [0, 16], sizes = [128, 16], strides = [1, 1]} : vector<128x96xf32> to vector<128x16xf32>
    %51 = vector.extract_strided_slice %27 {offsets = [0, 48], sizes = [128, 16], strides = [1, 1]} : vector<128x96xf32> to vector<128x16xf32>
    %52 = vector.extract_strided_slice %27 {offsets = [0, 80], sizes = [128, 16], strides = [1, 1]} : vector<128x96xf32> to vector<128x16xf32>
    %cst_24 = arith.constant dense<0.000000e+00> : vector<128x128xf32>
    %53 = tpu.matmul %50, %51, %cst_24 {dimension_numbers = #tpu.dot_dimension_numbers<[1], [1], [0], [0], [0, 0, 1, 0], [], []>} : vector<128x16xf32>, vector<128x16xf32>, vector<128x128xf32> -> vector<128x128xf32>
    %cst_25 = arith.constant 2.500000e-01 : f32
    %54 = vector.broadcast %cst_25 : f32 to vector<128x128xf32>
    %55 = arith.mulf %53, %54 : vector<128x128xf32>
    %56 = arith.addf %55, %28 : vector<128x128xf32>
    %cst_26 = arith.constant dense<0xFF800000> : vector<128xf32>
    %57 = vector.multi_reduction <maximumf>, %56, %cst_26 [1] : vector<128x128xf32> to vector<128xf32>
    %58 = vector.shape_cast %57 : vector<128xf32> to vector<128x1xf32>
    %59 = vector.broadcast %58 : vector<128x1xf32> to vector<128x128xf32>
    %60 = arith.subf %56, %59 : vector<128x128xf32>
    %61 = math.exp %60 : vector<128x128xf32>
    %cst_27 = arith.constant dense<0.000000e+00> : vector<128xf32>
    %62 = vector.multi_reduction <add>, %61, %cst_27 [1] : vector<128x128xf32> to vector<128xf32>
    %63 = vector.shape_cast %62 : vector<128xf32> to vector<128x1xf32>
    %64 = tpu.reciprocal %63 {approx = true} : vector<128x1xf32> -> vector<128x1xf32>
    %65 = vector.broadcast %64 : vector<128x1xf32> to vector<128x128xf32>
    %66 = arith.mulf %61, %65 : vector<128x128xf32>
    %cst_28 = arith.constant dense<0.000000e+00> : vector<128x16xf32>
    %67 = tpu.matmul %66, %52, %cst_28 {dimension_numbers = #tpu.dot_dimension_numbers<[1], [0], [0], [1], [0, 0, 1, 1], [], []>} : vector<128x128xf32>, vector<128x16xf32>, vector<128x16xf32> -> vector<128x16xf32>
    %68 = vector.extract_strided_slice %29 {offsets = [16, 0], sizes = [16, 32], strides = [1, 1]} : vector<32x32xf32> to vector<16x32xf32>
    %cst_29 = arith.constant dense<0.000000e+00> : vector<128x32xf32>
    %69 = tpu.matmul %67, %68, %cst_29 {dimension_numbers = #tpu.dot_dimension_numbers<[1], [0], [0], [1], [0, 0, 1, 1], [], []>} : vector<128x16xf32>, vector<16x32xf32>, vector<128x32xf32> -> vector<128x32xf32>
    %70 = arith.addf %49, %69 : vector<128x32xf32>
    %71 = arith.addf %0, %70 : vector<128x32xf32>
    %c0_30 = arith.constant 0 : index
    %c0_31 = arith.constant 0 : index
    %72 = vector.load %arg11[%c0_30, %c0_31] : memref<1x32xf32, #tpu.memory_space<vmem>>, vector<1x32xf32>
    %73 = vector.broadcast %72 : vector<1x32xf32> to vector<128x32xf32>
    %74 = arith.addf %71, %73 : vector<128x32xf32>
    %c0_32 = arith.constant 0 : index
    %c0_33 = arith.constant 0 : index
    %75 = vector.load %arg12[%c0_32, %c0_33] : memref<1x32xf32, #tpu.memory_space<vmem>>, vector<1x32xf32>
    %c0_34 = arith.constant 0 : index
    %c0_35 = arith.constant 0 : index
    %76 = vector.load %arg13[%c0_34, %c0_35] : memref<1x32xf32, #tpu.memory_space<vmem>>, vector<1x32xf32>
    %cst_36 = arith.constant dense<0.000000e+00> : vector<128xf32>
    %77 = vector.multi_reduction <add>, %74, %cst_36 [1] : vector<128x32xf32> to vector<128xf32>
    %78 = vector.shape_cast %77 : vector<128xf32> to vector<128x1xf32>
    %cst_37 = arith.constant 3.125000e-02 : f32
    %79 = vector.broadcast %cst_37 : f32 to vector<128x1xf32>
    %80 = arith.mulf %78, %79 : vector<128x1xf32>
    %81 = vector.broadcast %80 : vector<128x1xf32> to vector<128x32xf32>
    %82 = arith.subf %74, %81 : vector<128x32xf32>
    %83 = arith.mulf %82, %82 : vector<128x32xf32>
    %cst_38 = arith.constant dense<0.000000e+00> : vector<128xf32>
    %84 = vector.multi_reduction <add>, %83, %cst_38 [1] : vector<128x32xf32> to vector<128xf32>
    %85 = vector.shape_cast %84 : vector<128xf32> to vector<128x1xf32>
    %cst_39 = arith.constant 3.125000e-02 : f32
    %86 = vector.broadcast %cst_39 : f32 to vector<128x1xf32>
    %87 = arith.mulf %85, %86 : vector<128x1xf32>
    %cst_40 = arith.constant 9.99999974E-6 : f32
    %88 = vector.broadcast %cst_40 : f32 to vector<128x1xf32>
    %89 = arith.addf %87, %88 : vector<128x1xf32>
    %90 = math.rsqrt %89 : vector<128x1xf32>
    %91 = vector.broadcast %90 : vector<128x1xf32> to vector<128x32xf32>
    %92 = arith.mulf %82, %91 : vector<128x32xf32>
    %93 = vector.broadcast %75 : vector<1x32xf32> to vector<128x32xf32>
    %94 = arith.mulf %92, %93 : vector<128x32xf32>
    %95 = vector.broadcast %76 : vector<1x32xf32> to vector<128x32xf32>
    %96 = arith.addf %94, %95 : vector<128x32xf32>
    %c0_41 = arith.constant 0 : index
    %c0_42 = arith.constant 0 : index
    %97 = vector.load %arg14[%c0_41, %c0_42] : memref<32x128xf32, #tpu.memory_space<vmem>>, vector<32x128xf32>
    %cst_43 = arith.constant dense<0.000000e+00> : vector<128x128xf32>
    %98 = tpu.matmul %96, %97, %cst_43 {dimension_numbers = #tpu.dot_dimension_numbers<[1], [0], [0], [1], [0, 0, 1, 1], [], []>} : vector<128x32xf32>, vector<32x128xf32>, vector<128x128xf32> -> vector<128x128xf32>
    %c0_44 = arith.constant 0 : index
    %c0_45 = arith.constant 0 : index
    %99 = vector.load %arg15[%c0_44, %c0_45] : memref<1x128xf32, #tpu.memory_space<vmem>>, vector<1x128xf32>
    %100 = vector.broadcast %99 : vector<1x128xf32> to vector<128x128xf32>
    %101 = arith.addf %98, %100 : vector<128x128xf32>
    %102 = arith.mulf %101, %101 : vector<128x128xf32>
    %103 = arith.mulf %101, %102 : vector<128x128xf32>
    %cst_46 = arith.constant 4.471500e-02 : f32
    %104 = vector.broadcast %cst_46 : f32 to vector<128x128xf32>
    %105 = arith.mulf %104, %103 : vector<128x128xf32>
    %106 = arith.addf %101, %105 : vector<128x128xf32>
    %cst_47 = arith.constant 0.797884583 : f32
    %107 = vector.broadcast %cst_47 : f32 to vector<128x128xf32>
    %108 = arith.mulf %107, %106 : vector<128x128xf32>
    %109 = math.tanh %108 : vector<128x128xf32>
    %cst_48 = arith.constant 1.000000e+00 : f32
    %110 = vector.broadcast %cst_48 : f32 to vector<128x128xf32>
    %111 = arith.addf %110, %109 : vector<128x128xf32>
    %cst_49 = arith.constant 5.000000e-01 : f32
    %112 = vector.broadcast %cst_49 : f32 to vector<128x128xf32>
    %113 = arith.mulf %112, %111 : vector<128x128xf32>
    %114 = arith.mulf %101, %113 : vector<128x128xf32>
    %c0_50 = arith.constant 0 : index
    %c0_51 = arith.constant 0 : index
    %115 = vector.load %arg16[%c0_50, %c0_51] : memref<128x32xf32, #tpu.memory_space<vmem>>, vector<128x32xf32>
    %cst_52 = arith.constant dense<0.000000e+00> : vector<128x32xf32>
    %116 = tpu.matmul %114, %115, %cst_52 {dimension_numbers = #tpu.dot_dimension_numbers<[1], [0], [0], [1], [0, 0, 1, 1], [], []>} : vector<128x128xf32>, vector<128x32xf32>, vector<128x32xf32> -> vector<128x32xf32>
    %117 = arith.addf %74, %116 : vector<128x32xf32>
    %c0_53 = arith.constant 0 : index
    %c0_54 = arith.constant 0 : index
    %118 = vector.load %arg17[%c0_53, %c0_54] : memref<1x32xf32, #tpu.memory_space<vmem>>, vector<1x32xf32>
    %119 = vector.broadcast %118 : vector<1x32xf32> to vector<128x32xf32>
    %120 = arith.addf %117, %119 : vector<128x32xf32>
    %c0_55 = arith.constant 0 : index
    %c0_56 = arith.constant 0 : index
    %121 = vector.load %arg18[%c0_55, %c0_56] : memref<1x32xf32, #tpu.memory_space<vmem>>, vector<1x32xf32>
    %c0_57 = arith.constant 0 : index
    %c0_58 = arith.constant 0 : index
    %122 = vector.load %arg19[%c0_57, %c0_58] : memref<1x32xf32, #tpu.memory_space<vmem>>, vector<1x32xf32>
    %cst_59 = arith.constant dense<0.000000e+00> : vector<128xf32>
    %123 = vector.multi_reduction <add>, %120, %cst_59 [1] : vector<128x32xf32> to vector<128xf32>
    %124 = vector.shape_cast %123 : vector<128xf32> to vector<128x1xf32>
    %cst_60 = arith.constant 3.125000e-02 : f32
    %125 = vector.broadcast %cst_60 : f32 to vector<128x1xf32>
    %126 = arith.mulf %124, %125 : vector<128x1xf32>
    %127 = vector.broadcast %126 : vector<128x1xf32> to vector<128x32xf32>
    %128 = arith.subf %120, %127 : vector<128x32xf32>
    %129 = arith.mulf %128, %128 : vector<128x32xf32>
    %cst_61 = arith.constant dense<0.000000e+00> : vector<128xf32>
    %130 = vector.multi_reduction <add>, %129, %cst_61 [1] : vector<128x32xf32> to vector<128xf32>
    %131 = vector.shape_cast %130 : vector<128xf32> to vector<128x1xf32>
    %cst_62 = arith.constant 3.125000e-02 : f32
    %132 = vector.broadcast %cst_62 : f32 to vector<128x1xf32>
    %133 = arith.mulf %131, %132 : vector<128x1xf32>
    %cst_63 = arith.constant 9.99999974E-6 : f32
    %134 = vector.broadcast %cst_63 : f32 to vector<128x1xf32>
    %135 = arith.addf %133, %134 : vector<128x1xf32>
    %136 = math.rsqrt %135 : vector<128x1xf32>
    %137 = vector.broadcast %136 : vector<128x1xf32> to vector<128x32xf32>
    %138 = arith.mulf %128, %137 : vector<128x32xf32>
    %139 = vector.broadcast %121 : vector<1x32xf32> to vector<128x32xf32>
    %140 = arith.mulf %138, %139 : vector<128x32xf32>
    %141 = vector.broadcast %122 : vector<1x32xf32> to vector<128x32xf32>
    %142 = arith.addf %140, %141 : vector<128x32xf32>
    %cst_64 = arith.constant 1.000000e+00 : f32
    %143 = vector.broadcast %cst_64 : f32 to vector<1x32xf32>
    %cst_65 = arith.constant dense<0.000000e+00> : vector<1x128xf32>
    %144 = tpu.matmul %143, %142, %cst_65 {dimension_numbers = #tpu.dot_dimension_numbers<[1], [1], [0], [0], [0, 0, 1, 0], [], []>} : vector<1x32xf32>, vector<128x32xf32>, vector<1x128xf32> -> vector<1x128xf32>
    %cst_66 = arith.constant 3.125000e-02 : f32
    %145 = vector.broadcast %cst_66 : f32 to vector<1x128xf32>
    %146 = arith.mulf %144, %145 : vector<1x128xf32>
    %147 = arith.negf %146 : vector<1x128xf32>
    %148 = math.exp %147 : vector<1x128xf32>
    %cst_67 = arith.constant 1.000000e+00 : f32
    %149 = vector.broadcast %cst_67 : f32 to vector<1x128xf32>
    %150 = arith.addf %149, %148 : vector<1x128xf32>
    %151 = arith.divf %149, %150 : vector<1x128xf32>
    %c0_68 = arith.constant 0 : index
    %c0_69 = arith.constant 0 : index
    %c0_70 = arith.constant 0 : index
    %152 = vector.load %arg2[%c0_68, %c0_69, %c0_70] : memref<1x1x128xf32, #tpu.memory_space<vmem>>, vector<1x1x128xf32>
    %153 = vector.shape_cast %152 : vector<1x1x128xf32> to vector<1x128xf32>
    %154 = arith.mulf %151, %153 : vector<1x128xf32>
    %155 = vector.shape_cast %154 : vector<1x128xf32> to vector<1x1x128xf32>
    %c0_71 = arith.constant 0 : index
    %c0_72 = arith.constant 0 : index
    %c0_73 = arith.constant 0 : index
    %156 = vector.load %arg20[%c0_71, %c0_72, %c0_73] : memref<1x1x128xf32, #tpu.memory_space<vmem>>, vector<1x1x128xf32>
    tpu.vector_store %arg20[%c0_71, %c0_72, %c0_73], %155 {strides = array<i32>} : memref<1x1x128xf32, #tpu.memory_space<vmem>>, vector<1x1x128xf32>,
    %157 = math.sqrt %154 : vector<1x128xf32>
    %c0_74 = arith.constant 0 : index
    %c0_75 = arith.constant 0 : index
    %158 = vector.load %arg5[%c0_74, %c0_75] : memref<128x128xf32, #tpu.memory_space<vmem>>, vector<128x128xf32>
    %cst_76 = arith.constant dense<0.000000e+00> : vector<1x128xf32>
    %159 = tpu.matmul %157, %158, %cst_76 {dimension_numbers = #tpu.dot_dimension_numbers<[1], [0], [0], [1], [0, 0, 1, 1], [], []>} : vector<1x128xf32>, vector<128x128xf32>, vector<1x128xf32> -> vector<1x128xf32>
    %c0_77 = arith.constant 0 : index
    %c0_78 = arith.constant 0 : index
    %c0_79 = arith.constant 0 : index
    %160 = vector.load %arg3[%c0_77, %c0_78, %c0_79] : memref<1x1x128xf32, #tpu.memory_space<vmem>>, vector<1x1x128xf32>
    %161 = vector.shape_cast %160 : vector<1x1x128xf32> to vector<1x128xf32>
    %162 = arith.divf %159, %161 : vector<1x128xf32>
    %cst_80 = arith.constant 1.000000e+00 : f32
    %163 = vector.broadcast %cst_80 : f32 to vector<1x128xf32>
    %164 = arith.subf %162, %163 : vector<1x128xf32>
    %165 = vector.shape_cast %164 : vector<1x128xf32> to vector<1x1x128xf32>
    %c0_81 = arith.constant 0 : index
    %c0_82 = arith.constant 0 : index
    %c0_83 = arith.constant 0 : index
    %166 = vector.load %arg21[%c0_81, %c0_82, %c0_83] : memref<1x1x128xf32, #tpu.memory_space<vmem>>, vector<1x1x128xf32>
    tpu.vector_store %arg21[%c0_81, %c0_82, %c0_83], %165 {strides = array<i32>} : memref<1x1x128xf32, #tpu.memory_space<vmem>>, vector<1x1x128xf32>,
    return
  }
  func.func @transform_0(%arg0: i32) -> (i32, i32) {
    %c0_i32 = arith.constant 0 : i32
    %c0_i32_0 = arith.constant 0 : i32
    return %arg0, %c0_i32 : i32, i32
  }
  func.func @transform_1(%arg0: i32) -> (i32, i32, i32) {
    %c0_i32 = arith.constant 0 : i32
    %c0_i32_0 = arith.constant 0 : i32
    %c0_i32_1 = arith.constant 0 : i32
    return %arg0, %c0_i32, %c0_i32_0 : i32, i32, i32
  }
  func.func @transform_2(%arg0: i32) -> (i32, i32, i32) {
    %c0_i32 = arith.constant 0 : i32
    %c0_i32_0 = arith.constant 0 : i32
    %c0_i32_1 = arith.constant 0 : i32
    return %arg0, %c0_i32, %c0_i32_0 : i32, i32, i32
  }
  func.func @transform_3(%arg0: i32) -> (i32, i32) {
    %c0_i32 = arith.constant 0 : i32
    %c0_i32_0 = arith.constant 0 : i32
    %c0_i32_1 = arith.constant 0 : i32
    return %c0_i32, %c0_i32_0 : i32, i32
  }
  func.func @transform_4(%arg0: i32) -> (i32, i32) {
    %c0_i32 = arith.constant 0 : i32
    %c0_i32_0 = arith.constant 0 : i32
    %c0_i32_1 = arith.constant 0 : i32
    return %c0_i32, %c0_i32_0 : i32, i32
  }
  func.func @transform_5(%arg0: i32) -> (i32, i32) {
    %c0_i32 = arith.constant 0 : i32
    %c0_i32_0 = arith.constant 0 : i32
    %c0_i32_1 = arith.constant 0 : i32
    return %c0_i32, %c0_i32_0 : i32, i32
  }
  func.func @transform_6(%arg0: i32) -> (i32, i32) {
    %c0_i32 = arith.constant 0 : i32
    %c0_i32_0 = arith.constant 0 : i32
    %c0_i32_1 = arith.constant 0 : i32
    return %c0_i32, %c0_i32_0 : i32, i32
  }
  func.func @transform_7(%arg0: i32) -> (i32, i32) {
    %c0_i32 = arith.constant 0 : i32
    %c0_i32_0 = arith.constant 0 : i32
    %c0_i32_1 = arith.constant 0 : i32
    return %c0_i32, %c0_i32_0 : i32, i32
  }
  func.func @transform_8(%arg0: i32) -> (i32, i32) {
    %c0_i32 = arith.constant 0 : i32
    %c0_i32_0 = arith.constant 0 : i32
    %c0_i32_1 = arith.constant 0 : i32
    return %c0_i32, %c0_i32_0 : i32, i32
  }
  func.func @transform_9(%arg0: i32) -> (i32, i32) {
    %c0_i32 = arith.constant 0 : i32
    %c0_i32_0 = arith.constant 0 : i32
    %c0_i32_1 = arith.constant 0 : i32
    return %c0_i32, %c0_i32_0 : i32, i32
  }
  func.func @transform_10(%arg0: i32) -> (i32, i32) {
    %c0_i32 = arith.constant 0 : i32
    %c0_i32_0 = arith.constant 0 : i32
    %c0_i32_1 = arith.constant 0 : i32
    return %c0_i32, %c0_i32_0 : i32, i32
  }
  func.func @transform_11(%arg0: i32) -> (i32, i32) {
    %c0_i32 = arith.constant 0 : i32
    %c0_i32_0 = arith.constant 0 : i32
    %c0_i32_1 = arith.constant 0 : i32
    return %c0_i32, %c0_i32_0 : i32, i32
  }
  func.func @transform_12(%arg0: i32) -> (i32, i32) {
    %c0_i32 = arith.constant 0 : i32
    %c0_i32_0 = arith.constant 0 : i32
    %c0_i32_1 = arith.constant 0 : i32
    return %c0_i32, %c0_i32_0 : i32, i32
  }
  func.func @transform_13(%arg0: i32) -> (i32, i32) {
    %c0_i32 = arith.constant 0 : i32
    %c0_i32_0 = arith.constant 0 : i32
    %c0_i32_1 = arith.constant 0 : i32
    return %c0_i32, %c0_i32_0 : i32, i32
  }
  func.func @transform_14(%arg0: i32) -> (i32, i32) {
    %c0_i32 = arith.constant 0 : i32
    %c0_i32_0 = arith.constant 0 : i32
    %c0_i32_1 = arith.constant 0 : i32
    return %c0_i32, %c0_i32_0 : i32, i32
  }
  func.func @transform_15(%arg0: i32) -> (i32, i32) {
    %c0_i32 = arith.constant 0 : i32
    %c0_i32_0 = arith.constant 0 : i32
    %c0_i32_1 = arith.constant 0 : i32
    return %c0_i32, %c0_i32_0 : i32, i32
  }
  func.func @transform_16(%arg0: i32) -> (i32, i32) {
    %c0_i32 = arith.constant 0 : i32
    %c0_i32_0 = arith.constant 0 : i32
    %c0_i32_1 = arith.constant 0 : i32
    return %c0_i32, %c0_i32_0 : i32, i32
  }
  func.func @transform_17(%arg0: i32) -> (i32, i32) {
    %c0_i32 = arith.constant 0 : i32
    %c0_i32_0 = arith.constant 0 : i32
    %c0_i32_1 = arith.constant 0 : i32
    return %c0_i32, %c0_i32_0 : i32, i32
  }
  func.func @transform_18(%arg0: i32) -> (i32, i32) {
    %c0_i32 = arith.constant 0 : i32
    %c0_i32_0 = arith.constant 0 : i32
    %c0_i32_1 = arith.constant 0 : i32
    return %c0_i32, %c0_i32_0 : i32, i32
  }
  func.func @transform_19(%arg0: i32) -> (i32, i32, i32) {
    %c0_i32 = arith.constant 0 : i32
    %c0_i32_0 = arith.constant 0 : i32
    %c0_i32_1 = arith.constant 0 : i32
    return %arg0, %c0_i32, %c0_i32_0 : i32, i32, i32
  }
  func.func @transform_20(%arg0: i32) -> (i32, i32, i32) {
    %c0_i32 = arith.constant 0 : i32
    %c0_i32_0 = arith.constant 0 : i32
    %c0_i32_1 = arith.constant 0 : i32
    return %arg0, %c0_i32, %c0_i32_0 : i32, i32, i32
  }
}

</mosaic_0001>

<bundles_post_ra>
// kernel: tpu_custom_call.1
= control target key start
LH: loop header
LB: loop body
LE: loop exit
PB: predicated region body
PF: predicated region fallthrough
CT: control target
= control target key end

     0   :  { %s5931_s0 = inlined_call_operand.vmem [shape: f32[128,32], index: 0, kind: input, shape index: {}]   ;;  %s5932_s1 = inlined_call_operand.hbm [shape: f32[1,1,128], index: 1, kind: input, shape index: {}]   ;;  %s5933_s2 = inlined_call_operand.hbm [shape: f32[1,1,128], index: 2, kind: input, shape index: {}]   ;;  %s5934_s3 = inlined_call_operand.vmem [shape: f32[128,128], index: 3, kind: input, shape index: {}]   ;;  %s5935_s4 = inlined_call_operand.vmem [shape: f32[128,128], index: 4, kind: input, shape index: {}]   ;;  %s5936_s5 = inlined_call_operand.vmem [shape: f32[1,32], index: 5, kind: input, shape index: {}]   ;;  %s5937_s6 = inlined_call_operand.vmem [shape: f32[1,32], index: 6, kind: input, shape index: {}]   ;;  %s5938_s7 = inlined_call_operand.vmem [shape: f32[32,96], index: 7, kind: input, shape index: {}]   ;;  %s5939_s8 = inlined_call_operand.vmem [shape: f32[1,96], index: 8, kind: input, shape index: {}]   ;;  %s5940_s9 = inlined_call_operand.hbm [shape: f32[32,32], index: 9, kind: input, shape index: {}]   ;;  %s5941_s10 = inlined_call_operand.vmem [shape: f32[1,32], index: 10, kind: input, shape index: {}]   ;;  %s5942_s11 = inlined_call_operand.vmem [shape: f32[1,32], index: 11, kind: input, shape index: {}]   ;;  %s5943_s12 = inlined_call_operand.vmem [shape: f32[1,32], index: 12, kind: input, shape index: {}]   ;;  %s5944_s13 = inlined_call_operand.hbm [shape: f32[32,128], index: 13, kind: input, shape index: {}]   ;;  %s5945_s14 = inlined_call_operand.vmem [shape: f32[1,128], index: 14, kind: input, shape index: {}]   ;;  %s5946_s15 = inlined_call_operand.vmem [shape: f32[128,32], index: 15, kind: input, shape index: {}]   ;;  %s5947_s16 = inlined_call_operand.vmem [shape: f32[1,32], index: 16, kind: input, shape index: {}]   ;;  %s5948_s17 = inlined_call_operand.vmem [shape: f32[1,32], index: 17, kind: input, shape index: {}]   ;;  %s5949_s18 = inlined_call_operand.vmem [shape: f32[1,32], index: 18, kind: input, shape index: {}]   ;;  %s5950_s19 = inlined_call_operand.hbm [shape: f32[1,1,128], index: 19, kind: output, shape index: {0}]   ;;  %s5951_s20 = inlined_call_operand.hbm [shape: f32[1,1,128], index: 20, kind: output, shape index: {1}]  }
   0x1   :  { %5955 = sst [smem:[#allocation18_spill]] %s5931_s0 }
   0x2   :  { %5956 = sst [smem:[#allocation19_spill]] %s5932_s1 }
   0x3   :  { %5957 = sst [smem:[#allocation20_spill]] %s5933_s2 }
   0x4   :  { %5958 = sst [smem:[#allocation21_spill]] %s5934_s3 }
   0x5   :  { %5959 = sst [smem:[#allocation22_spill]] %s5935_s4 }
   0x6   :  { %5960 = sst [smem:[#allocation23_spill]] %s5951_s20 }
   0x7   :  { %26 = vsyncpa [#allocation3], 0 }
   0x8   :  { %27 = vsyncpa [#allocation6], 0 }
   0x9   :  { %28 = vsyncpa [#allocation9], 0 }
   0xa   :  { %29 = vsyncpa [#allocation4], 0  ;;  %s5961_s23 = sld [smem:[#allocation20_spill]] }
  0x10   :  { %s49_s24 = sshll.u32 %s5961_s23, 4  ;;  %s50_s24 = int_to_ptr.hbm [resolvable:$true] %s49_s24 }
  0x11   :  { %30 = vsyncpa [#allocation12], 0  ;;  %s3940_s2 = smov [#allocation5]   ;;  %s5962_s27 = sld [smem:[#allocation19_spill]] }
  0x12   :  { %s51_s25 = sshll.u32 %s3940_s2, 4  ;;  %s3941_s4 = smov [#allocation2]   ;;  %s52_s25 = int_to_ptr.vmem [resolvable:$true] %s51_s25 }
  0x13   :  { %54 = dma.hbm_to_vmem [thread:$0]  %s50_s24, 16, %s52_s25, [#allocation6]  }
  0x14   :  { %s40_s29 = sshll.u32 %s3941_s4, 4  ;;  %s71_s21 = sshll.u32 %s5940_s9, 4  ;;  %s41_s29 = int_to_ptr.vmem [resolvable:$true] %s40_s29  ;;  %s72_s21 = int_to_ptr.hbm [resolvable:$true] %s71_s21 }
  0x15   :  { %s3942_s1 = smov [#allocation7]   ;;  %s90_s20 = sshll.u32 %s5944_s13, 4  ;;  %s91_s20 = int_to_ptr.hbm [resolvable:$true] %s90_s20 }
  0x16   :  { %s73_s22 = sshll.u32 %s3942_s1, 4  ;;  %s3943_s3 = smov 128   ;;  %s74_s22 = int_to_ptr.vmem [resolvable:$true] %s73_s22 }
  0x17   :  { %s38_s28 = sshll.u32 %s5962_s27, 4  ;;  %s3944_s26 = smov 8   ;;  %s39_s28 = int_to_ptr.hbm [resolvable:$true] %s38_s28 }
  0x18   :  { %43 = dma.hbm_to_vmem [thread:$0]  %s39_s28, 16, %s41_s29, [#allocation3]  }
  0x19   :  { %79 = dma.hbm_to_vmem [thread:$0]  %s72_s21, 512, %s74_s22, [#allocation6], %s3943_s3, %s3943_s3, %s3944_s26  }
  0x1a   :  { %s3945_s24 = smov [#allocation8]  }
  0x1b   :  { %s92_s25 = sshll.u32 %s3945_s24, 4  ;;  %s93_s25 = int_to_ptr.vmem [resolvable:$true] %s92_s25 }
  0x1c   :  { %98 = dma.hbm_to_vmem [thread:$0]  %s91_s20, 512, %s93_s25, [#allocation9], %s3943_s3, %s3943_s3, %s3944_s26  }
  0x1d   :  { %3930 = dma.done.wait [#allocation3], 16  }
  0x1e   :  { %3931 = vsyncadd [#allocation3], 4294967280 }
  0x1f   :  { %3932 = dma.done.wait [#allocation6], 528  }
  0x20   :  { %3933 = vsyncadd [#allocation6], 4294966768 }
  0x21   :  { %3934 = dma.done.wait [#allocation9], 512  }
  0x22   :  { %3935 = vsyncadd [#allocation9], 4294966784  ;;  %vm143_vm0 = vcmask 261120   ;;  %s5963_s28 = sld [smem:[#allocation18_spill]]  ;;  %s3946_s1 = smov 96  }
  0x23   :  { %s3948_s22 = smov 112   ;;  %s3949_s23 = smov 64  }
  0x24   :  { %s3950_s2 = smov 48   ;;  %s5978_s24 = sld [smem:[#allocation21_spill]] }
  0x25   :  { %s5990_s25 = sld [smem:[#allocation23_spill]] }
  0x28   :  { %v135_v0 = vld [vmem:[%s5963_s28 + $0x50] sm:$0xff]  ;;  %v133_v1 = vld [vmem:[%s5963_s28 + $0x40] sm:$0xff]  ;;  %v134_v5 = vld [vmem:[%s5963_s28 + $0x48] sm:$0xff] }
  0x29   :  { %v174_v2 = vsel %vm143_vm0, %v135_v0, 0.0  ;;  %v168_v3 = vsel %vm143_vm0, %v133_v1, 0.0  ;;  %v137_v4 = vld [vmem:[%s5963_s28 + $0x60] sm:$0xff]  ;;  %v136_v6 = vld [vmem:[%s5963_s28 + $0x58] sm:$0xff]  ;;  %v138_v8 = vld [vmem:[%s5963_s28 + $0x68] sm:$0xff]  ;;  %v171_v9 = vsel %vm143_vm0, %v134_v5, 0.0 }
  0x2a   :  { %175 = vadd.xlane.f32.xlu1 %v174_v2  ;;  %169 = vadd.xlane.f32.xlu0 %v168_v3  ;;  %v180_v7 = vsel %vm143_vm0, %v137_v4, 0.0  ;;  %v177_v10 = vsel %vm143_vm0, %v136_v6, 0.0  ;;  %v183_v11 = vsel %vm143_vm0, %v138_v8, 0.0  ;;  %v139_v12 = vld [vmem:[%s5963_s28 + $0x70] sm:$0xff]  ;;  %v4112_v28 = vld [vmem:[%s5963_s28 + $0x78] sm:$0xff]  ;;  %v4119_v30 = vld [vmem:[%s5963_s28 + $0x28] sm:$0xff] }
  0x2b   :  { %181 = vadd.xlane.f32.xlu2 %v180_v7  ;;  %v186_v13 = vsel %vm143_vm0, %v139_v12, 0.0  ;;  %v189_v33 = vsel %vm143_vm0, %v4112_v28, 0.0  ;;  %v159_v35 = vsel %vm143_vm0, %v4119_v30, 0.0  ;;  %v4135_v39 = vld [vmem:[%s5963_s28 + $0x20] sm:$0xff]  ;;  %v4154_v48 = vld [vmem:[%s5963_s28 + $0x30] sm:$0xff]  ;;  %v4159_v49 = vld [vmem:[%s5963_s28 + $0x8] sm:$0xff] }
  0x2c   :  { %v4140_v40 = vld [vmem:[%s5963_s28] sm:$0xff]  ;;  %v156_v43 = vsel %vm143_vm0, %v4135_v39, 0.0  ;;  %v162_v51 = vsel %vm143_vm0, %v4154_v48, 0.0  ;;  %v147_v54 = vsel %vm143_vm0, %v4159_v49, 0.0  ;;  %v4173_v57 = vld [vmem:[%s5963_s28 + $0x38] sm:$0xff]  ;;  %v4185_v62 = vld [vmem:[%s5963_s28 + $0x10] sm:$0xff] }
  0x2d   :  { %v144_v45 = vsel %vm143_vm0, %v4140_v40, 0.0  ;;  %v165_v59 = vsel %vm143_vm0, %v4173_v57, 0.0  ;;  %v537_v3 = vld [vmem:[%s5938_s7 + $0x18] sm:$0xff]  ;;  %s3230_s9 = sshll.u32 %s5990_s25, 4  ;;  %s3231_s9 = int_to_ptr.hbm [resolvable:$true] %s3230_s9 }
  0x2e   :  { %3395 = vmatpush.msra.mxu3 %v537_v3  ;;  %3394 = vmatpush.msra.mxu2 %v537_v3 }
  0x2f   :  { %602 = vmatpush.msra.mxu0 %v537_v3 }
  0x32   :  { %172 = vadd.xlane.f32.xlu0 %v171_v9  ;;  %178 = vadd.xlane.f32.xlu1 %v177_v10 }
  0x33   :  { %184 = vadd.xlane.f32.xlu2 %v183_v11 }
  0x3a   :  { %187 = vadd.xlane.f32.xlu1 %v186_v13 }
  0x9d   :  { %v176_v14 = vpop.xlane.xlu1 %175  ;;  %v170_v15 = vpop.xlane.xlu0 %169 }
  0x9e   :  { %v202_v16 = vmul.f32 0.03125, %v176_v14  ;;  %v200_v17 = vmul.f32 0.03125, %v170_v15  ;;  %v182_v31 = vpop.xlane.xlu2 %181 }
  0x9f   :  { %v204_v37 = vmul.f32 0.03125, %v182_v31 }
  0xa0   :  { %v4099_v18 = vsub.f32 %v135_v0, %v202_v16  ;;  %v4101_v19 = vsub.f32 %v133_v1, %v200_v17  ;;  %v150_v0 = vsel %vm143_vm0, %v4185_v62, 0.0  ;;  %v4193_v1 = vld [vmem:[%s5963_s28 + $0x18] sm:$0xff] }
  0xa1   :  { %v4142_v41 = vsub.f32 %v137_v4, %v204_v37  ;;  %v153_v2 = vsel %vm143_vm0, %v4193_v1, 0.0  ;;  %v536_v4 = vld [vmem:[%s5938_s7 + $0x10] sm:$0xff] }
  0xa2   :  { %v234_v20 = vmul.f32 %v4099_v18, %v4099_v18  ;;  %v232_v21 = vmul.f32 %v4101_v19, %v4101_v19  ;;  %3397 = vmatpush.msra.mxu3 %v536_v4  ;;  %3396 = vmatpush.msra.mxu2 %v536_v4 }
  0xa3   :  { %v236_v47 = vmul.f32 %v4142_v41, %v4142_v41  ;;  %603 = vmatpush.msra.mxu0 %v536_v4 }
  0xa4   :  { %v270_v22 = vsel %vm143_vm0, %v234_v20, 0.0  ;;  %v264_v23 = vsel %vm143_vm0, %v232_v21, 0.0 }
  0xa5   :  { %271 = vadd.xlane.f32.xlu1 %v270_v22  ;;  %265 = vadd.xlane.f32.xlu0 %v264_v23  ;;  %v173_v24 = vpop.xlane.xlu0 %172  ;;  %v179_v25 = vpop.xlane.xlu1 %178  ;;  %v276_v52 = vsel %vm143_vm0, %v236_v47, 0.0 }
  0xa6   :  { %v201_v26 = vmul.f32 0.03125, %v173_v24  ;;  %v203_v27 = vmul.f32 0.03125, %v179_v25  ;;  %v185_v44 = vpop.xlane.xlu2 %184 }
  0xa7   :  { %v205_v46 = vmul.f32 0.03125, %v185_v44 }
  0xa8   :  { %v4114_v29 = vsub.f32 %v134_v5, %v201_v26  ;;  %v4121_v32 = vsub.f32 %v136_v6, %v203_v27  ;;  %v535_v5 = vld [vmem:[%s5938_s7 + $0x8] sm:$0xff]  ;;  %v534_v6 = vld [vmem:[%s5938_s7] sm:$0xff] }
  0xa9   :  { %v4161_v50 = vsub.f32 %v138_v8, %v205_v46  ;;  %3399 = vmatpush.msra.mxu3 %v535_v5  ;;  %3398 = vmatpush.msra.mxu2 %v535_v5 }
  0xaa   :  { %v233_v34 = vmul.f32 %v4114_v29, %v4114_v29  ;;  %v235_v38 = vmul.f32 %v4121_v32, %v4121_v32  ;;  %604 = vmatpush.msra.mxu0 %v535_v5  ;;  %v4255_v5 = vld [vmem:[%s5937_s6] ss:$0 sm:$0xff]  ;;  %s5989_s6 = sld [smem:[#allocation22_spill]] }
  0xab   :  { %v237_v56 = vmul.f32 %v4161_v50, %v4161_v50  ;;  %3401 = vmatpush.msra.mxu3 %v534_v6  ;;  %3400 = vmatpush.msra.mxu2 %v534_v6 }
  0xac   :  { %v267_v36 = vsel %vm143_vm0, %v233_v34, 0.0  ;;  %v273_v42 = vsel %vm143_vm0, %v235_v38, 0.0  ;;  %605 = vmatpush.msra.mxu0 %v534_v6 }
  0xad   :  { %190 = vadd.xlane.f32.xlu0 %v189_v33  ;;  %268 = vadd.xlane.f32.xlu2 %v267_v36  ;;  %v188_v53 = vpop.xlane.xlu1 %187  ;;  %v279_v60 = vsel %vm143_vm0, %v237_v56, 0.0 }
  0xae   :  { %160 = vadd.xlane.f32.xlu1 %v159_v35  ;;  %v206_v55 = vmul.f32 0.03125, %v188_v53 }
  0xb0   :  { %v4175_v58 = vsub.f32 %v139_v12, %v206_v55 }
  0xb2   :  { %v238_v61 = vmul.f32 %v4175_v58, %v4175_v58 }
  0xb4   :  { %v282_v63 = vsel %vm143_vm0, %v238_v61, 0.0 }
  0xb5   :  { %274 = vadd.xlane.f32.xlu0 %v273_v42  ;;  %157 = vadd.xlane.f32.xlu2 %v156_v43 }
  0xb6   :  { %145 = vadd.xlane.f32.xlu1 %v144_v45 }
  0xbd   :  { %163 = vadd.xlane.f32.xlu0 %v162_v51  ;;  %277 = vadd.xlane.f32.xlu2 %v276_v52 }
  0xbe   :  { %148 = vadd.xlane.f32.xlu1 %v147_v54 }
  0xc5   :  { %166 = vadd.xlane.f32.xlu0 %v165_v59  ;;  %280 = vadd.xlane.f32.xlu2 %v279_v60 }
  0xcd   :  { %283 = vadd.xlane.f32.xlu2 %v282_v63  ;;  %151 = vadd.xlane.f32.xlu0 %v150_v0 }
  0xd5   :  { %154 = vadd.xlane.f32.xlu2 %v153_v2 }
 0x118   :  { %v272_v7 = vpop.xlane.xlu1 %271  ;;  %v266_v8 = vpop.xlane.xlu0 %265 }
 0x119   :  { %v298_v9 = vmul.f32 0.03125, %v272_v7  ;;  %v296_v10 = vmul.f32 0.03125, %v266_v8 }
 0x11b   :  { %v4209_v11 = vadd.f32 1e-05, %v298_v9  ;;  %v312_v12 = vadd.f32 1e-05, %v296_v10 }
 0x11d   :  { %3506 = vrsqrt.f32 %v4209_v11  ;;  %vm406_vm2 = vweird.f32 %v312_v12  ;;  %vm426_vm4 = vweird.f32 %v4209_v11 }
 0x11e   :  { %3508 = vrsqrt.f32 %v312_v12 }
 0x120   :  { %v269_v13 = vpop.xlane.xlu2 %268  ;;  %v191_v14 = vpop.xlane.xlu0 %190 }
 0x121   :  { %v297_v15 = vmul.f32 0.03125, %v269_v13  ;;  %v207_v16 = vmul.f32 0.03125, %v191_v14  ;;  %v161_v17 = vpop.xlane.xlu1 %160 }
 0x122   :  { %v197_v20 = vmul.f32 0.03125, %v161_v17 }
 0x123   :  { %v4212_v21 = vpop.eup %3506  ;;  %v4214_v22 = vadd.f32 1e-05, %v297_v15  ;;  %v4217_v23 = vsub.f32 %v4112_v28, %v207_v16 }
 0x124   :  { %v3509_v24 = vpop.eup %3508  ;;  %v421_v25 = vmul.f32 %v4212_v21, %v4209_v11  ;;  %v4223_v27 = vsub.f32 %v4119_v30, %v197_v20  ;;  %vm427_vm5 = vweird.f32 %v4212_v21 }
 0x125   :  { %v401_v26 = vmul.f32 %v3509_v24, %v312_v12  ;;  %3510 = vrsqrt.f32 %v4214_v22  ;;  %v239_v31 = vmul.f32 %v4217_v23, %v4217_v23  ;;  %vm407_vm1 = vweird.f32 %v3509_v24  ;;  %vm4274_vm8 = vmor %vm426_vm4, %vm427_vm5 }
 0x126   :  { %v422_v34 = vmul.f32 %v4212_v21, %v421_v25  ;;  %v229_v44 = vmul.f32 %v4223_v27, %v4223_v27  ;;  %vm408_vm3 = vmor %vm406_vm2, %vm407_vm1  ;;  %vm416_vm7 = vweird.f32 %v4214_v22 }
 0x127   :  { %v402_v33 = vmul.f32 %v3509_v24, %v401_v26  ;;  %v285_v28 = vsel %vm143_vm0, %v239_v31, 0.0 }
 0x128   :  { %v275_v35 = vpop.xlane.xlu0 %274  ;;  %v158_v36 = vpop.xlane.xlu2 %157  ;;  %286 = vadd.xlane.f32.xlu1 %v285_v28  ;;  %v423_v52 = vmul.f32 0.5, %v422_v34  ;;  %v255_v60 = vsel %vm143_vm0, %v229_v44, 0.0 }
 0x129   :  { %v403_v37 = vmul.f32 0.5, %v402_v33  ;;  %v299_v38 = vmul.f32 0.03125, %v275_v35  ;;  %v196_v42 = vmul.f32 0.03125, %v158_v36  ;;  %v146_v43 = vpop.xlane.xlu1 %145 }
 0x12a   :  { %v192_v30 = vmul.f32 0.03125, %v146_v43  ;;  %v424_v0 = vsub.f32 1.5, %v423_v52 }
 0x12b   :  { %v3511_v45 = vpop.eup %3510  ;;  %v404_v46 = vsub.f32 1.5, %v403_v37  ;;  %v4231_v47 = vadd.f32 1e-05, %v299_v38  ;;  %v4234_v51 = vsub.f32 %v4135_v39, %v196_v42  ;;  %v4247_v39 = vld [vmem:[%s5936_s5] ss:$0 sm:$0xff] }
 0x12c   :  { %v411_v53 = vmul.f32 %v3511_v45, %v4214_v22  ;;  %v4241_v56 = vsub.f32 %v4140_v40, %v192_v30  ;;  %vm417_vm6 = vweird.f32 %v3511_v45  ;;  %v425_v16 = vmul.f32 %v4212_v21, %v424_v0 }
 0x12d   :  { %v405_v54 = vmul.f32 %v3509_v24, %v404_v46  ;;  %3512 = vrsqrt.f32 %v4231_v47  ;;  %v228_v55 = vmul.f32 %v4234_v51, %v4234_v51  ;;  %vm418_vm9 = vmor %vm416_vm7, %vm417_vm6  ;;  %vm436_vm10 = vweird.f32 %v4231_v47 }
 0x12e   :  { %v412_v59 = vmul.f32 %v3511_v45, %v411_v53  ;;  %v224_v8 = vmul.f32 %v4241_v56, %v4241_v56  ;;  %v429_v37 = vsel %vm4274_vm8, %v4212_v21, %v425_v16 }
 0x12f   :  { %v252_v61 = vsel %vm143_vm0, %v228_v55, 0.0  ;;  %v409_v63 = vsel %vm408_vm3, %v3509_v24, %v405_v54  ;;  %v490_v52 = vmul.f32 %v429_v37, %v4099_v18 }
 0x130   :  { %v413_v2 = vmul.f32 0.5, %v412_v59  ;;  %v164_v3 = vpop.xlane.xlu0 %163  ;;  %v278_v4 = vpop.xlane.xlu2 %277  ;;  %253 = vadd.xlane.f32.xlu0 %v252_v61  ;;  %v488_v40 = vmul.f32 %v409_v63, %v4101_v19  ;;  %256 = vadd.xlane.f32.xlu1 %v255_v60  ;;  %v240_v25 = vsel %vm143_vm0, %v224_v8, 0.0 }
 0x131   :  { %v198_v6 = vmul.f32 0.03125, %v164_v3  ;;  %v300_v7 = vmul.f32 0.03125, %v278_v4  ;;  %v149_v9 = vpop.xlane.xlu1 %148  ;;  %v509_v63 = vmul.f32 %v4247_v39, %v490_v52 }
 0x132   :  { %v414_v10 = vsub.f32 1.5, %v413_v2  ;;  %v507_v12 = vmul.f32 %v4247_v39, %v488_v40  ;;  %v193_v13 = vmul.f32 0.03125, %v149_v9 }
 0x133   :  { %v4261_v19 = vpop.eup %3512  ;;  %v4265_v14 = vsub.f32 %v4154_v48, %v198_v6  ;;  %v4267_v15 = vadd.f32 1e-05, %v300_v7  ;;  %v528_v9 = vadd.f32 %v4255_v5, %v509_v63 }
 0x134   :  { %v415_v20 = vmul.f32 %v3511_v45, %v414_v10  ;;  %v431_v24 = vmul.f32 %v4261_v19, %v4231_v47  ;;  %v526_v22 = vadd.f32 %v4255_v5, %v507_v12  ;;  %v4286_v11 = vsub.f32 %v4159_v49, %v193_v13 }
 0x135   :  { %3514 = vrsqrt.f32 %v4267_v15  ;;  %v230_v48 = vmul.f32 %v4265_v14, %v4265_v14  ;;  %vm437_vm11 = vweird.f32 %v4261_v19  ;;  %vm446_vm13 = vweird.f32 %v4267_v15 }
 0x136   :  { %v432_v26 = vmul.f32 %v4261_v19, %v431_v24  ;;  %3255 = vmatmul.msk.f32.vlgmr.msra.gmra.mxu3 %vm143_vm0, %v526_v22  ;;  %v419_v31 = vsel %vm418_vm9, %v3511_v45, %v415_v20  ;;  %v225_v43 = vmul.f32 %v4286_v11, %v4286_v11  ;;  %vm4312_vm12 = vmor %vm436_vm10, %vm437_vm11 }
 0x137   :  { %v258_v33 = vsel %vm143_vm0, %v230_v48, 0.0  ;;  %v489_v34 = vmul.f32 %v419_v31, %v4114_v29 }
 0x138   :  { %v433_v35 = vmul.f32 0.5, %v432_v26  ;;  %v167_v36 = vpop.xlane.xlu0 %166  ;;  %v281_v28 = vpop.xlane.xlu2 %280  ;;  %259 = vadd.xlane.f32.xlu2 %v258_v33  ;;  %241 = vadd.xlane.f32.xlu0 %v240_v25 }
 0x139   :  { %v199_v49 = vmul.f32 0.03125, %v167_v36  ;;  %v301_v38 = vmul.f32 0.03125, %v281_v28  ;;  %v508_v42 = vmul.f32 %v4247_v39, %v489_v34 }
 0x13a   :  { %v434_v44 = vsub.f32 1.5, %v433_v35 }
 0x13b   :  { %v3515_v30 = vpop.eup %3514  ;;  %v4299_v29 = vsub.f32 %v4173_v57, %v199_v49  ;;  %v317_v45 = vadd.f32 1e-05, %v301_v38  ;;  %v527_v46 = vadd.f32 %v4255_v5, %v508_v42  ;;  %v243_v57 = vsel %vm143_vm0, %v225_v43, 0.0 }
 0x13c   :  { %v441_v21 = vmul.f32 %v3515_v30, %v4267_v15  ;;  %v435_v53 = vmul.f32 %v4261_v19, %v434_v44  ;;  %vm447_vm14 = vweird.f32 %v3515_v30 }
 0x13d   :  { %3516 = vrsqrt.f32 %v317_v45  ;;  %v231_v54 = vmul.f32 %v4299_v29, %v4299_v29  ;;  %vm4328_vm15 = vmor %vm446_vm13, %vm447_vm14  ;;  %vm456_vm1 = vweird.f32 %v317_v45 }
 0x13e   :  { %v442_v55 = vmul.f32 %v3515_v30, %v441_v21  ;;  %3256 = vmatmul.msk.f32.gmra.mxu3 %vm143_vm0, %v527_v46  ;;  %v439_v3 = vsel %vm4312_vm12, %v4261_v19, %v435_v53 }
 0x13f   :  { %v261_v59 = vsel %vm143_vm0, %v231_v54, 0.0  ;;  %v491_v10 = vmul.f32 %v439_v3, %v4121_v32 }
 0x140   :  { %v443_v60 = vmul.f32 0.5, %v442_v55  ;;  %v284_v61 = vpop.xlane.xlu2 %283  ;;  %v152_v18 = vpop.xlane.xlu0 %151  ;;  %262 = vadd.xlane.f32.xlu1 %v261_v59  ;;  %244 = vadd.xlane.f32.xlu2 %v243_v57 }
 0x141   :  { %v302_v0 = vmul.f32 0.03125, %v284_v61  ;;  %v194_v2 = vmul.f32 0.03125, %v152_v18  ;;  %v510_v20 = vmul.f32 %v4247_v39, %v491_v10 }
 0x142   :  { %v444_v4 = vsub.f32 1.5, %v443_v60 }
 0x143   :  { %v3517_v40 = vpop.eup %3516  ;;  %v318_v6 = vadd.f32 1e-05, %v302_v0  ;;  %v4322_v7 = vsub.f32 %v4185_v62, %v194_v2  ;;  %v529_v31 = vadd.f32 %v4255_v5, %v510_v20 }
 0x144   :  { %v451_v8 = vmul.f32 %v3517_v40, %v317_v45  ;;  %v445_v12 = vmul.f32 %v3515_v30, %v444_v4  ;;  %vm457_vm2 = vweird.f32 %v3517_v40 }
 0x145   :  { %3518 = vrsqrt.f32 %v318_v6  ;;  %v226_v13 = vmul.f32 %v4322_v7, %v4322_v7  ;;  %vm458_vm3 = vmor %vm456_vm1, %vm457_vm2  ;;  %vm466_vm4 = vweird.f32 %v318_v6 }
 0x146   :  { %v452_v15 = vmul.f32 %v3517_v40, %v451_v8  ;;  %3257 = vmatmul.msk.f32.gmra.mxu3 %vm143_vm0, %v528_v9  ;;  %v449_v24 = vsel %vm4328_vm15, %v3515_v30, %v445_v12 }
 0x147   :  { %v246_v62 = vsel %vm143_vm0, %v226_v13, 0.0  ;;  %v492_v33 = vmul.f32 %v449_v24, %v4142_v41 }
 0x148   :  { %v453_v16 = vmul.f32 0.5, %v452_v15  ;;  %v155_v17 = vpop.xlane.xlu2 %154  ;;  %247 = vadd.xlane.f32.xlu0 %v246_v62 }
 0x149   :  { %v195_v32 = vmul.f32 0.03125, %v155_v17 }
 0x14a   :  { %v454_v22 = vsub.f32 1.5, %v453_v16 }
 0x14b   :  { %v3519_v48 = vpop.eup %3518  ;;  %v4338_v25 = vsub.f32 %v4193_v1, %v195_v32  ;;  %v511_v1 = vmul.f32 %v4247_v39, %v492_v33 }
 0x14c   :  { %v461_v26 = vmul.f32 %v3519_v48, %v318_v6  ;;  %v455_v34 = vmul.f32 %v3517_v40, %v454_v22  ;;  %vm467_vm5 = vweird.f32 %v3519_v48 }
 0x14d   :  { %v227_v35 = vmul.f32 %v4338_v25, %v4338_v25  ;;  %v530_v41 = vadd.f32 %v4255_v5, %v511_v1  ;;  %vm468_vm6 = vmor %vm466_vm4, %vm467_vm5 }
 0x14e   :  { %v462_v36 = vmul.f32 %v3519_v48, %v461_v26  ;;  %3258 = vmatmul.msk.f32.gmra.mxu3 %vm143_vm0, %v529_v31  ;;  %v459_v49 = vsel %vm458_vm3, %v3517_v40, %v455_v34 }
 0x14f   :  { %v249_v28 = vsel %vm143_vm0, %v227_v35, 0.0  ;;  %v493_v42 = vmul.f32 %v459_v49, %v4161_v50 }
 0x150   :  { %v463_v37 = vmul.f32 0.5, %v462_v36  ;;  %250 = vadd.xlane.f32.xlu1 %v249_v28 }
 0x151   :  { %v512_v44 = vmul.f32 %v4247_v39, %v493_v42 }
 0x152   :  { %v464_v38 = vsub.f32 1.5, %v463_v37 }
 0x153   :  { %v531_v45 = vadd.f32 %v4255_v5, %v512_v44 }
 0x154   :  { %v465_v43 = vmul.f32 %v3519_v48, %v464_v38 }
 0x156   :  { %3259 = vmatmul.msk.f32.gmra.mxu3 %vm143_vm0, %v530_v41  ;;  %v469_v30 = vsel %vm468_vm6, %v3519_v48, %v465_v43 }
 0x157   :  { %v494_v46 = vmul.f32 %v469_v30, %v4175_v58 }
 0x159   :  { %v513_v21 = vmul.f32 %v4247_v39, %v494_v46 }
 0x15b   :  { %v532_v52 = vadd.f32 %v4255_v5, %v513_v21 }
 0x15e   :  { %3260 = vmatmul.msk.f32.gmra.mxu3 %vm143_vm0, %v531_v45 }
 0x166   :  { %3261 = vmatmul.msk.f32.gmra.mxu3 %vm143_vm0, %v532_v52 }
 0x19b   :  { %v287_v50 = vpop.xlane.xlu1 %286 }
 0x19c   :  { %v303_v53 = vmul.f32 0.03125, %v287_v50 }
 0x19e   :  { %v319_v54 = vadd.f32 1e-05, %v303_v53 }
 0x1a0   :  { %3520 = vrsqrt.f32 %v319_v54  ;;  %vm476_vm7 = vweird.f32 %v319_v54 }
 0x1a3   :  { %v254_v57 = vpop.xlane.xlu0 %253  ;;  %v257_v59 = vpop.xlane.xlu1 %256 }
 0x1a4   :  { %v292_v55 = vmul.f32 0.03125, %v254_v57  ;;  %v293_v47 = vmul.f32 0.03125, %v257_v59 }
 0x1a6   :  { %v308_v60 = vadd.f32 1e-05, %v292_v55  ;;  %v3521_v61 = vpop.eup %3520  ;;  %v309_v18 = vadd.f32 1e-05, %v293_v47 }
 0x1a7   :  { %v471_v58 = vmul.f32 %v3521_v61, %v319_v54  ;;  %vm477_vm8 = vweird.f32 %v3521_v61 }
 0x1a8   :  { %3522 = vrsqrt.f32 %v308_v60  ;;  %vm478_vm9 = vmor %vm476_vm7, %vm477_vm8  ;;  %vm376_vm10 = vweird.f32 %v309_v18  ;;  %vm366_vm13 = vweird.f32 %v308_v60 }
 0x1a9   :  { %3524 = vrsqrt.f32 %v309_v18  ;;  %v472_v63 = vmul.f32 %v3521_v61, %v471_v58 }
 0x1ab   :  { %v260_v0 = vpop.xlane.xlu2 %259  ;;  %v242_v2 = vpop.xlane.xlu0 %241  ;;  %v473_v3 = vmul.f32 0.5, %v472_v63 }
 0x1ac   :  { %v294_v4 = vmul.f32 0.03125, %v260_v0  ;;  %v288_v40 = vmul.f32 0.03125, %v242_v2 }
 0x1ad   :  { %v474_v8 = vsub.f32 1.5, %v473_v3 }
 0x1ae   :  { %v3523_v6 = vpop.eup %3522  ;;  %v4357_v9 = vadd.f32 1e-05, %v294_v4  ;;  %v304_v10 = vadd.f32 1e-05, %v288_v40 }
 0x1af   :  { %v3525_v12 = vpop.eup %3524  ;;  %v361_v13 = vmul.f32 %v3523_v6, %v308_v60  ;;  %v475_v19 = vmul.f32 %v3521_v61, %v474_v8  ;;  %vm367_vm11 = vweird.f32 %v3523_v6 }
 0x1b0   :  { %v371_v15 = vmul.f32 %v3525_v12, %v309_v18  ;;  %3526 = vrsqrt.f32 %v4357_v9  ;;  %vm377_vm12 = vweird.f32 %v3525_v12  ;;  %vm368_vm14 = vmor %vm366_vm13, %vm367_vm11  ;;  %vm326_vm1 = vweird.f32 %v304_v10 }
 0x1b1   :  { %v362_v62 = vmul.f32 %v3523_v6, %v361_v13  ;;  %3528 = vrsqrt.f32 %v304_v10  ;;  %v479_v17 = vsel %vm478_vm9, %v3521_v61, %v475_v19  ;;  %vm4375_vm15 = vmor %vm376_vm10, %vm377_vm12  ;;  %vm386_vm3 = vweird.f32 %v4357_v9 }
 0x1b2   :  { %v372_v16 = vmul.f32 %v3525_v12, %v371_v15  ;;  %v495_v22 = vmul.f32 %v479_v17, %v4217_v23 }
 0x1b3   :  { %v363_v20 = vmul.f32 0.5, %v362_v62  ;;  %v245_v32 = vpop.xlane.xlu2 %244  ;;  %v263_v24 = vpop.xlane.xlu1 %262 }
 0x1b4   :  { %v373_v48 = vmul.f32 0.5, %v372_v16  ;;  %v289_v26 = vmul.f32 0.03125, %v245_v32  ;;  %v295_v31 = vmul.f32 0.03125, %v263_v24  ;;  %v514_v34 = vmul.f32 %v4247_v39, %v495_v22 }
 0x1b5   :  { %v364_v33 = vsub.f32 1.5, %v363_v20 }
 0x1b6   :  { %v4362_v35 = vpop.eup %3526  ;;  %v374_v36 = vsub.f32 1.5, %v373_v48  ;;  %v305_v28 = vadd.f32 1e-05, %v289_v26  ;;  %v4364_v37 = vadd.f32 1e-05, %v295_v31  ;;  %v533_v38 = vadd.f32 %v4255_v5, %v514_v34 }
 0x1b7   :  { %v3529_v1 = vpop.eup %3528  ;;  %v365_v49 = vmul.f32 %v3523_v6, %v364_v33  ;;  %v381_v23 = vmul.f32 %v4362_v35, %v4357_v9  ;;  %vm387_vm4 = vweird.f32 %v4362_v35 }
 0x1b8   :  { %v375_v41 = vmul.f32 %v3525_v12, %v374_v36  ;;  %v321_v42 = vmul.f32 %v3529_v1, %v304_v10  ;;  %3530 = vrsqrt.f32 %v305_v28  ;;  %3262 = vmatmul.msk.f32.gmra.mxu3 %vm143_vm0, %v533_v38  ;;  %vm327_vm2 = vweird.f32 %v3529_v1  ;;  %vm4401_vm6 = vmor %vm386_vm3, %vm387_vm4 }
 0x1b9   :  { %v382_v43 = vmul.f32 %v4362_v35, %v381_v23  ;;  %3532 = vrsqrt.f32 %v4364_v37  ;;  %v4371_v44 = vpop.f32.mrf.mxu3  ;;  %v369_v46 = vsel %vm368_vm14, %v3523_v6, %v365_v49  ;;  %vm4386_vm5 = vmor %vm326_vm1, %vm327_vm2  ;;  %vm336_vm7 = vweird.f32 %v305_v28 }
 0x1ba   :  { %v322_v45 = vmul.f32 %v3529_v1, %v321_v42  ;;  %v484_v50 = vmul.f32 %v369_v46, %v4234_v51  ;;  %v379_v53 = vsel %vm4375_vm15, %v3525_v12, %v375_v41  ;;  %vm396_vm10 = vweird.f32 %v4364_v37 }
 0x1bb   :  { %v383_v21 = vmul.f32 0.5, %v382_v43  ;;  %v248_v52 = vpop.xlane.xlu0 %247  ;;  %v485_v18 = vmul.f32 %v379_v53, %v4223_v27  ;;  %vm723_vm4 = vcmask 130048  }
 0x1bc   :  { %v323_v54 = vmul.f32 0.5, %v322_v45  ;;  %v290_v57 = vmul.f32 0.03125, %v248_v52  ;;  %v503_v59 = vmul.f32 %v4247_v39, %v484_v50 }
 0x1bd   :  { %v384_v55 = vsub.f32 1.5, %v383_v21  ;;  %v504_v10 = vmul.f32 %v4247_v39, %v485_v18  ;;  %v4433_v21 = vld [vmem:[%s5939_s8] ss:$0 sm:$0xff]  ;;  %s3947_s8 = smov 80  }
 0x1be   :  { %v3531_v47 = vpop.eup %3530  ;;  %v324_v60 = vsub.f32 1.5, %v323_v54  ;;  %v306_v61 = vadd.f32 1e-05, %v290_v57  ;;  %v522_v0 = vadd.f32 %v4255_v5, %v503_v59 }
 0x1bf   :  { %v3533_v58 = vpop.eup %3532  ;;  %v331_v63 = vmul.f32 %v3531_v47, %v305_v28  ;;  %v385_v2 = vmul.f32 %v4362_v35, %v384_v55  ;;  %vm337_vm8 = vweird.f32 %v3531_v47  ;;  %v523_v26 = vadd.f32 %v4255_v5, %v504_v10 }
 0x1c0   :  { %v325_v3 = vmul.f32 %v3529_v1, %v324_v60  ;;  %v391_v4 = vmul.f32 %v3533_v58, %v4364_v37  ;;  %3534 = vrsqrt.f32 %v306_v61  ;;  %3251 = vmatmul.msk.f32.vlgmr.msra.gmra.mxu2 %vm143_vm0, %v522_v0  ;;  %vm4410_vm9 = vmor %vm336_vm7, %vm337_vm8  ;;  %vm397_vm11 = vweird.f32 %v3533_v58 }
 0x1c1   :  { %v332_v40 = vmul.f32 %v3531_v47, %v331_v63  ;;  %v4394_v27 = vpop.f32.mrf.mxu3  ;;  %v389_v17 = vsel %vm4401_vm6, %v4362_v35, %v385_v2  ;;  %vm398_vm12 = vmor %vm396_vm10, %vm397_vm11  ;;  %vm346_vm13 = vweird.f32 %v306_v61 }
 0x1c2   :  { %v392_v6 = vmul.f32 %v3533_v58, %v391_v4  ;;  %v329_v8 = vsel %vm4386_vm5, %v3529_v1, %v325_v3  ;;  %v486_v34 = vmul.f32 %v389_v17, %v4265_v14 }
 0x1c3   :  { %v333_v13 = vmul.f32 0.5, %v332_v40  ;;  %v251_v19 = vpop.xlane.xlu1 %250  ;;  %v480_v15 = vmul.f32 %v329_v8, %v4241_v56 }
 0x1c4   :  { %v393_v62 = vmul.f32 0.5, %v392_v6  ;;  %v291_v16 = vmul.f32 0.03125, %v251_v19  ;;  %v505_v14 = vmul.f32 %v4247_v39, %v486_v34 }
 0x1c5   :  { %v334_v20 = vsub.f32 1.5, %v333_v13  ;;  %v499_v32 = vmul.f32 %v4247_v39, %v480_v15 }
 0x1c6   :  { %v3535_v9 = vpop.eup %3534  ;;  %v394_v22 = vsub.f32 1.5, %v393_v62  ;;  %v307_v48 = vadd.f32 1e-05, %v291_v16  ;;  %v524_v46 = vadd.f32 %v4255_v5, %v505_v14 }
 0x1c7   :  { %v335_v31 = vmul.f32 %v3531_v47, %v334_v20  ;;  %v341_v56 = vmul.f32 %v3535_v9, %v306_v61  ;;  %v518_v33 = vadd.f32 %v4255_v5, %v499_v32  ;;  %vm347_vm14 = vweird.f32 %v3535_v9 }
 0x1c8   :  { %v395_v36 = vmul.f32 %v3533_v58, %v394_v22  ;;  %3536 = vrsqrt.f32 %v307_v48  ;;  %3252 = vmatmul.msk.f32.gmra.mxu2 %vm143_vm0, %v523_v26  ;;  %vm348_vm15 = vmor %vm346_vm13, %vm347_vm14  ;;  %vm356_vm1 = vweird.f32 %v307_v48 }
 0x1c9   :  { %v342_v35 = vmul.f32 %v3535_v9, %v341_v56  ;;  %3247 = vmatmul.msk.f32.vlgmr.msra.gmra.mxu0 %vm143_vm0, %v518_v33  ;;  %v4420_v28 = vpop.f32.mrf.mxu3  ;;  %v339_v1 = vsel %vm4410_vm9, %v3531_v47, %v335_v31 }
 0x1ca   :  { %v481_v49 = vmul.f32 %v339_v1, %v4286_v11  ;;  %v399_v38 = vsel %vm398_vm12, %v3533_v58, %v395_v36  ;;  %v4497_v10 = vadd.f32 %v4433_v21, %v4420_v28 }
 0x1cb   :  { %v343_v23 = vmul.f32 0.5, %v342_v35  ;;  %v487_v11 = vmul.f32 %v399_v38, %v4299_v29 }
 0x1cc   :  { %v500_v37 = vmul.f32 %v4247_v39, %v481_v49 }
 0x1cd   :  { %v344_v41 = vsub.f32 1.5, %v343_v23  ;;  %v506_v29 = vmul.f32 %v4247_v39, %v487_v11 }
 0x1ce   :  { %v3537_v42 = vpop.eup %3536  ;;  %v519_v43 = vadd.f32 %v4255_v5, %v500_v37 }
 0x1cf   :  { %v345_v30 = vmul.f32 %v3535_v9, %v344_v41  ;;  %v351_v45 = vmul.f32 %v3537_v42, %v307_v48  ;;  %vm357_vm2 = vweird.f32 %v3537_v42  ;;  %v525_v61 = vadd.f32 %v4255_v5, %v506_v29 }
 0x1d0   :  { %3253 = vmatmul.msk.f32.gmra.mxu2 %vm143_vm0, %v524_v46  ;;  %vm358_vm3 = vmor %vm356_vm1, %vm357_vm2 }
 0x1d1   :  { %v352_v52 = vmul.f32 %v3537_v42, %v351_v45  ;;  %3248 = vmatmul.msk.f32.gmra.mxu0 %vm143_vm0, %v519_v43  ;;  %v640_v50 = vpop.f32.mrf.mxu3  ;;  %v349_v53 = vsel %vm348_vm15, %v3535_v9, %v345_v30 }
 0x1d2   :  { %v4438_v54 = vadd.f32 %v4433_v21, %v640_v50  ;;  %v482_v57 = vmul.f32 %v349_v53, %v4322_v7 }
 0x1d3   :  { %v353_v55 = vmul.f32 0.5, %v352_v52 }
 0x1d4   :  { %713 = vrot.lane.b32.xlu1 %v4438_v54, %s3946_s1  ;;  %1196 = vrot.lane.b32.xlu2 %v4438_v54, %s3947_s8  ;;  %v501_v59 = vmul.f32 %v4247_v39, %v482_v57 }
 0x1d5   :  { %v354_v47 = vsub.f32 1.5, %v353_v55 }
 0x1d6   :  { %v520_v60 = vadd.f32 %v4255_v5, %v501_v59 }
 0x1d7   :  { %v355_v7 = vmul.f32 %v3537_v42, %v354_v47 }
 0x1d8   :  { %3254 = vmatmul.msk.f32.gmra.mxu2 %vm143_vm0, %v525_v61 }
 0x1d9   :  { %3249 = vmatmul.msk.f32.gmra.mxu0 %vm143_vm0, %v520_v60  ;;  %v643_v18 = vpop.f32.mrf.mxu3  ;;  %v359_v58 = vsel %vm358_vm3, %v3537_v42, %v355_v7 }
 0x1da   :  { %v4452_v51 = vadd.f32 %v4433_v21, %v643_v18  ;;  %v483_v63 = vmul.f32 %v359_v58, %v4338_v25 }
 0x1dc   :  { %1198 = vrot.lane.b32.xlu1 %v4452_v51, %s3947_s8  ;;  %715 = vrot.lane.b32.xlu0 %v4452_v51, %s3946_s1  ;;  %v502_v0 = vmul.f32 %v4247_v39, %v483_v63  ;;  %v4478_v39 = vadd.f32 %v4433_v21, %v4394_v27 }
 0x1de   :  { %v521_v2 = vadd.f32 %v4255_v5, %v502_v0  ;;  %v4484_v5 = vadd.f32 %v4433_v21, %v4371_v44 }
 0x1e0   :  { %v3441_v37 = vpack.i.bf16 %v4484_v5, %v4478_v39 }
 0x1e1   :  { %3250 = vmatmul.msk.f32.gmra.mxu0 %vm143_vm0, %v521_v2  ;;  %v646_v3 = vpop.f32.mrf.mxu3 }
 0x1e2   :  { %v4463_v4 = vadd.f32 %v4433_v21, %v646_v3 }
 0x1e4   :  { %1200 = vrot.lane.b32.xlu0 %v4463_v4, %s3947_s8  ;;  %717 = vrot.lane.b32.xlu2 %v4463_v4, %s3946_s1  ;;  %v3416_v23 = vpack.i.bf16 %v4452_v51, %v4463_v4 }
 0x1e9   :  { %v649_v25 = vpop.f32.mrf.mxu3 }
 0x1ea   :  { %v4470_v40 = vadd.f32 %v4433_v21, %v649_v25 }
 0x1ec   :  { %1202 = vrot.lane.b32.xlu1 %v4470_v40, %s3947_s8  ;;  %719 = vrot.lane.b32.xlu2 %v4470_v40, %s3946_s1 }
 0x1f4   :  { %1192 = vrot.lane.b32.xlu1 %v4478_v39, %s3947_s8 }
 0x1fc   :  { %707 = vrot.lane.b32.xlu1 %v4484_v5, %s3946_s1 }
 0x22e   :  { %v1197_v31 = vpop.permute.xlu2 %1196 }
 0x23b   :  { %v652_v6 = vpop.f32.mrf.mxu3 }
 0x23c   :  { %v4489_v8 = vadd.f32 %v4433_v21, %v652_v6 }
 0x23e   :  { %721 = vrot.lane.b32.xlu0 %v4489_v8, %s3946_s1  ;;  %1204 = vrot.lane.b32.xlu2 %v4489_v8, %s3947_s8  ;;  %v718_v56 = vpop.permute.xlu2 %717  ;;  %v3486_v60 = vpack.i.bf16 %v4470_v40, %v4489_v8 }
 0x243   :  { %v619_v27 = vpop.f32.mrf.mxu2 }
 0x244   :  { %v4534_v24 = vadd.f32 %v4433_v21, %v619_v27 }
 0x246   :  { %v607_v44 = vpop.f32.mrf.mxu0  ;;  %1194 = vrot.lane.b32.xlu0 %v4497_v10, %s3947_s8  ;;  %711 = vrot.lane.b32.xlu2 %v4497_v10, %s3946_s1  ;;  %v714_v33 = vpop.permute.xlu1 %713 }
 0x247   :  { %v4546_v48 = vadd.f32 %v4433_v21, %v607_v44  ;;  %v720_v34 = vpop.permute.xlu2 %719 }
 0x24b   :  { %v622_v12 = vpop.f32.mrf.mxu2 }
 0x24c   :  { %v4513_v17 = vadd.f32 %v4433_v21, %v622_v12 }
 0x24e   :  { %v610_v13 = vpop.f32.mrf.mxu0  ;;  %709 = vrot.lane.b32.xlu0 %v4478_v39, %s3946_s1  ;;  %1190 = vrot.lane.b32.xlu2 %v4484_v5, %s3947_s8  ;;  %v1199_v36 = vpop.permute.xlu1 %1198  ;;  %v3461_v43 = vpack.i.bf16 %v4534_v24, %v4513_v17 }
 0x24f   :  { %v4555_v26 = vadd.f32 %v4433_v21, %v610_v13  ;;  %v716_v35 = vpop.permute.xlu0 %715 }
 0x251   :  { %v3481_v11 = vpack.i.bf16 %v4546_v48, %v4555_v26 }
 0x253   :  { %v625_v19 = vpop.f32.mrf.mxu2 }
 0x254   :  { %v4508_v15 = vadd.f32 %v4433_v21, %v625_v19 }
 0x256   :  { %1186 = vrot.lane.b32.xlu1 %v4508_v15, %s3947_s8  ;;  %v613_v62 = vpop.f32.mrf.mxu0 }
 0x257   :  { %v4537_v22 = vadd.f32 %v4433_v21, %v613_v62  ;;  %v1201_v49 = vpop.permute.xlu0 %1200 }
 0x25b   :  { %v628_v16 = vpop.f32.mrf.mxu2 }
 0x25c   :  { %v4516_v20 = vadd.f32 %v4433_v21, %v628_v16 }
 0x25e   :  { %701 = vrot.lane.b32.xlu1 %v4513_v17, %s3946_s1  ;;  %705 = vrot.lane.b32.xlu2 %v4516_v20, %s3946_s1  ;;  %v616_v32 = vpop.f32.mrf.mxu0  ;;  %v1203_v1 = vpop.permute.xlu1 %1202  ;;  %v3446_v38 = vpack.i.bf16 %v4508_v15, %v4516_v20 }
 0x25f   :  { %1188 = vrot.lane.b32.xlu0 %v4516_v20, %s3947_s8  ;;  %v4525_v9 = vadd.f32 %v4433_v21, %v616_v32  ;;  %v3426_v21 = vpack.i.bf16 %v4497_v10, %v4438_v54 }
 0x261   :  { %v3466_v50 = vpack.i.bf16 %v4537_v22, %v4525_v9 }
 0x266   :  { %1184 = vrot.lane.b32.xlu2 %v4513_v17, %s3947_s8  ;;  %1180 = vrot.lane.b32.xlu1 %v4525_v9, %s3947_s8  ;;  %v1193_v46 = vpop.permute.xlu1 %1192 }
 0x267   :  { %703 = vrot.lane.b32.xlu0 %v4508_v15, %s3946_s1 }
 0x26e   :  { %699 = vrot.lane.b32.xlu2 %v4534_v24, %s3946_s1  ;;  %695 = vrot.lane.b32.xlu1 %v4537_v22, %s3946_s1  ;;  %v708_v53 = vpop.permute.xlu1 %707 }
 0x26f   :  { %1182 = vrot.lane.b32.xlu0 %v4534_v24, %s3947_s8 }
 0x276   :  { %1178 = vrot.lane.b32.xlu2 %v4537_v22, %s3947_s8  ;;  %1174 = vrot.lane.b32.xlu1 %v4546_v48, %s3947_s8 }
 0x277   :  { %697 = vrot.lane.b32.xlu0 %v4525_v9, %s3946_s1 }
 0x27e   :  { %693 = vrot.lane.b32.xlu2 %v4555_v26, %s3946_s1  ;;  %1144 = vrot.lane.b32.xlu1 %v4555_v26, %s3948_s22 }
 0x27f   :  { %1176 = vrot.lane.b32.xlu0 %v4555_v26, %s3947_s8 }
 0x286   :  { %691 = vrot.lane.b32.xlu2 %v4546_v48, %s3946_s1  ;;  %1150 = vrot.lane.b32.xlu1 %v4534_v24, %s3948_s22 }
 0x287   :  { %1142 = vrot.lane.b32.xlu0 %v4546_v48, %s3948_s22 }
 0x28e   :  { %1148 = vrot.lane.b32.xlu2 %v4525_v9, %s3948_s22  ;;  %1156 = vrot.lane.b32.xlu1 %v4516_v20, %s3948_s22 }
 0x28f   :  { %1146 = vrot.lane.b32.xlu0 %v4537_v22, %s3948_s22 }
 0x296   :  { %1154 = vrot.lane.b32.xlu2 %v4508_v15, %s3948_s22  ;;  %1162 = vrot.lane.b32.xlu1 %v4497_v10, %s3948_s22 }
 0x297   :  { %1152 = vrot.lane.b32.xlu0 %v4513_v17, %s3948_s22 }
 0x298   :  { %v1205_v28 = vpop.permute.xlu2 %1204 }
 0x299   :  { %3295 = vmatpush.xpose.msk.msrb.mxu3 %vm723_vm4, %v1205_v28 }
 0x29d   :  { %3296 = vmatpush.xpose.msk.msrb.mxu3 %vm723_vm4, %v1203_v1 }
 0x29e   :  { %1160 = vrot.lane.b32.xlu2 %v4478_v39, %s3948_s22  ;;  %1168 = vrot.lane.b32.xlu1 %v4463_v4, %s3948_s22 }
 0x29f   :  { %1158 = vrot.lane.b32.xlu0 %v4484_v5, %s3948_s22 }
 0x2a0   :  { %v712_v14 = vpop.permute.xlu2 %711 }
 0x2a1   :  { %3297 = vmatpush.xpose.msk.msrb.mxu3 %vm723_vm4, %v1201_v49 }
 0x2a5   :  { %3298 = vmatpush.xpose.msk.msrb.mxu3 %vm723_vm4, %v1199_v36 }
 0x2a6   :  { %1166 = vrot.lane.b32.xlu2 %v4452_v51, %s3948_s22  ;;  %3417 = vrot.lane.b32.xlu1 %v3416_v23, %s3949_s23 }
 0x2a7   :  { %1164 = vrot.lane.b32.xlu0 %v4438_v54, %s3948_s22 }
 0x2a8   :  { %v1191_v41 = vpop.permute.xlu2 %1190 }
 0x2a9   :  { %3299 = vmatpush.xpose.msk.msrb.mxu3 %vm723_vm4, %v1197_v31 }
 0x2ae   :  { %3442 = vrot.lane.b32.xlu2 %v3441_v37, %s3950_s2  ;;  %3447 = vrot.lane.b32.xlu1 %v3446_v38, %s3949_s23 }
 0x2af   :  { %1170 = vrot.lane.b32.xlu0 %v4470_v40, %s3948_s22 }
 0x2b0   :  { %v722_v42 = vpop.permute.xlu0 %721 }
 0x2b1   :  { %3263 = vmatpush.xpose.msk.msra.mxu1 %vm723_vm4, %v722_v42 }
 0x2b5   :  { %3264 = vmatpush.xpose.msk.msra.mxu1 %vm723_vm4, %v720_v34 }
 0x2b6   :  { %3462 = vrot.lane.b32.xlu2 %v3461_v43, %s3950_s2  ;;  %3457 = vrot.lane.b32.xlu1 %v3461_v43, %s3949_s23 }
 0x2b7   :  { %3422 = vrot.lane.b32.xlu0 %v3416_v23, %s3950_s2 }
 0x2b8   :  { %v1195_v30 = vpop.permute.xlu0 %1194  ;;  %v706_v45 = vpop.permute.xlu2 %705 }
 0x2b9   :  { %3265 = vmatpush.xpose.msk.msra.mxu1 %vm723_vm4, %v718_v56  ;;  %3300 = vmatpush.xpose.msk.msrb.mxu3 %vm723_vm4, %v1195_v30 }
 0x2bd   :  { %3266 = vmatpush.xpose.msk.msra.mxu1 %vm723_vm4, %v716_v35  ;;  %3301 = vmatpush.xpose.msk.msrb.mxu3 %vm723_vm4, %v1193_v46 }
 0x2be   :  { %1172 = vrot.lane.b32.xlu2 %v4489_v8, %s3948_s22  ;;  %3482 = vrot.lane.b32.xlu1 %v3481_v11, %s3950_s2  ;;  %s3952_s22 = smov [#allocation10]  }
 0x2bf   :  { %3427 = vrot.lane.b32.xlu0 %v3426_v21, %s3949_s23 }
 0x2c0   :  { %v1185_v52 = vpop.permute.xlu2 %1184  ;;  %v710_v57 = vpop.permute.xlu0 %709 }
 0x2c1   :  { %3267 = vmatpush.xpose.msk.msra.mxu1 %vm723_vm4, %v714_v33  ;;  %3302 = vmatpush.xpose.msk.msrb.mxu3 %vm723_vm4, %v1191_v41 }
 0x2c5   :  { %3268 = vmatpush.xpose.msk.msra.mxu1 %vm723_vm4, %v712_v14 }
 0x2c6   :  { %3467 = vrot.lane.b32.xlu2 %v3466_v50, %s3949_s23 }
 0x2c7   :  { %3432 = vrot.lane.b32.xlu0 %v3426_v21, %s3950_s2 }
 0x2c8   :  { %v700_v55 = vpop.permute.xlu2 %699  ;;  %v1187_v29 = vpop.permute.xlu1 %1186 }
 0x2c9   :  { %3269 = vmatpush.xpose.msk.msra.mxu1 %vm723_vm4, %v710_v57 }
 0x2cd   :  { %3270 = vmatpush.xpose.msk.msra.mxu1 %vm723_vm4, %v708_v53 }
 0x2ce   :  { %3477 = vrot.lane.b32.xlu2 %v3481_v11, %s3949_s23 }
 0x2cf   :  { %3437 = vrot.lane.b32.xlu0 %v3441_v37, %s3949_s23 }
 0x2d0   :  { %v1179_v59 = vpop.permute.xlu2 %1178  ;;  %v702_v7 = vpop.permute.xlu1 %701 }
 0x2d1   :  { %v1189_v47 = vpop.permute.xlu0 %1188  ;;  %3271 = vmatpush.xpose.msk.msra.mxu1 %vm723_vm4, %v706_v45 }
 0x2d2   :  { %3303 = vmatpush.xpose.msk.msrb.mxu3 %vm723_vm4, %v1189_v47 }
 0x2d6   :  { %3304 = vmatpush.xpose.msk.msrb.mxu3 %vm723_vm4, %v1187_v29  ;;  %3487 = vrot.lane.b32.xlu2 %v3486_v60, %s3949_s23  ;;  %s3217_s23 = sshll.u32 %s3952_s22, 4  ;;  %s3218_s23 = int_to_ptr.vmem [resolvable:$true] %s3217_s23 }
 0x2d7   :  { %3452 = vrot.lane.b32.xlu0 %v3446_v38, %s3950_s2 }
 0x2d8   :  { %v694_v61 = vpop.permute.xlu2 %693  ;;  %v1181_v63 = vpop.permute.xlu1 %1180 }
 0x2d9   :  { %v704_v18 = vpop.permute.xlu0 %703 }
 0x2da   :  { %3272 = vmatpush.xpose.msk.msra.mxu1 %vm723_vm4, %v704_v18  ;;  %3305 = vmatpush.xpose.msk.msrb.mxu3 %vm723_vm4, %v1185_v52 }
 0x2de   :  { %3273 = vmatpush.xpose.msk.msra.mxu1 %vm723_vm4, %v702_v7 }
 0x2df   :  { %3472 = vrot.lane.b32.xlu0 %v3466_v50, %s3950_s2 }
 0x2e0   :  { %v692_v58 = vpop.permute.xlu2 %691  ;;  %v696_v25 = vpop.permute.xlu1 %695 }
 0x2e1   :  { %v1183_v0 = vpop.permute.xlu0 %1182 }
 0x2e2   :  { %3274 = vmatpush.xpose.msk.msra.mxu1 %vm723_vm4, %v700_v55  ;;  %3306 = vmatpush.xpose.msk.msrb.mxu3 %vm723_vm4, %v1183_v0 }
 0x2e6   :  { %3307 = vmatpush.xpose.msk.msrb.mxu3 %vm723_vm4, %v1181_v63 }
 0x2e7   :  { %3492 = vrot.lane.b32.xlu0 %v3486_v60, %s3950_s2 }
 0x2e8   :  { %v1149_v2 = vpop.permute.xlu2 %1148  ;;  %v1175_v44 = vpop.permute.xlu1 %1174 }
 0x2e9   :  { %v698_v3 = vpop.permute.xlu0 %697 }
 0x2ea   :  { %3275 = vmatpush.xpose.msk.msra.mxu1 %vm723_vm4, %v698_v3  ;;  %3308 = vmatpush.xpose.msk.msrb.mxu3 %vm723_vm4, %v1179_v59 }
 0x2ee   :  { %3276 = vmatpush.xpose.msk.msra.mxu1 %vm723_vm4, %v696_v25 }
 0x2f0   :  { %v1155_v6 = vpop.permute.xlu2 %1154  ;;  %v1145_v19 = vpop.permute.xlu1 %1144 }
 0x2f1   :  { %v1177_v27 = vpop.permute.xlu0 %1176 }
 0x2f2   :  { %3277 = vmatpush.xpose.msk.msra.mxu1 %vm723_vm4, %v694_v61  ;;  %3309 = vmatpush.xpose.msk.msrb.mxu3 %vm723_vm4, %v1177_v27 }
 0x2f6   :  { %3278 = vmatpush.xpose.msk.msra.mxu1 %vm723_vm4, %v692_v58  ;;  %3310 = vmatpush.xpose.msk.msrb.mxu3 %vm723_vm4, %v1175_v44  ;;  %v655_v44 = vld [vmem:[%s5978_s24] sm:$0xff] }
 0x2f8   :  { %v1161_v12 = vpop.permute.xlu2 %1160  ;;  %v1151_v56 = vpop.permute.xlu1 %1150 }
 0x2f9   :  { %v1143_v13 = vpop.permute.xlu0 %1142  ;;  %3279 = vmatmul.msk.f32.vlgmr.msra.gmra.mxu1 %vm723_vm4, %v4546_v48 }
 0x2fa   :  { %3311 = vmatmul.msk.f32.vlgmr.msrb.gmra.mxu3 %vm723_vm4, %v1143_v13 }
 0x300   :  { %v4662_v62 = vpop.permute.xlu2 %1166 }
 0x301   :  { %v1147_v16 = vpop.permute.xlu0 %1146  ;;  %3280 = vmatmul.msk.f32.gmra.mxu1 %vm723_vm4, %v4555_v26  ;;  %v1157_v26 = vpop.permute.xlu1 %1156 }
 0x302   :  { %3312 = vmatmul.msk.f32.gmra.mxu3 %vm723_vm4, %v1145_v19 }
 0x308   :  { %v4667_v32 = vpop.permute.xlu2 %3442 }
 0x309   :  { %v1153_v31 = vpop.permute.xlu0 %1152  ;;  %3281 = vmatmul.msk.f32.gmra.mxu1 %vm723_vm4, %v4537_v22  ;;  %v1163_v22 = vpop.permute.xlu1 %1162  ;;  %v3444_v18 = vunpack.i.l.bf16 %v4667_v32  ;;  %v3445_v58 = vunpack.i.h.bf16 %v4667_v32  ;;  %v656_v32 = vld [vmem:[%s5978_s24 + $0x8] sm:$0xff] }
 0x30a   :  { %3313 = vmatmul.msk.f32.gmra.mxu3 %vm723_vm4, %v1147_v16 }
 0x310   :  { %v4672_v48 = vpop.permute.xlu2 %3462 }
 0x311   :  { %v1159_v33 = vpop.permute.xlu0 %1158  ;;  %3282 = vmatmul.msk.f32.gmra.mxu1 %vm723_vm4, %v4525_v9  ;;  %v4687_v9 = vpop.permute.xlu1 %1168  ;;  %v3464_v0 = vunpack.i.l.bf16 %v4672_v48 }
 0x312   :  { %3314 = vmatmul.msk.f32.gmra.mxu3 %vm723_vm4, %v1149_v2  ;;  %v3465_v2 = vunpack.i.h.bf16 %v4672_v48 }
 0x318   :  { %v4677_v34 = vpop.permute.xlu2 %1172 }
 0x319   :  { %v1165_v36 = vpop.permute.xlu0 %1164  ;;  %3283 = vmatmul.msk.f32.gmra.mxu1 %vm723_vm4, %v4534_v24  ;;  %v3418_v37 = vpop.permute.xlu1 %3417 }
 0x31a   :  { %3315 = vmatmul.msk.f32.gmra.mxu3 %vm723_vm4, %v1151_v56  ;;  %v3419_v38 = vunpack.i.l.bf16 %v3418_v37  ;;  %v3420_v41 = vunpack.i.h.bf16 %v3418_v37 }
 0x320   :  { %v3468_v35 = vpop.permute.xlu2 %3467 }
 0x321   :  { %v4682_v28 = vpop.permute.xlu0 %1170  ;;  %3284 = vmatmul.msk.f32.gmra.mxu1 %vm723_vm4, %v4513_v17  ;;  %v3448_v43 = vpop.permute.xlu1 %3447  ;;  %v3469_v53 = vunpack.i.l.bf16 %v3468_v35  ;;  %v3470_v57 = vunpack.i.h.bf16 %v3468_v35 }
 0x322   :  { %3316 = vmatmul.msk.f32.gmra.mxu3 %vm723_vm4, %v1153_v31  ;;  %v3449_v11 = vunpack.i.l.bf16 %v3448_v43  ;;  %v3450_v21 = vunpack.i.h.bf16 %v3448_v43 }
 0x328   :  { %v3478_v1 = vpop.permute.xlu2 %3477 }
 0x329   :  { %v4689_v49 = vpop.permute.xlu0 %3422  ;;  %3285 = vmatmul.msk.f32.gmra.mxu1 %vm723_vm4, %v4508_v15  ;;  %v3479_v29 = vunpack.i.l.bf16 %v3478_v1 }
 0x32a   :  { %3317 = vmatmul.msk.f32.gmra.mxu3 %vm723_vm4, %v1155_v6  ;;  %v3425_v7 = vunpack.i.h.bf16 %v4689_v49 }
 0x330   :  { %v3488_v24 = vpop.permute.xlu2 %3487 }
 0x331   :  { %v3428_v23 = vpop.permute.xlu0 %3427  ;;  %3286 = vmatmul.msk.f32.gmra.mxu1 %vm723_vm4, %v4516_v20  ;;  %v3489_v14 = vunpack.i.l.bf16 %v3488_v24  ;;  %v3490_v17 = vunpack.i.h.bf16 %v3488_v24  ;;  %v658_v24 = vld [vmem:[%s5978_s24 + $0x18] sm:$0xff] }
 0x332   :  { %3318 = vmatmul.msk.f32.gmra.mxu3 %vm723_vm4, %v1157_v26  ;;  %v3429_v15 = vunpack.i.l.bf16 %v3428_v23  ;;  %v3430_v20 = vunpack.i.h.bf16 %v3428_v23 }
 0x333   :  { %1077 = vmatpush.msrb.mxu2 %v3489_v14 }
 0x335   :  { %1078 = vmatpush.msrb.mxu2 %v3490_v17 }
 0x337   :  { %1079 = vmatpush.msrb.mxu2 %v3419_v38 }
 0x339   :  { %v3433_v42 = vpop.permute.xlu0 %3432  ;;  %3287 = vmatmul.msk.f32.gmra.mxu1 %vm723_vm4, %v4484_v5  ;;  %1080 = vmatpush.msrb.mxu2 %v3420_v41  ;;  %v3458_v5 = vpop.permute.xlu1 %3457 }
 0x33a   :  { %3319 = vmatmul.msk.f32.gmra.mxu3 %vm723_vm4, %v1159_v33  ;;  %v3459_v50 = vunpack.i.l.bf16 %v3458_v5  ;;  %v3435_v61 = vunpack.i.h.bf16 %v3433_v42 }
 0x33b   :  { %1081 = vmatpush.msrb.mxu2 %v3429_v15 }
 0x33d   :  { %1082 = vmatpush.msrb.mxu2 %v3430_v20 }
 0x341   :  { %v3438_v30 = vpop.permute.xlu0 %3437  ;;  %3288 = vmatmul.msk.f32.gmra.mxu1 %vm723_vm4, %v4478_v39  ;;  %v3460_v39 = vunpack.i.h.bf16 %v3458_v5  ;;  %v3483_v3 = vpop.permute.xlu1 %3482 }
 0x342   :  { %3320 = vmatmul.msk.f32.gmra.mxu3 %vm723_vm4, %v1161_v12  ;;  %v3439_v45 = vunpack.i.l.bf16 %v3438_v30  ;;  %v3440_v46 = vunpack.i.h.bf16 %v3438_v30  ;;  %v3484_v27 = vunpack.i.l.bf16 %v3483_v3  ;;  %v3485_v13 = vunpack.i.h.bf16 %v3483_v3 }
 0x344   :  { %1083 = vmatpush.msrb.mxu2 %v3439_v45 }
 0x346   :  { %1084 = vmatpush.msrb.mxu2 %v3440_v46 }
 0x348   :  { %1085 = vmatpush.msrb.mxu2 %v3449_v11  ;;  %v660_v11 = vld [vmem:[%s5978_s24 + $0x28] sm:$0xff] }
 0x349   :  { %v3453_v52 = vpop.permute.xlu0 %3452  ;;  %3289 = vmatmul.msk.f32.gmra.mxu1 %vm723_vm4, %v4497_v10  ;;  %v3480_v10 = vunpack.i.h.bf16 %v3478_v1 }
 0x34a   :  { %1086 = vmatpush.msrb.mxu2 %v3450_v21  ;;  %3321 = vmatmul.msk.f32.gmra.mxu3 %vm723_vm4, %v1163_v22  ;;  %v3455_v63 = vunpack.i.h.bf16 %v3453_v52 }
 0x34c   :  { %1087 = vmatpush.msrb.mxu2 %v3459_v50 }
 0x34e   :  { %1088 = vmatpush.msrb.mxu2 %v3460_v39 }
 0x350   :  { %1089 = vmatpush.msrb.mxu2 %v3469_v53 }
 0x351   :  { %v3473_v55 = vpop.permute.xlu0 %3472  ;;  %3290 = vmatmul.msk.f32.gmra.mxu1 %vm723_vm4, %v4438_v54  ;;  %v3424_v54 = vunpack.i.l.bf16 %v4689_v49 }
 0x352   :  { %1090 = vmatpush.msrb.mxu2 %v3470_v57  ;;  %3322 = vmatmul.msk.f32.gmra.mxu3 %vm723_vm4, %v1165_v36  ;;  %v3475_v25 = vunpack.i.h.bf16 %v3473_v55  ;;  %v657_v36 = vld [vmem:[%s5978_s24 + $0x10] sm:$0xff] }
 0x353   :  { %v661_v57 = vld [vmem:[%s5978_s24 + $0x30] sm:$0xff] }
 0x354   :  { %1091 = vmatpush.msrb.mxu2 %v3479_v29 }
 0x356   :  { %1092 = vmatpush.msrb.mxu2 %v3480_v10 }
 0x359   :  { %v3493_v59 = vpop.permute.xlu0 %3492  ;;  %3291 = vmatmul.msk.f32.gmra.mxu1 %vm723_vm4, %v4452_v51  ;;  %v3434_v51 = vunpack.i.l.bf16 %v3433_v42  ;;  %v659_v42 = vld [vmem:[%s5978_s24 + $0x20] sm:$0xff] }
 0x35a   :  { %3323 = vmatmul.msk.f32.gmra.mxu3 %vm723_vm4, %v4662_v62  ;;  %v3494_v47 = vunpack.i.l.bf16 %v3493_v59  ;;  %v3495_v60 = vunpack.i.h.bf16 %v3493_v59 }
 0x35c   :  { %1559 = vmatpush.msrb.mxu0 %v3494_v47 }
 0x35e   :  { %1560 = vmatpush.msrb.mxu0 %v3495_v60 }
 0x360   :  { %1561 = vmatpush.msrb.mxu0 %v3424_v54 }
 0x361   :  { %3292 = vmatmul.msk.f32.gmra.mxu1 %vm723_vm4, %v4463_v4  ;;  %v3454_v4 = vunpack.i.l.bf16 %v3453_v52 }
 0x362   :  { %3324 = vmatmul.msk.f32.gmra.mxu3 %vm723_vm4, %v4687_v9  ;;  %1562 = vmatpush.msrb.mxu0 %v3425_v7 }
 0x364   :  { %1563 = vmatpush.msrb.mxu0 %v3434_v51 }
 0x366   :  { %1564 = vmatpush.msrb.mxu0 %v3435_v61  ;;  %v662_v61 = vld [vmem:[%s5978_s24 + $0x38] sm:$0xff] }
 0x368   :  { %1565 = vmatpush.msrb.mxu0 %v3444_v18 }
 0x369   :  { %3293 = vmatmul.msk.f32.gmra.mxu1 %vm723_vm4, %v4470_v40  ;;  %v3474_v40 = vunpack.i.l.bf16 %v3473_v55 }
 0x36a   :  { %3325 = vmatmul.msk.f32.gmra.mxu3 %vm723_vm4, %v4682_v28  ;;  %1566 = vmatpush.msrb.mxu0 %v3445_v58  ;;  %v663_v58 = vld [vmem:[%s5978_s24 + $0x40] sm:$0xff] }
 0x36c   :  { %1567 = vmatpush.msrb.mxu0 %v3454_v4 }
 0x36e   :  { %1568 = vmatpush.msrb.mxu0 %v3455_v63 }
 0x370   :  { %1569 = vmatpush.msrb.mxu0 %v3464_v0 }
 0x371   :  { %3294 = vmatmul.msk.f32.gmra.mxu1 %vm723_vm4, %v4489_v8 }
 0x372   :  { %3326 = vmatmul.msk.f32.gmra.mxu3 %vm723_vm4, %v4677_v34  ;;  %1570 = vmatpush.msrb.mxu0 %v3465_v2 }
 0x374   :  { %1571 = vmatpush.msrb.mxu0 %v3474_v40 }
 0x376   :  { %v805_v6 = vpop.f32.mrf.mxu1  ;;  %1572 = vmatpush.msrb.mxu0 %v3475_v25 }
 0x377   :  { %v853_v12 = vmul.f32 0.25, %v805_v6 }
 0x378   :  { %1573 = vmatpush.msrb.mxu0 %v3484_v27 }
 0x379   :  { %v4734_v19 = vadd.f32 %v853_v12, %v655_v44 }
 0x37a   :  { %1574 = vmatpush.msrb.mxu0 %v3485_v13  ;;  %v664_v13 = vld [vmem:[%s5978_s24 + $0x48] sm:$0xff] }
 0x37b   :  { %885 = vmax.xlane.f32.xlu1 %v4734_v19 }
 0x37d   :  { %v1287_v8 = vpop.f32.mrf.mxu3 }
 0x37e   :  { %v1335_v62 = vmul.f32 0.25, %v1287_v8  ;;  %v808_v16 = vpop.f32.mrf.mxu1 }
 0x37f   :  { %v854_v31 = vmul.f32 0.25, %v808_v16 }
 0x380   :  { %v4740_v56 = vadd.f32 %v1335_v62, %v655_v44 }
 0x381   :  { %v4742_v48 = vadd.f32 %v854_v31, %v656_v32  ;;  %v665_v31 = vld [vmem:[%s5978_s24 + $0x50] sm:$0xff] }
 0x382   :  { %1367 = vmax.xlane.f32.xlu0 %v4740_v56 }
 0x383   :  { %887 = vmax.xlane.f32.xlu2 %v4742_v48 }
 0x385   :  { %v1290_v33 = vpop.f32.mrf.mxu3 }
 0x386   :  { %v1336_v26 = vmul.f32 0.25, %v1290_v33  ;;  %v811_v34 = vpop.f32.mrf.mxu1 }
 0x387   :  { %v855_v22 = vmul.f32 0.25, %v811_v34 }
 0x388   :  { %v4749_v35 = vadd.f32 %v1336_v26, %v656_v32 }
 0x389   :  { %v4751_v28 = vadd.f32 %v855_v22, %v657_v36 }
 0x38a   :  { %1369 = vmax.xlane.f32.xlu1 %v4749_v35 }
 0x38b   :  { %889 = vmax.xlane.f32.xlu0 %v4751_v28 }
 0x38d   :  { %v1293_v9 = vpop.f32.mrf.mxu3 }
 0x38e   :  { %v1337_v1 = vmul.f32 0.25, %v1293_v9  ;;  %v814_v49 = vpop.f32.mrf.mxu1 }
 0x38f   :  { %v856_v23 = vmul.f32 0.25, %v814_v49 }
 0x390   :  { %v4758_v14 = vadd.f32 %v1337_v1, %v657_v36  ;;  %v666_v36 = vld [vmem:[%s5978_s24 + $0x58] sm:$0xff] }
 0x391   :  { %v4760_v37 = vadd.f32 %v856_v23, %v658_v24 }
 0x392   :  { %1371 = vmax.xlane.f32.xlu2 %v4758_v14 }
 0x393   :  { %891 = vmax.xlane.f32.xlu1 %v4760_v37 }
 0x395   :  { %v1296_v17 = vpop.f32.mrf.mxu3 }
 0x396   :  { %v1338_v38 = vmul.f32 0.25, %v1296_v17  ;;  %v817_v41 = vpop.f32.mrf.mxu1 }
 0x397   :  { %v857_v15 = vmul.f32 0.25, %v817_v41 }
 0x398   :  { %v4767_v20 = vadd.f32 %v1338_v38, %v658_v24 }
 0x399   :  { %v4769_v43 = vadd.f32 %v857_v15, %v659_v42 }
 0x39a   :  { %1373 = vmax.xlane.f32.xlu0 %v4767_v20 }
 0x39b   :  { %893 = vmax.xlane.f32.xlu1 %v4769_v43 }
 0x39d   :  { %v1299_v30 = vpop.f32.mrf.mxu3 }
 0x39e   :  { %v1339_v45 = vmul.f32 0.25, %v1299_v30  ;;  %v820_v46 = vpop.f32.mrf.mxu1 }
 0x39f   :  { %v858_v5 = vmul.f32 0.25, %v820_v46 }
 0x3a0   :  { %v4776_v21 = vadd.f32 %v1339_v45, %v659_v42 }
 0x3a1   :  { %v4778_v52 = vadd.f32 %v858_v5, %v660_v11 }
 0x3a2   :  { %1375 = vmax.xlane.f32.xlu2 %v4776_v21 }
 0x3a3   :  { %895 = vmax.xlane.f32.xlu1 %v4778_v52 }
 0x3a5   :  { %v1302_v50 = vpop.f32.mrf.mxu3 }
 0x3a6   :  { %v1340_v39 = vmul.f32 0.25, %v1302_v50  ;;  %v823_v53 = vpop.f32.mrf.mxu1 }
 0x3a7   :  { %v859_v55 = vmul.f32 0.25, %v823_v53 }
 0x3a8   :  { %v4785_v29 = vadd.f32 %v1340_v39, %v660_v11 }
 0x3a9   :  { %v4787_v10 = vadd.f32 %v859_v55, %v661_v57 }
 0x3aa   :  { %1377 = vmax.xlane.f32.xlu0 %v4785_v29 }
 0x3ab   :  { %897 = vmax.xlane.f32.xlu2 %v4787_v10 }
 0x3ad   :  { %v1305_v59 = vpop.f32.mrf.mxu3 }
 0x3ae   :  { %v1341_v47 = vmul.f32 0.25, %v1305_v59  ;;  %v826_v60 = vpop.f32.mrf.mxu1 }
 0x3af   :  { %v860_v7 = vmul.f32 0.25, %v826_v60 }
 0x3b0   :  { %v4791_v54 = vadd.f32 %v1341_v47, %v661_v57 }
 0x3b1   :  { %v4800_v63 = vadd.f32 %v860_v7, %v662_v61 }
 0x3b2   :  { %1379 = vmax.xlane.f32.xlu1 %v4791_v54 }
 0x3b5   :  { %v1308_v51 = vpop.f32.mrf.mxu3 }
 0x3b6   :  { %v829_v18 = vpop.f32.mrf.mxu1  ;;  %v1342_v2 = vmul.f32 0.25, %v1308_v51 }
 0x3b7   :  { %v861_v4 = vmul.f32 0.25, %v829_v18 }
 0x3b8   :  { %v4805_v6 = vadd.f32 %v1342_v2, %v662_v61 }
 0x3b9   :  { %v4802_v0 = vadd.f32 %v861_v4, %v663_v58 }
 0x3ba   :  { %899 = vmax.xlane.f32.xlu1 %v4800_v63 }
 0x3bd   :  { %v1311_v40 = vpop.f32.mrf.mxu3 }
 0x3be   :  { %v1343_v3 = vmul.f32 0.25, %v1311_v40  ;;  %v832_v25 = vpop.f32.mrf.mxu1 }
 0x3bf   :  { %v862_v44 = vmul.f32 0.25, %v832_v25 }
 0x3c0   :  { %v4807_v27 = vadd.f32 %v1343_v3, %v663_v58 }
 0x3c1   :  { %v4814_v62 = vadd.f32 %v862_v44, %v664_v13 }
 0x3c2   :  { %1381 = vmax.xlane.f32.xlu1 %v4805_v6  ;;  %1383 = vmax.xlane.f32.xlu2 %v4807_v27 }
 0x3c5   :  { %v1314_v12 = vpop.f32.mrf.mxu3 }
 0x3c6   :  { %v835_v8 = vpop.f32.mrf.mxu1  ;;  %v1344_v30 = vmul.f32 0.25, %v1314_v12 }
 0x3ca   :  { %903 = vmax.xlane.f32.xlu2 %v4814_v62 }
 0x3cd   :  { %v1317_v16 = vpop.f32.mrf.mxu3 }
 0x3ce   :  { %v1345_v32 = vmul.f32 0.25, %v1317_v16  ;;  %v838_v26 = vpop.f32.mrf.mxu1  ;;  %v667_v16 = vld [vmem:[%s5978_s24 + $0x60] sm:$0xff] }
 0x3cf   :  { %v864_v34 = vmul.f32 0.25, %v838_v26  ;;  %v668_v26 = vld [vmem:[%s5978_s24 + $0x68] sm:$0xff] }
 0x3d0   :  { %v4820_v33 = vadd.f32 %v1345_v32, %v665_v31 }
 0x3d1   :  { %v4826_v22 = vadd.f32 %v864_v34, %v666_v36 }
 0x3d2   :  { %1387 = vmax.xlane.f32.xlu2 %v4820_v33 }
 0x3d5   :  { %v1320_v45 = vpop.f32.mrf.mxu3 }
 0x3d6   :  { %v1346_v53 = vmul.f32 0.25, %v1320_v45 }
 0x3d8   :  { %v4847_v60 = vadd.f32 %v1346_v53, %v666_v36 }
 0x3da   :  { %907 = vmax.xlane.f32.xlu2 %v4826_v22 }
 0x3ee   :  { %v886_v9 = vpop.xlane.xlu1 %885 }
 0x3ef   :  { %v917_v1 = vsub.f32 %v4734_v19, %v886_v9 }
 0x3f1   :  { %v933_v49 = vmul.f32 1.442695, %v917_v1  ;;  %v841_v1 = vpop.f32.mrf.mxu1 }
 0x3f3   :  { %3538 = vpow2.f32 %v933_v49 }
 0x3f5   :  { %v1368_v24 = vpop.xlane.xlu0 %1367 }
 0x3f6   :  { %v1399_v23 = vsub.f32 %v4740_v56, %v1368_v24  ;;  %v888_v17 = vpop.xlane.xlu2 %887  ;;  %v4838_v56 = vadd.f32 %v1344_v30, %v664_v13 }
 0x3f7   :  { %v918_v38 = vsub.f32 %v4742_v48, %v888_v17 }
 0x3f8   :  { %v1415_v41 = vmul.f32 1.442695, %v1399_v23 }
 0x3f9   :  { %v4832_v42 = vpop.eup %3538  ;;  %v935_v15 = vmul.f32 1.442695, %v918_v38  ;;  %v844_v45 = vpop.f32.mrf.mxu1 }
 0x3fa   :  { %3540 = vpow2.f32 %v1415_v41  ;;  %965 = vadd.xlane.f32.xlu0 %v4832_v42 }
 0x3fb   :  { %3542 = vpow2.f32 %v935_v15 }
 0x3fd   :  { %v1370_v46 = vpop.xlane.xlu1 %1369 }
 0x3fe   :  { %v890_v19 = vpop.xlane.xlu0 %889  ;;  %v1400_v39 = vsub.f32 %v4749_v35, %v1370_v46  ;;  %v863_v35 = vmul.f32 0.25, %v835_v8 }
 0x3ff   :  { %v919_v11 = vsub.f32 %v4751_v28, %v890_v19  ;;  %v1323_v28 = vpop.f32.mrf.mxu3 }
 0x400   :  { %v4836_v5 = vpop.eup %3540  ;;  %v1417_v57 = vmul.f32 1.442695, %v1400_v39  ;;  %v1347_v25 = vmul.f32 0.25, %v1323_v28  ;;  %v865_v39 = vmul.f32 0.25, %v841_v1 }
 0x401   :  { %v4840_v50 = vpop.eup %3542  ;;  %v937_v48 = vmul.f32 1.442695, %v919_v11  ;;  %1447 = vadd.xlane.f32.xlu1 %v4836_v5 }
 0x402   :  { %967 = vadd.xlane.f32.xlu2 %v4840_v50  ;;  %1385 = vmax.xlane.f32.xlu0 %v4838_v56 }
 0x403   :  { %3544 = vpow2.f32 %v937_v48 }
 0x404   :  { %3546 = vpow2.f32 %v1417_v57 }
 0x405   :  { %v1372_v47 = vpop.xlane.xlu2 %1371 }
 0x406   :  { %v892_v55 = vpop.xlane.xlu1 %891  ;;  %v1401_v61 = vsub.f32 %v4758_v14, %v1372_v47  ;;  %v4905_v47 = vadd.f32 %v865_v39, %v667_v16 }
 0x407   :  { %v920_v59 = vsub.f32 %v4760_v37, %v892_v55  ;;  %v4855_v37 = vadd.f32 %v863_v35, %v665_v31  ;;  %v1326_v3 = vpop.f32.mrf.mxu3  ;;  %v4869_v31 = vadd.f32 %v1347_v25, %v667_v16 }
 0x408   :  { %v1419_v58 = vmul.f32 1.442695, %v1401_v61  ;;  %v1348_v44 = vmul.f32 0.25, %v1326_v3 }
 0x409   :  { %v4849_v7 = vpop.eup %3544  ;;  %v939_v51 = vmul.f32 1.442695, %v920_v59  ;;  %901 = vmax.xlane.f32.xlu1 %v4802_v0  ;;  %v847_v59 = vpop.f32.mrf.mxu1 }
 0x40a   :  { %969 = vadd.xlane.f32.xlu2 %v4849_v7  ;;  %1389 = vmax.xlane.f32.xlu0 %v4847_v60  ;;  %v4857_v4 = vpop.eup %3546  ;;  %v4874_v36 = vadd.f32 %v1348_v44, %v668_v26  ;;  %v867_v35 = vmul.f32 0.25, %v847_v59 }
 0x40b   :  { %3548 = vpow2.f32 %v939_v51 }
 0x40c   :  { %3550 = vpow2.f32 %v1419_v58 }
 0x40d   :  { %v1374_v2 = vpop.xlane.xlu0 %1373 }
 0x40e   :  { %v894_v18 = vpop.xlane.xlu1 %893  ;;  %v1402_v14 = vsub.f32 %v4767_v20, %v1374_v2 }
 0x410   :  { %v1421_v32 = vmul.f32 1.442695, %v1402_v14 }
 0x411   :  { %v4859_v40 = vpop.eup %3548  ;;  %905 = vmax.xlane.f32.xlu1 %v4855_v37 }
 0x412   :  { %1449 = vadd.xlane.f32.xlu0 %v4857_v4  ;;  %971 = vadd.xlane.f32.xlu2 %v4859_v40  ;;  %v4876_v20 = vpop.eup %3550 }
 0x415   :  { %v1376_v12 = vpop.xlane.xlu2 %1375 }
 0x416   :  { %v1403_v13 = vsub.f32 %v4776_v21, %v1376_v12  ;;  %v896_v8 = vpop.xlane.xlu1 %895  ;;  %v921_v21 = vsub.f32 %v4769_v43, %v894_v18 }
 0x417   :  { %v922_v9 = vsub.f32 %v4778_v52, %v896_v8 }
 0x418   :  { %v1423_v34 = vmul.f32 1.442695, %v1403_v13  ;;  %v941_v17 = vmul.f32 1.442695, %v921_v21 }
 0x419   :  { %1391 = vmax.xlane.f32.xlu1 %v4869_v31  ;;  %v943_v49 = vmul.f32 1.442695, %v922_v9 }
 0x41a   :  { %3552 = vpow2.f32 %v1423_v34  ;;  %1451 = vadd.xlane.f32.xlu0 %v4876_v20  ;;  %1393 = vmax.xlane.f32.xlu2 %v4874_v36 }
 0x41b   :  { %3554 = vpow2.f32 %v1421_v32  ;;  %v1329_v32 = vpop.f32.mrf.mxu3 }
 0x41c   :  { %3556 = vpow2.f32 %v943_v49  ;;  %v850_v49 = vpop.f32.mrf.mxu1 }
 0x41d   :  { %v1378_v24 = vpop.xlane.xlu0 %1377 }
 0x41e   :  { %v1404_v23 = vsub.f32 %v4785_v29, %v1378_v24  ;;  %v898_v38 = vpop.xlane.xlu2 %897  ;;  %v868_v24 = vmul.f32 0.25, %v850_v49 }
 0x41f   :  { %v923_v30 = vsub.f32 %v4787_v10, %v898_v38  ;;  %v866_v10 = vmul.f32 0.25, %v844_v45 }
 0x420   :  { %v4884_v41 = vpop.eup %3552  ;;  %v1425_v52 = vmul.f32 1.442695, %v1404_v23  ;;  %v670_v23 = vld [vmem:[%s5978_s24 + $0x78] sm:$0xff] }
 0x421   :  { %v4886_v15 = vpop.eup %3554  ;;  %1455 = vadd.xlane.f32.xlu1 %v4884_v41  ;;  %v945_v46 = vmul.f32 1.442695, %v923_v30  ;;  %v4901_v55 = vadd.f32 %v866_v10, %v668_v26  ;;  %v1349_v26 = vmul.f32 0.25, %v1329_v32  ;;  %v4944_v38 = vadd.f32 %v868_v24, %v670_v23 }
 0x422   :  { %3558 = vpow2.f32 %v1425_v52  ;;  %1453 = vadd.xlane.f32.xlu0 %v4886_v15  ;;  %v4891_v29 = vpop.eup %3556 }
 0x423   :  { %3560 = vpow2.f32 %v941_v17 }
 0x424   :  { %3562 = vpow2.f32 %v945_v46 }
 0x425   :  { %v1380_v43 = vpop.xlane.xlu1 %1379 }
 0x426   :  { %v1405_v48 = vsub.f32 %v4791_v54, %v1380_v43  ;;  %v669_v54 = vld [vmem:[%s5978_s24 + $0x70] sm:$0xff] }
 0x427   :  { %v4935_v1 = vadd.f32 %v1349_v26, %v669_v54 }
 0x428   :  { %v4893_v19 = vpop.eup %3558  ;;  %v1427_v57 = vmul.f32 1.442695, %v1405_v48 }
 0x429   :  { %v4895_v11 = vpop.eup %3560  ;;  %1457 = vadd.xlane.f32.xlu2 %v4893_v19  ;;  %975 = vadd.xlane.f32.xlu1 %v4891_v29 }
 0x42a   :  { %973 = vadd.xlane.f32.xlu0 %v4895_v11  ;;  %v4903_v28 = vpop.eup %3562  ;;  %3564 = vpow2.f32 %v1427_v57 }
 0x42d   :  { %v900_v53 = vpop.xlane.xlu1 %899 }
 0x42e   :  { %v924_v51 = vsub.f32 %v4800_v63, %v900_v53  ;;  %v4916_v63 = vadd.f32 %v867_v35, %v669_v54 }
 0x430   :  { %v947_v61 = vmul.f32 1.442695, %v924_v51  ;;  %v4918_v44 = vpop.eup %3564 }
 0x431   :  { %977 = vadd.xlane.f32.xlu2 %v4903_v28  ;;  %911 = vmax.xlane.f32.xlu1 %v4901_v55 }
 0x432   :  { %909 = vmax.xlane.f32.xlu0 %v4905_v47  ;;  %3566 = vpow2.f32 %v947_v61 }
 0x435   :  { %v1384_v18 = vpop.xlane.xlu2 %1383  ;;  %v1382_v58 = vpop.xlane.xlu1 %1381 }
 0x436   :  { %v1407_v2 = vsub.f32 %v4807_v27, %v1384_v18  ;;  %v1406_v3 = vsub.f32 %v4805_v6, %v1382_v58 }
 0x438   :  { %v1431_v25 = vmul.f32 1.442695, %v1407_v2  ;;  %v1429_v14 = vmul.f32 1.442695, %v1406_v3  ;;  %v4923_v8 = vpop.eup %3566 }
 0x439   :  { %913 = vmax.xlane.f32.xlu2 %v4916_v63 }
 0x43a   :  { %3568 = vpow2.f32 %v1431_v25  ;;  %1459 = vadd.xlane.f32.xlu0 %v4918_v44 }
 0x43b   :  { %3570 = vpow2.f32 %v1429_v14 }
 0x43d   :  { %v904_v12 = vpop.xlane.xlu2 %903 }
 0x43e   :  { %v926_v13 = vsub.f32 %v4814_v62, %v904_v12 }
 0x440   :  { %v4925_v27 = vpop.eup %3568  ;;  %v951_v6 = vmul.f32 1.442695, %v926_v13 }
 0x441   :  { %v4927_v16 = vpop.eup %3570  ;;  %1463 = vadd.xlane.f32.xlu2 %v4925_v27 }
 0x442   :  { %3572 = vpow2.f32 %v951_v6  ;;  %1461 = vadd.xlane.f32.xlu1 %v4927_v16  ;;  %979 = vadd.xlane.f32.xlu0 %v4923_v8 }
 0x445   :  { %v1388_v34 = vpop.xlane.xlu2 %1387 }
 0x446   :  { %v1409_v9 = vsub.f32 %v4820_v33, %v1388_v34 }
 0x448   :  { %v4933_v62 = vpop.eup %3572  ;;  %v1435_v21 = vmul.f32 1.442695, %v1409_v9 }
 0x449   :  { %983 = vadd.xlane.f32.xlu2 %v4933_v62 }
 0x44a   :  { %3574 = vpow2.f32 %v1435_v21  ;;  %1395 = vmax.xlane.f32.xlu0 %v4935_v1 }
 0x44d   :  { %v908_v33 = vpop.xlane.xlu2 %907 }
 0x44e   :  { %v928_v53 = vsub.f32 %v4826_v22, %v908_v33 }
 0x450   :  { %v4942_v17 = vpop.eup %3574 }
 0x451   :  { %1467 = vadd.xlane.f32.xlu2 %v4942_v17 }
 0x452   :  { %915 = vmax.xlane.f32.xlu0 %v4944_v38 }
 0x46d   :  { %v966_v52 = vpop.xlane.xlu0 %965 }
 0x46e   :  { %3576 = vrcp.f32 %v966_v52 }
 0x474   :  { %v3577_v30 = vpop.eup %3576  ;;  %v1448_v43 = vpop.xlane.xlu1 %1447 }
 0x475   :  { %3578 = vrcp.f32 %v1448_v43  ;;  %v968_v45 = vpop.xlane.xlu2 %967  ;;  %v1386_v46 = vpop.xlane.xlu0 %1385  ;;  %v1013_v10 = vmul.f32 %v3577_v30, %v4832_v42  ;;  %v955_v42 = vmul.f32 1.442695, %v928_v53 }
 0x476   :  { %3580 = vrcp.f32 %v968_v45  ;;  %v1408_v48 = vsub.f32 %v4838_v56, %v1386_v46 }
 0x477   :  { %1093 = vmatmul.f32.vlgmr.msrb.gmra.mxu2 %v1013_v10 }
 0x478   :  { %v1433_v39 = vmul.f32 1.442695, %v1408_v48 }
 0x47a   :  { %3582 = vpow2.f32 %v1433_v39 }
 0x47b   :  { %v3579_v57 = vpop.eup %3578 }
 0x47c   :  { %v3581_v59 = vpop.eup %3580  ;;  %v902_v51 = vpop.xlane.xlu1 %901  ;;  %v1495_v35 = vmul.f32 %v3579_v57, %v4836_v5 }
 0x47d   :  { %v925_v54 = vsub.f32 %v4802_v0, %v902_v51  ;;  %v970_v61 = vpop.xlane.xlu2 %969  ;;  %v1390_v18 = vpop.xlane.xlu0 %1389  ;;  %v1014_v58 = vmul.f32 %v3581_v59, %v4840_v50 }
 0x47e   :  { %3584 = vrcp.f32 %v970_v61  ;;  %1575 = vmatmul.f32.vlgmr.msrb.gmra.mxu0 %v1495_v35  ;;  %v1332_v50 = vpop.f32.mrf.mxu3  ;;  %v1410_v52 = vsub.f32 %v4847_v60, %v1390_v18 }
 0x47f   :  { %v949_v56 = vmul.f32 1.442695, %v925_v54  ;;  %1096 = vmatmul.f32.gmra.mxu2 %v1014_v58  ;;  %v1350_v6 = vmul.f32 0.25, %v1332_v50 }
 0x480   :  { %v4954_v2 = vpop.eup %3582  ;;  %v1437_v45 = vmul.f32 1.442695, %v1410_v52 }
 0x481   :  { %3586 = vpow2.f32 %v949_v56  ;;  %1465 = vadd.xlane.f32.xlu0 %v4954_v2  ;;  %v4968_v33 = vadd.f32 %v1350_v6, %v670_v23 }
 0x482   :  { %3588 = vpow2.f32 %v955_v42 }
 0x484   :  { %v3585_v22 = vpop.eup %3584  ;;  %v906_v3 = vpop.xlane.xlu1 %905 }
 0x485   :  { %v1450_v5 = vpop.xlane.xlu0 %1449  ;;  %v972_v25 = vpop.xlane.xlu2 %971  ;;  %v1015_v0 = vmul.f32 %v3585_v22, %v4849_v7  ;;  %v927_v13 = vsub.f32 %v4855_v37, %v906_v3 }
 0x486   :  { %3590 = vrcp.f32 %v1450_v5 }
 0x487   :  { %v4958_v14 = vpop.eup %3586  ;;  %3592 = vrcp.f32 %v972_v25  ;;  %1099 = vmatmul.f32.gmra.mxu2 %v1015_v0  ;;  %v953_v26 = vmul.f32 1.442695, %v927_v13 }
 0x488   :  { %v4960_v12 = vpop.eup %3588  ;;  %981 = vadd.xlane.f32.xlu1 %v4958_v14 }
 0x489   :  { %987 = vadd.xlane.f32.xlu0 %v4960_v12 }
 0x48c   :  { %v3591_v32 = vpop.eup %3590  ;;  %v1392_v34 = vpop.xlane.xlu1 %1391 }
 0x48d   :  { %v3593_v9 = vpop.eup %3592  ;;  %v1411_v7 = vsub.f32 %v4869_v31, %v1392_v34  ;;  %v1452_v21 = vpop.xlane.xlu0 %1451  ;;  %v1496_v49 = vmul.f32 %v3591_v32, %v4857_v4 }
 0x48e   :  { %3594 = vrcp.f32 %v1452_v21  ;;  %v1016_v24 = vmul.f32 %v3593_v9, %v4859_v40  ;;  %v1394_v43 = vpop.xlane.xlu2 %1393 }
 0x48f   :  { %v1439_v37 = vmul.f32 1.442695, %v1411_v7  ;;  %1578 = vmatmul.f32.gmra.mxu0 %v1496_v49  ;;  %3596 = vpow2.f32 %v953_v26  ;;  %v1412_v3 = vsub.f32 %v4874_v36, %v1394_v43  ;;  %v674_v36 = vld [vmem:[#allocation7 + $0x18] sm:$0xff] }
 0x490   :  { %1102 = vmatmul.f32.gmra.mxu2 %v1016_v24  ;;  %1397 = vmax.xlane.f32.xlu1 %v4968_v33 }
 0x491   :  { %3598 = vpow2.f32 %v1439_v37  ;;  %1686 = vmatpush.msra.mxu2 %v674_v36 }
 0x494   :  { %v3595_v30 = vpop.eup %3594  ;;  %v1456_v31 = vpop.xlane.xlu1 %1455 }
 0x495   :  { %v1454_v46 = vpop.xlane.xlu0 %1453  ;;  %v1497_v4 = vmul.f32 %v3595_v30, %v4876_v20  ;;  %v4973_v10 = vpop.eup %3596 }
 0x496   :  { %3600 = vrcp.f32 %v1454_v46 }
 0x497   :  { %v4975_v40 = vpop.eup %3598  ;;  %1581 = vmatmul.f32.gmra.mxu0 %v1497_v4  ;;  %3602 = vpow2.f32 %v1437_v45 }
 0x498   :  { %985 = vadd.xlane.f32.xlu1 %v4973_v10  ;;  %1471 = vadd.xlane.f32.xlu0 %v4975_v40  ;;  %3604 = vrcp.f32 %v1456_v31 }
 0x49c   :  { %v3601_v60 = vpop.eup %3600  ;;  %v1458_v23 = vpop.xlane.xlu2 %1457 }
 0x49d   :  { %v976_v48 = vpop.xlane.xlu1 %975  ;;  %v974_v39 = vpop.xlane.xlu0 %973  ;;  %v1498_v53 = vmul.f32 %v3601_v60, %v4886_v15 }
 0x49e   :  { %v4980_v57 = vpop.eup %3602  ;;  %3606 = vrcp.f32 %v974_v39 }
 0x49f   :  { %1584 = vmatmul.f32.gmra.mxu0 %v1498_v53  ;;  %v3605_v20 = vpop.eup %3604  ;;  %3608 = vrcp.f32 %v1458_v23 }
 0x4a0   :  { %1469 = vadd.xlane.f32.xlu1 %v4980_v57  ;;  %3610 = vrcp.f32 %v976_v48  ;;  %v1499_v18 = vmul.f32 %v3605_v20, %v4884_v41 }
 0x4a4   :  { %v978_v59 = vpop.xlane.xlu2 %977  ;;  %v3607_v35 = vpop.eup %3606 }
 0x4a5   :  { %v912_v51 = vpop.xlane.xlu1 %911  ;;  %v910_v61 = vpop.xlane.xlu0 %909  ;;  %v1017_v15 = vmul.f32 %v3607_v35, %v4895_v11 }
 0x4a6   :  { %v930_v54 = vsub.f32 %v4901_v55, %v912_v51  ;;  %v929_v58 = vsub.f32 %v4905_v47, %v910_v61  ;;  %v3609_v22 = vpop.eup %3608  ;;  %v1441_v47 = vmul.f32 1.442695, %v1412_v3 }
 0x4a7   :  { %1587 = vmatmul.f32.gmra.mxu0 %v1499_v18  ;;  %1105 = vmatmul.f32.gmra.mxu2 %v1017_v15  ;;  %v3611_v5 = vpop.eup %3610  ;;  %v1500_v41 = vmul.f32 %v3609_v22, %v4893_v19  ;;  %v673_v15 = vld [vmem:[#allocation7 + $0x10] sm:$0xff] }
 0x4a8   :  { %v959_v42 = vmul.f32 1.442695, %v930_v54  ;;  %v957_v56 = vmul.f32 1.442695, %v929_v58  ;;  %v1018_v11 = vmul.f32 %v3611_v5, %v4891_v29  ;;  %1687 = vmatpush.msra.mxu2 %v673_v15 }
 0x4aa   :  { %3612 = vpow2.f32 %v959_v42 }
 0x4ab   :  { %3614 = vpow2.f32 %v957_v56 }
 0x4ac   :  { %v914_v25 = vpop.xlane.xlu2 %913  ;;  %3616 = vrcp.f32 %v978_v59 }
 0x4ad   :  { %v931_v55 = vsub.f32 %v4916_v63, %v914_v25  ;;  %v1460_v0 = vpop.xlane.xlu0 %1459  ;;  %v672_v63 = vld [vmem:[#allocation7 + $0x8] sm:$0xff] }
 0x4ae   :  { %3618 = vrcp.f32 %v1460_v0  ;;  %1799 = vmatpush.msrb.mxu1 %v672_v63 }
 0x4af   :  { %v961_v13 = vmul.f32 1.442695, %v931_v55  ;;  %1590 = vmatmul.f32.gmra.mxu0 %v1500_v41  ;;  %1108 = vmatmul.f32.gmra.mxu2 %v1018_v11 }
 0x4b0   :  { %v4991_v50 = vpop.eup %3612 }
 0x4b1   :  { %v4993_v6 = vpop.eup %3614  ;;  %991 = vadd.xlane.f32.xlu1 %v4991_v50  ;;  %3620 = vpow2.f32 %v961_v13 }
 0x4b2   :  { %989 = vadd.xlane.f32.xlu2 %v4993_v6  ;;  %3622 = vpow2.f32 %v1441_v47  ;;  %v3617_v19 = vpop.eup %3616 }
 0x4b3   :  { %v1019_v9 = vmul.f32 %v3617_v19, %v4903_v28 }
 0x4b4   :  { %v3619_v32 = vpop.eup %3618  ;;  %v1464_v49 = vpop.xlane.xlu2 %1463 }
 0x4b5   :  { %v1462_v29 = vpop.xlane.xlu1 %1461  ;;  %v980_v26 = vpop.xlane.xlu0 %979  ;;  %v1501_v34 = vmul.f32 %v3619_v32, %v4918_v44 }
 0x4b6   :  { %3624 = vrcp.f32 %v1462_v29 }
 0x4b7   :  { %v4999_v7 = vpop.eup %3620  ;;  %3626 = vrcp.f32 %v980_v26  ;;  %1593 = vmatmul.f32.gmra.mxu0 %v1501_v34  ;;  %1111 = vmatmul.f32.gmra.mxu2 %v1019_v9 }
 0x4b8   :  { %v5001_v21 = vpop.eup %3622  ;;  %993 = vadd.xlane.f32.xlu0 %v4999_v7  ;;  %3628 = vrcp.f32 %v1464_v49 }
 0x4ba   :  { %1473 = vadd.xlane.f32.xlu2 %v5001_v21 }
 0x4bc   :  { %v3625_v24 = vpop.eup %3624 }
 0x4bd   :  { %v3627_v37 = vpop.eup %3626  ;;  %v1396_v52 = vpop.xlane.xlu0 %1395  ;;  %v1502_v44 = vmul.f32 %v3625_v24, %v4927_v16 }
 0x4be   :  { %v1413_v28 = vsub.f32 %v4935_v1, %v1396_v52  ;;  %v1020_v30 = vmul.f32 %v3627_v37, %v4923_v8  ;;  %v3629_v31 = vpop.eup %3628  ;;  %v671_v8 = vld [vmem:[#allocation7] sm:$0xff]  ;;  %v984_v1 = vpop.xlane.xlu2 %983 }
 0x4bf   :  { %1596 = vmatmul.f32.gmra.mxu0 %v1502_v44  ;;  %v1503_v46 = vmul.f32 %v3629_v31, %v4925_v27  ;;  %1800 = vmatpush.msrb.mxu1 %v671_v8 }
 0x4c0   :  { %v1443_v43 = vmul.f32 1.442695, %v1413_v28  ;;  %1114 = vmatmul.f32.gmra.mxu2 %v1020_v30 }
 0x4c2   :  { %3630 = vpow2.f32 %v1443_v43 }
 0x4c5   :  { %v916_v45 = vpop.xlane.xlu0 %915 }
 0x4c6   :  { %v932_v4 = vsub.f32 %v4944_v38, %v916_v45  ;;  %v1468_v39 = vpop.xlane.xlu2 %1467 }
 0x4c7   :  { %1599 = vmatmul.f32.gmra.mxu0 %v1503_v46 }
 0x4c8   :  { %v5010_v60 = vpop.eup %3630  ;;  %v963_v23 = vmul.f32 1.442695, %v932_v4 }
 0x4c9   :  { %1475 = vadd.xlane.f32.xlu1 %v5010_v60 }
 0x4ca   :  { %3632 = vpow2.f32 %v963_v23 }
 0x4d0   :  { %v5013_v16 = vpop.eup %3632 }
 0x4d1   :  { %995 = vadd.xlane.f32.xlu2 %v5013_v16 }
 0x4f4   :  { %v1466_v48 = vpop.xlane.xlu0 %1465 }
 0x4f5   :  { %3634 = vrcp.f32 %v1466_v48 }
 0x4f6   :  { %3636 = vrcp.f32 %v1468_v39 }
 0x4fa   :  { %v1094_v27 = vpop.f32.mrf.mxu2 }
 0x4fb   :  { %v3635_v53 = vpop.eup %3634  ;;  %v982_v38 = vpop.xlane.xlu1 %981  ;;  %3343 = vmatmul.msk.f32.vlgmr.msrb.gmra.mxu1 %vm723_vm4, %v1094_v27 }
 0x4fc   :  { %3638 = vrcp.f32 %v982_v38  ;;  %v1504_v20 = vmul.f32 %v3635_v53, %v4954_v2  ;;  %v3637_v59 = vpop.eup %3636  ;;  %v1576_v28 = vpop.f32.mrf.mxu0 }
 0x4fd   :  { %3640 = vrcp.f32 %v984_v1  ;;  %v1505_v58 = vmul.f32 %v3637_v59, %v4942_v17 }
 0x4fe   :  { %1602 = vmatmul.f32.gmra.mxu0 %v1504_v20 }
 0x502   :  { %v3639_v51 = vpop.eup %3638  ;;  %v1097_v35 = vpop.f32.mrf.mxu2 }
 0x503   :  { %v1398_v54 = vpop.xlane.xlu1 %1397  ;;  %3344 = vmatmul.msk.f32.gmra.mxu1 %vm723_vm4, %v1097_v35  ;;  %v1021_v61 = vmul.f32 %v3639_v51, %v4958_v14  ;;  %v3641_v2 = vpop.eup %3640 }
 0x504   :  { %v1414_v18 = vsub.f32 %v4968_v33, %v1398_v54  ;;  %v1022_v3 = vmul.f32 %v3641_v2, %v4933_v62  ;;  %v988_v33 = vpop.xlane.xlu0 %987 }
 0x505   :  { %1117 = vmatmul.f32.gmra.mxu2 %v1021_v61 }
 0x506   :  { %v1445_v42 = vmul.f32 1.442695, %v1414_v18  ;;  %1605 = vmatmul.f32.gmra.mxu0 %v1505_v58 }
 0x508   :  { %3642 = vpow2.f32 %v1445_v42 }
 0x50a   :  { %v1100_v56 = vpop.f32.mrf.mxu2 }
 0x50b   :  { %v986_v22 = vpop.xlane.xlu1 %985  ;;  %3345 = vmatmul.msk.f32.gmra.mxu1 %vm723_vm4, %v1100_v56 }
 0x50c   :  { %3644 = vrcp.f32 %v986_v22  ;;  %v1472_v0 = vpop.xlane.xlu0 %1471  ;;  %v1579_v31 = vpop.f32.mrf.mxu0 }
 0x50d   :  { %1120 = vmatmul.f32.gmra.mxu2 %v1022_v3  ;;  %3646 = vrcp.f32 %v988_v33  ;;  %v5069_v33 = vld [vmem:[%s5941_s10] ss:$0 sm:$0xff]  ;;  %s3219_s10 = sshll.u32 %s5950_s19, 4  ;;  %s3953_s19 = smov [#allocation11]   ;;  %s3220_s10 = int_to_ptr.hbm [resolvable:$true] %s3219_s10 }
 0x50e   :  { %v5024_v14 = vpop.eup %3642  ;;  %s3228_s2 = sshll.u32 %s3953_s19, 4  ;;  %s3229_s2 = int_to_ptr.vmem [resolvable:$true] %s3228_s2 }
 0x50f   :  { %1477 = vadd.xlane.f32.xlu0 %v5024_v14 }
 0x512   :  { %v3645_v17 = vpop.eup %3644 }
 0x513   :  { %v1103_v5 = vpop.f32.mrf.mxu2  ;;  %v1470_v25 = vpop.xlane.xlu1 %1469  ;;  %v1023_v55 = vmul.f32 %v3645_v17, %v4973_v10  ;;  %v3770_v17 = vld [vmem:[%s5963_s28] sm:$0xff] }
 0x514   :  { %3648 = vrcp.f32 %v1470_v25  ;;  %3346 = vmatmul.msk.f32.gmra.mxu1 %vm723_vm4, %v1103_v5  ;;  %v3647_v41 = vpop.eup %3646  ;;  %v1582_v46 = vpop.f32.mrf.mxu0 }
 0x515   :  { %1123 = vmatmul.f32.gmra.mxu2 %v1023_v55  ;;  %3650 = vrcp.f32 %v1472_v0  ;;  %v1024_v11 = vmul.f32 %v3647_v41, %v4960_v12 }
 0x51a   :  { %v3649_v62 = vpop.eup %3648 }
 0x51b   :  { %v1506_v47 = vmul.f32 %v3649_v62, %v4980_v57  ;;  %v3651_v13 = vpop.eup %3650 }
 0x51c   :  { %v1507_v36 = vmul.f32 %v3651_v13, %v4975_v40 }
 0x51d   :  { %1608 = vmatmul.f32.gmra.mxu0 %v1506_v47  ;;  %1126 = vmatmul.f32.gmra.mxu2 %v1024_v11  ;;  %v3771_v47 = vld [vmem:[%s5963_s28 + $0x8] sm:$0xff] }
 0x524   :  { %v992_v19 = vpop.xlane.xlu1 %991 }
 0x525   :  { %v990_v63 = vpop.xlane.xlu2 %989  ;;  %1611 = vmatmul.f32.gmra.mxu0 %v1507_v36 }
 0x526   :  { %3652 = vrcp.f32 %v990_v63 }
 0x527   :  { %3654 = vrcp.f32 %v992_v19 }
 0x52a   :  { %v1106_v10 = vpop.f32.mrf.mxu2 }
 0x52b   :  { %3347 = vmatmul.msk.f32.gmra.mxu1 %vm723_vm4, %v1106_v10  ;;  %v994_v12 = vpop.xlane.xlu0 %993  ;;  %v3772_v10 = vld [vmem:[%s5963_s28 + $0x10] sm:$0xff] }
 0x52c   :  { %v3653_v32 = vpop.eup %3652 }
 0x52d   :  { %v1474_v29 = vpop.xlane.xlu2 %1473  ;;  %v1025_v26 = vmul.f32 %v3653_v32, %v4993_v6  ;;  %v3655_v57 = vpop.eup %3654 }
 0x52e   :  { %3656 = vrcp.f32 %v1474_v29  ;;  %v1026_v40 = vmul.f32 %v3655_v57, %v4991_v50 }
 0x52f   :  { %1129 = vmatmul.f32.gmra.mxu2 %v1025_v26  ;;  %3658 = vrcp.f32 %v994_v12 }
 0x532   :  { %v1109_v9 = vpop.f32.mrf.mxu2 }
 0x533   :  { %3348 = vmatmul.msk.f32.gmra.mxu1 %vm723_vm4, %v1109_v9 }
 0x534   :  { %v3657_v34 = vpop.eup %3656 }
 0x535   :  { %v1508_v49 = vmul.f32 %v3657_v34, %v5001_v21  ;;  %v3659_v24 = vpop.eup %3658 }
 0x536   :  { %v1027_v52 = vmul.f32 %v3659_v24, %v4999_v7  ;;  %v1585_v7 = vpop.f32.mrf.mxu0 }
 0x537   :  { %1132 = vmatmul.f32.gmra.mxu2 %v1026_v40  ;;  %1614 = vmatmul.f32.gmra.mxu0 %v1508_v49  ;;  %v3773_v40 = vld [vmem:[%s5963_s28 + $0x18] sm:$0xff] }
 0x53a   :  { %v1112_v37 = vpop.f32.mrf.mxu2 }
 0x53b   :  { %3349 = vmatmul.msk.f32.gmra.mxu1 %vm723_vm4, %v1112_v37 }
 0x53c   :  { %v1476_v6 = vpop.xlane.xlu1 %1475 }
 0x53d   :  { %3660 = vrcp.f32 %v1476_v6 }
 0x53e   :  { %v1588_v4 = vpop.f32.mrf.mxu0 }
 0x53f   :  { %1135 = vmatmul.f32.gmra.mxu2 %v1027_v52 }
 0x543   :  { %v3661_v44 = vpop.eup %3660  ;;  %v1115_v30 = vpop.f32.mrf.mxu2 }
 0x544   :  { %3350 = vmatmul.msk.f32.gmra.mxu1 %vm723_vm4, %v1115_v30  ;;  %v996_v43 = vpop.xlane.xlu2 %995  ;;  %v1509_v50 = vmul.f32 %v3661_v44, %v5010_v60  ;;  %v3774_v44 = vld [vmem:[%s5963_s28 + $0x20] sm:$0xff] }
 0x545   :  { %3662 = vrcp.f32 %v996_v43 }
 0x546   :  { %1617 = vmatmul.f32.gmra.mxu0 %v1509_v50  ;;  %v1591_v23 = vpop.f32.mrf.mxu0 }
 0x54b   :  { %v3663_v21 = vpop.eup %3662 }
 0x54c   :  { %v1028_v45 = vmul.f32 %v3663_v21, %v5013_v16 }
 0x54e   :  { %1138 = vmatmul.f32.gmra.mxu2 %v1028_v45  ;;  %v1594_v60 = vpop.f32.mrf.mxu0  ;;  %v3775_v45 = vld [vmem:[%s5963_s28 + $0x28] sm:$0xff] }
 0x556   :  { %3327 = vmatmul.msk.f32.vlgmr.msra.gmra.mxu2 %vm723_vm4, %v1576_v28  ;;  %v1597_v16 = vpop.f32.mrf.mxu0 }
 0x55e   :  { %3328 = vmatmul.msk.f32.gmra.mxu2 %vm723_vm4, %v1579_v31  ;;  %v1600_v53 = vpop.f32.mrf.mxu0 }
 0x566   :  { %3329 = vmatmul.msk.f32.gmra.mxu2 %vm723_vm4, %v1582_v46 }
 0x56e   :  { %3330 = vmatmul.msk.f32.gmra.mxu2 %vm723_vm4, %v1585_v7 }
 0x576   :  { %3331 = vmatmul.msk.f32.gmra.mxu2 %vm723_vm4, %v1588_v4 }
 0x578   :  { %v1802_v2 = vpop.f32.mrf.mxu1 }
 0x57b   :  { %v1603_v38 = vpop.f32.mrf.mxu0 }
 0x57e   :  { %3332 = vmatmul.msk.f32.gmra.mxu2 %vm723_vm4, %v1591_v23 }
 0x580   :  { %v1805_v22 = vpop.f32.mrf.mxu1 }
 0x582   :  { %v1478_v8 = vpop.xlane.xlu0 %1477 }
 0x583   :  { %3664 = vrcp.f32 %v1478_v8  ;;  %v1606_v51 = vpop.f32.mrf.mxu0 }
 0x586   :  { %3333 = vmatmul.msk.f32.gmra.mxu2 %vm723_vm4, %v1594_v60 }
 0x588   :  { %v1118_v1 = vpop.f32.mrf.mxu2  ;;  %v1808_v41 = vpop.f32.mrf.mxu1 }
 0x589   :  { %v3665_v48 = vpop.eup %3664  ;;  %3351 = vmatmul.msk.f32.gmra.mxu1 %vm723_vm4, %v1118_v1  ;;  %v3776_v1 = vld [vmem:[%s5963_s28 + $0x30] sm:$0xff] }
 0x58a   :  { %v1510_v39 = vmul.f32 %v3665_v48, %v5024_v14 }
 0x58c   :  { %1620 = vmatmul.f32.gmra.mxu0 %v1510_v39 }
 0x58e   :  { %3334 = vmatmul.msk.f32.gmra.mxu2 %vm723_vm4, %v1597_v16 }
 0x590   :  { %v1121_v27 = vpop.f32.mrf.mxu2 }
 0x591   :  { %3352 = vmatmul.msk.f32.gmra.mxu1 %vm723_vm4, %v1121_v27  ;;  %v1811_v32 = vpop.f32.mrf.mxu1 }
 0x596   :  { %3335 = vmatmul.msk.f32.gmra.mxu2 %vm723_vm4, %v1600_v53 }
 0x598   :  { %v1124_v20 = vpop.f32.mrf.mxu2 }
 0x599   :  { %3353 = vmatmul.msk.f32.gmra.mxu1 %vm723_vm4, %v1124_v20 }
 0x59a   :  { %v1609_v35 = vpop.f32.mrf.mxu0 }
 0x59e   :  { %3336 = vmatmul.msk.f32.gmra.mxu2 %vm723_vm4, %v1603_v38 }
 0x5a0   :  { %v1127_v59 = vpop.f32.mrf.mxu2 }
 0x5a1   :  { %3354 = vmatmul.msk.f32.gmra.mxu1 %vm723_vm4, %v1127_v59 }
 0x5a2   :  { %v1612_v61 = vpop.f32.mrf.mxu0 }
 0x5a6   :  { %3337 = vmatmul.msk.f32.gmra.mxu2 %vm723_vm4, %v1606_v51 }
 0x5a8   :  { %v1814_v9 = vpop.f32.mrf.mxu1 }
 0x5ae   :  { %3338 = vmatmul.msk.f32.gmra.mxu2 %vm723_vm4, %v1609_v35 }
 0x5b0   :  { %v1817_v30 = vpop.f32.mrf.mxu1 }
 0x5b2   :  { %v1130_v54 = vpop.f32.mrf.mxu2 }
 0x5b3   :  { %3355 = vmatmul.msk.f32.gmra.mxu1 %vm723_vm4, %v1130_v54 }
 0x5b4   :  { %v1615_v58 = vpop.f32.mrf.mxu0 }
 0x5b6   :  { %3339 = vmatmul.msk.f32.gmra.mxu2 %vm723_vm4, %v1612_v61 }
 0x5b8   :  { %v1820_v4 = vpop.f32.mrf.mxu1 }
 0x5ba   :  { %v1133_v18 = vpop.f32.mrf.mxu2 }
 0x5bb   :  { %3356 = vmatmul.msk.f32.gmra.mxu1 %vm723_vm4, %v1133_v18 }
 0x5be   :  { %3340 = vmatmul.msk.f32.gmra.mxu2 %vm723_vm4, %v1615_v58  ;;  %v3777_v58 = vld [vmem:[%s5963_s28 + $0x38] sm:$0xff] }
 0x5c1   :  { %v1823_v38 = vpop.f32.mrf.mxu1 }
 0x5c2   :  { %v1136_v15 = vpop.f32.mrf.mxu2 }
 0x5c3   :  { %3357 = vmatmul.msk.f32.gmra.mxu1 %vm723_vm4, %v1136_v15  ;;  %v1618_v42 = vpop.f32.mrf.mxu0 }
 0x5c6   :  { %3341 = vmatmul.msk.f32.gmra.mxu2 %vm723_vm4, %v1618_v42 }
 0x5d1   :  { %v1139_v56 = vpop.f32.mrf.mxu2 }
 0x5d2   :  { %3358 = vmatmul.msk.f32.gmra.mxu1 %vm723_vm4, %v1139_v56 }
 0x5d9   :  { %v1689_v3 = vpop.f32.mrf.mxu2 }
 0x5da   :  { %v1803_v14 = vadd.f32 %v1802_v2, %v1689_v3 }
 0x5dc   :  { %v1850_v5 = vadd.f32 %v3770_v17, %v1803_v14 }
 0x5de   :  { %v5075_v25 = vadd.f32 %v5069_v33, %v1850_v5 }
 0x5e0   :  { %v1888_v55 = vsel %vm143_vm0, %v5075_v25, 0.0 }
 0x5e1   :  { %1889 = vadd.xlane.f32.xlu1 %v1888_v55  ;;  %v1692_v0 = vpop.f32.mrf.mxu2 }
 0x5e2   :  { %v1806_v62 = vadd.f32 %v1805_v22, %v1692_v0  ;;  %v3778_v0 = vld [vmem:[%s5963_s28 + $0x40] sm:$0xff] }
 0x5e4   :  { %v1851_v11 = vadd.f32 %v3771_v47, %v1806_v62 }
 0x5e6   :  { %v5083_v13 = vadd.f32 %v5069_v33, %v1851_v11 }
 0x5e8   :  { %v1891_v36 = vsel %vm143_vm0, %v5083_v13, 0.0 }
 0x5e9   :  { %1892 = vadd.xlane.f32.xlu2 %v1891_v36  ;;  %v1695_v63 = vpop.f32.mrf.mxu2 }
 0x5ea   :  { %v1809_v19 = vadd.f32 %v1808_v41, %v1695_v63 }
 0x5ec   :  { %v1852_v29 = vadd.f32 %v3772_v10, %v1809_v19 }
 0x5ee   :  { %v5091_v26 = vadd.f32 %v5069_v33, %v1852_v29 }
 0x5f0   :  { %v1894_v12 = vsel %vm143_vm0, %v5091_v26, 0.0 }
 0x5f1   :  { %1895 = vadd.xlane.f32.xlu0 %v1894_v12  ;;  %v1698_v57 = vpop.f32.mrf.mxu2 }
 0x5f2   :  { %v1812_v34 = vadd.f32 %v1811_v32, %v1698_v57  ;;  %v3779_v57 = vld [vmem:[%s5963_s28 + $0x48] sm:$0xff] }
 0x5f4   :  { %v1853_v49 = vadd.f32 %v3773_v40, %v1812_v34 }
 0x5f6   :  { %v5099_v24 = vadd.f32 %v5069_v33, %v1853_v49 }
 0x5f8   :  { %v1897_v37 = vsel %vm143_vm0, %v5099_v24, 0.0 }
 0x5f9   :  { %1898 = vadd.xlane.f32.xlu1 %v1897_v37  ;;  %v1701_v6 = vpop.f32.mrf.mxu2 }
 0x5fa   :  { %v1815_v52 = vadd.f32 %v1814_v9, %v1701_v6 }
 0x5fc   :  { %v1854_v28 = vadd.f32 %v3774_v44, %v1815_v52 }
 0x5fe   :  { %v5107_v43 = vadd.f32 %v5069_v33, %v1854_v28 }
 0x600   :  { %v1900_v50 = vsel %vm143_vm0, %v5107_v43, 0.0 }
 0x601   :  { %1901 = vadd.xlane.f32.xlu2 %v1900_v50  ;;  %v1704_v21 = vpop.f32.mrf.mxu2  ;;  %v3780_v50 = vld [vmem:[%s5963_s28 + $0x50] sm:$0xff] }
 0x602   :  { %v1818_v31 = vadd.f32 %v1817_v30, %v1704_v21 }
 0x604   :  { %v1855_v46 = vadd.f32 %v3775_v45, %v1818_v31 }
 0x606   :  { %v5115_v7 = vadd.f32 %v5069_v33, %v1855_v46  ;;  %v1826_v35 = vpop.f32.mrf.mxu1 }
 0x608   :  { %v1903_v23 = vsel %vm143_vm0, %v5115_v7, 0.0 }
 0x609   :  { %v1621_v60 = vpop.f32.mrf.mxu0  ;;  %1904 = vadd.xlane.f32.xlu0 %v1903_v23  ;;  %v1707_v8 = vpop.f32.mrf.mxu2 }
 0x60a   :  { %v1821_v16 = vadd.f32 %v1820_v4, %v1707_v8  ;;  %3342 = vmatmul.msk.f32.gmra.mxu2 %vm723_vm4, %v1621_v60 }
 0x60c   :  { %v1856_v48 = vadd.f32 %v3776_v1, %v1821_v16 }
 0x60e   :  { %v5124_v39 = vadd.f32 %v5069_v33, %v1856_v48  ;;  %v1829_v5 = vpop.f32.mrf.mxu1 }
 0x610   :  { %v1906_v27 = vsel %vm143_vm0, %v5124_v39, 0.0 }
 0x611   :  { %1907 = vadd.xlane.f32.xlu2 %v1906_v27  ;;  %v1710_v53 = vpop.f32.mrf.mxu2  ;;  %v3781_v27 = vld [vmem:[%s5963_s28 + $0x58] sm:$0xff] }
 0x612   :  { %v1824_v54 = vadd.f32 %v1823_v38, %v1710_v53 }
 0x614   :  { %v1857_v15 = vadd.f32 %v3777_v58, %v1824_v54 }
 0x616   :  { %v5138_v3 = vadd.f32 %v5069_v33, %v1857_v15  ;;  %v1832_v12 = vpop.f32.mrf.mxu1 }
 0x618   :  { %v1909_v47 = vsel %vm143_vm0, %v5138_v3, 0.0 }
 0x619   :  { %v1713_v20 = vpop.f32.mrf.mxu2 }
 0x61a   :  { %v1827_v14 = vadd.f32 %v1826_v35, %v1713_v20 }
 0x61c   :  { %v1858_v41 = vadd.f32 %v3778_v0, %v1827_v14 }
 0x61e   :  { %v5152_v19 = vadd.f32 %v5069_v33, %v1858_v41  ;;  %v1835_v46 = vpop.f32.mrf.mxu1 }
 0x620   :  { %v1912_v40 = vsel %vm143_vm0, %v5152_v19, 0.0 }
 0x621   :  { %v1716_v2 = vpop.f32.mrf.mxu2 }
 0x622   :  { %v1830_v32 = vadd.f32 %v1829_v5, %v1716_v2 }
 0x624   :  { %v1859_v34 = vadd.f32 %v3779_v57, %v1830_v32 }
 0x626   :  { %v5166_v6 = vadd.f32 %v5069_v33, %v1859_v34  ;;  %v2281_v34 = vld [vmem:[#allocation8 + $0x18] sm:$0xff] }
 0x627   :  { %2346 = vmatpush.msra.mxu3 %v2281_v34  ;;  %v3785_v34 = vld [vmem:[%s5963_s28 + $0x78] sm:$0xff] }
 0x628   :  { %v1915_v45 = vsel %vm143_vm0, %v5166_v6, 0.0 }
 0x629   :  { %v1719_v63 = vpop.f32.mrf.mxu2 }
 0x62a   :  { %v1833_v52 = vadd.f32 %v1832_v12, %v1719_v63 }
 0x62c   :  { %v1860_v21 = vadd.f32 %v3780_v50, %v1833_v52 }
 0x62e   :  { %v5180_v60 = vadd.f32 %v5069_v33, %v1860_v21 }
 0x630   :  { %v1918_v20 = vsel %vm143_vm0, %v5180_v60, 0.0 }
 0x631   :  { %v1722_v28 = vpop.f32.mrf.mxu2 }
 0x632   :  { %v1836_v8 = vadd.f32 %v1835_v46, %v1722_v28 }
 0x634   :  { %v1861_v53 = vadd.f32 %v3781_v27, %v1836_v8 }
 0x636   :  { %v5194_v54 = vadd.f32 %v5069_v33, %v1861_v53 }
 0x639   :  { %v1725_v48 = vpop.f32.mrf.mxu2 }
 0x641   :  { %v1728_v14 = vpop.f32.mrf.mxu2 }
 0x654   :  { %v1890_v59 = vpop.xlane.xlu1 %1889 }
 0x655   :  { %v1936_v51 = vmul.f32 0.03125, %v1890_v59  ;;  %v1838_v59 = vpop.f32.mrf.mxu1 }
 0x657   :  { %v5129_v61 = vsub.f32 %v5075_v25, %v1936_v51 }
 0x659   :  { %v1968_v18 = vmul.f32 %v5129_v61, %v5129_v61 }
 0x65b   :  { %v1984_v42 = vsel %vm143_vm0, %v1968_v18, 0.0  ;;  %v1839_v18 = vadd.f32 %v1838_v59, %v1725_v48 }
 0x65c   :  { %v1893_v56 = vpop.xlane.xlu2 %1892  ;;  %1985 = vadd.xlane.f32.xlu1 %v1984_v42  ;;  %v3782_v42 = vld [vmem:[%s5963_s28 + $0x60] sm:$0xff] }
 0x65d   :  { %v1937_v22 = vmul.f32 0.03125, %v1893_v56  ;;  %v1862_v2 = vadd.f32 %v3782_v42, %v1839_v18  ;;  %v1841_v0 = vpop.f32.mrf.mxu1 }
 0x65f   :  { %v5141_v17 = vsub.f32 %v5083_v13, %v1937_v22  ;;  %v1921_v22 = vsel %vm143_vm0, %v5194_v54, 0.0  ;;  %v5208_v41 = vadd.f32 %v5069_v33, %v1862_v2 }
 0x661   :  { %v1969_v55 = vmul.f32 %v5141_v17, %v5141_v17 }
 0x663   :  { %v1987_v62 = vsel %vm143_vm0, %v1969_v55, 0.0 }
 0x664   :  { %v1896_v11 = vpop.xlane.xlu0 %1895  ;;  %1988 = vadd.xlane.f32.xlu0 %v1987_v62  ;;  %1910 = vadd.xlane.f32.xlu1 %v1909_v47  ;;  %v1842_v62 = vadd.f32 %v1841_v0, %v1728_v14 }
 0x665   :  { %v1938_v36 = vmul.f32 0.03125, %v1896_v11  ;;  %v1844_v46 = vpop.f32.mrf.mxu1 }
 0x667   :  { %v5155_v10 = vsub.f32 %v5091_v26, %v1938_v36  ;;  %v3783_v36 = vld [vmem:[%s5963_s28 + $0x68] sm:$0xff] }
 0x668   :  { %v1863_v63 = vadd.f32 %v3783_v36, %v1842_v62 }
 0x669   :  { %v1970_v29 = vmul.f32 %v5155_v10, %v5155_v10 }
 0x66a   :  { %v5222_v12 = vadd.f32 %v5069_v33, %v1863_v63  ;;  %v5244_v63 = vld [vmem:[%s5942_s11] ss:$0 sm:$0xff] }
 0x66b   :  { %v1990_v9 = vsel %vm143_vm0, %v1970_v29, 0.0  ;;  %v1924_v29 = vsel %vm143_vm0, %v5208_v41, 0.0 }
 0x66c   :  { %v1899_v49 = vpop.xlane.xlu1 %1898  ;;  %1991 = vadd.xlane.f32.xlu2 %v1990_v9  ;;  %1913 = vadd.xlane.f32.xlu0 %v1912_v40  ;;  %v1927_v57 = vsel %vm143_vm0, %v5222_v12, 0.0  ;;  %v2280_v9 = vld [vmem:[#allocation8 + $0x10] sm:$0xff]  ;;  %v2279_v40 = vld [vmem:[#allocation8 + $0x8] sm:$0xff] }
 0x66d   :  { %v1939_v37 = vmul.f32 0.03125, %v1899_v49  ;;  %2347 = vmatpush.msra.mxu3 %v2280_v9  ;;  %v2278_v49 = vld [vmem:[#allocation8] sm:$0xff] }
 0x66f   :  { %v5169_v44 = vsub.f32 %v5099_v24, %v1939_v37  ;;  %2348 = vmatpush.msra.mxu3 %v2279_v40  ;;  %v5254_v40 = vld [vmem:[%s5943_s12] ss:$0 sm:$0xff] }
 0x671   :  { %v1971_v30 = vmul.f32 %v5169_v44, %v5169_v44  ;;  %2349 = vmatpush.msra.mxu3 %v2278_v49 }
 0x673   :  { %v1993_v31 = vsel %vm143_vm0, %v1971_v30, 0.0  ;;  %v1731_v30 = vpop.f32.mrf.mxu2 }
 0x674   :  { %v1902_v4 = vpop.xlane.xlu2 %1901  ;;  %1994 = vadd.xlane.f32.xlu1 %v1993_v31  ;;  %1916 = vadd.xlane.f32.xlu2 %v1915_v45 }
 0x675   :  { %v1940_v23 = vmul.f32 0.03125, %v1902_v4 }
 0x677   :  { %v5183_v16 = vsub.f32 %v5107_v43, %v1940_v23  ;;  %v1845_v23 = vadd.f32 %v1844_v46, %v1731_v30 }
 0x679   :  { %v1972_v1 = vmul.f32 %v5183_v16, %v5183_v16 }
 0x67b   :  { %v1996_v38 = vsel %vm143_vm0, %v1972_v1, 0.0 }
 0x67c   :  { %v1905_v51 = vpop.xlane.xlu0 %1904  ;;  %1997 = vadd.xlane.f32.xlu0 %v1996_v38  ;;  %1919 = vadd.xlane.f32.xlu1 %v1918_v20  ;;  %v3784_v38 = vld [vmem:[%s5963_s28 + $0x70] sm:$0xff] }
 0x67d   :  { %v1941_v35 = vmul.f32 0.03125, %v1905_v51  ;;  %v1864_v20 = vadd.f32 %v3784_v38, %v1845_v23 }
 0x67f   :  { %v5197_v58 = vsub.f32 %v5115_v7, %v1941_v35 }
 0x681   :  { %v1973_v15 = vmul.f32 %v5197_v58, %v5197_v58 }
 0x683   :  { %v1999_v56 = vsel %vm143_vm0, %v1973_v15, 0.0 }
 0x684   :  { %v1908_v5 = vpop.xlane.xlu2 %1907  ;;  %2000 = vadd.xlane.f32.xlu2 %v1999_v56  ;;  %1922 = vadd.xlane.f32.xlu0 %v1921_v22  ;;  %v1847_v56 = vpop.f32.mrf.mxu1 }
 0x685   :  { %v1942_v55 = vmul.f32 0.03125, %v1908_v5  ;;  %v5236_v5 = vadd.f32 %v5069_v33, %v1864_v20 }
 0x687   :  { %v5211_v47 = vsub.f32 %v5124_v39, %v1942_v55 }
 0x689   :  { %v1974_v11 = vmul.f32 %v5211_v47, %v5211_v47 }
 0x68b   :  { %v2002_v32 = vsel %vm143_vm0, %v1974_v11, 0.0 }
 0x68c   :  { %2003 = vadd.xlane.f32.xlu1 %v2002_v32  ;;  %1925 = vadd.xlane.f32.xlu2 %v1924_v29 }
 0x68d   :  { %v1734_v59 = vpop.f32.mrf.mxu2 }
 0x68e   :  { %v1848_v55 = vadd.f32 %v1847_v56, %v1734_v59 }
 0x690   :  { %v1865_v9 = vadd.f32 %v3785_v34, %v1848_v55 }
 0x692   :  { %v5262_v23 = vadd.f32 %v5069_v33, %v1865_v9 }
 0x694   :  { %1928 = vadd.xlane.f32.xlu1 %v1927_v57 }
 0x6cf   :  { %v1986_v37 = vpop.xlane.xlu1 %1985 }
 0x6d0   :  { %v2032_v52 = vmul.f32 0.03125, %v1986_v37 }
 0x6d2   :  { %v2048_v28 = vadd.f32 1e-05, %v2032_v52  ;;  %v1930_v52 = vsel %vm143_vm0, %v5236_v5, 0.0 }
 0x6d4   :  { %3666 = vrsqrt.f32 %v2048_v28  ;;  %vm2070_vm6 = vweird.f32 %v2048_v28 }
 0x6d7   :  { %v1989_v50 = vpop.xlane.xlu0 %1988  ;;  %v1911_v21 = vpop.xlane.xlu1 %1910 }
 0x6d8   :  { %v2033_v31 = vmul.f32 0.03125, %v1989_v50  ;;  %v1943_v45 = vmul.f32 0.03125, %v1911_v21 }
 0x6da   :  { %v3667_v4 = vpop.eup %3666  ;;  %v2049_v8 = vadd.f32 1e-05, %v2033_v31  ;;  %v5227_v1 = vsub.f32 %v5138_v3, %v1943_v45 }
 0x6db   :  { %v2065_v48 = vmul.f32 %v3667_v4, %v2048_v28  ;;  %vm2071_vm5 = vweird.f32 %v3667_v4 }
 0x6dc   :  { %3668 = vrsqrt.f32 %v2049_v8  ;;  %v1975_v27 = vmul.f32 %v5227_v1, %v5227_v1  ;;  %vm2072_vm7 = vmor %vm2070_vm6, %vm2071_vm5  ;;  %vm2080_vm9 = vweird.f32 %v2049_v8 }
 0x6dd   :  { %v2066_v53 = vmul.f32 %v3667_v4, %v2065_v48 }
 0x6de   :  { %v2005_v51 = vsel %vm143_vm0, %v1975_v27, 0.0 }
 0x6df   :  { %v2067_v35 = vmul.f32 0.5, %v2066_v53  ;;  %v1992_v18 = vpop.xlane.xlu2 %1991  ;;  %v1914_v15 = vpop.xlane.xlu0 %1913  ;;  %2006 = vadd.xlane.f32.xlu0 %v2005_v51 }
 0x6e0   :  { %v2034_v42 = vmul.f32 0.03125, %v1992_v18  ;;  %v1944_v2 = vmul.f32 0.03125, %v1914_v15  ;;  %v1933_v18 = vsel %vm143_vm0, %v5262_v23, 0.0 }
 0x6e1   :  { %v2068_v22 = vsub.f32 1.5, %v2067_v35 }
 0x6e2   :  { %v3669_v14 = vpop.eup %3668  ;;  %v2050_v0 = vadd.f32 1e-05, %v2034_v42  ;;  %v5239_v62 = vsub.f32 %v5152_v19, %v1944_v2 }
 0x6e3   :  { %v2069_v11 = vmul.f32 %v3667_v4, %v2068_v22  ;;  %v2075_v36 = vmul.f32 %v3669_v14, %v2049_v8  ;;  %vm2081_vm8 = vweird.f32 %v3669_v14 }
 0x6e4   :  { %3670 = vrsqrt.f32 %v2050_v0  ;;  %v1976_v32 = vmul.f32 %v5239_v62, %v5239_v62  ;;  %vm2082_vm10 = vmor %vm2080_vm9, %vm2081_vm8  ;;  %vm2090_vm12 = vweird.f32 %v2050_v0 }
 0x6e5   :  { %v2073_v29 = vsel %vm2072_vm7, %v3667_v4, %v2069_v11  ;;  %v2076_v57 = vmul.f32 %v3669_v14, %v2075_v36 }
 0x6e6   :  { %v2224_v49 = vmul.f32 %v2073_v29, %v5129_v61  ;;  %v2008_v37 = vsel %vm143_vm0, %v1976_v32, 0.0 }
 0x6e7   :  { %v2077_v28 = vmul.f32 0.5, %v2076_v57  ;;  %v1995_v30 = vpop.xlane.xlu1 %1994  ;;  %v1917_v50 = vpop.xlane.xlu2 %1916  ;;  %2009 = vadd.xlane.f32.xlu2 %v2008_v37  ;;  %1931 = vadd.xlane.f32.xlu0 %v1930_v52 }
 0x6e8   :  { %v2243_v21 = vmul.f32 %v5244_v63, %v2224_v49  ;;  %v2035_v31 = vmul.f32 0.03125, %v1995_v30  ;;  %v1945_v45 = vmul.f32 0.03125, %v1917_v50 }
 0x6e9   :  { %v2078_v46 = vsub.f32 1.5, %v2077_v28 }
 0x6ea   :  { %v3671_v4 = vpop.eup %3670  ;;  %v2262_v61 = vadd.f32 %v5254_v40, %v2243_v21  ;;  %v2051_v48 = vadd.f32 1e-05, %v2035_v31  ;;  %v5266_v27 = vsub.f32 %v5166_v6, %v1945_v45 }
 0x6eb   :  { %v2079_v53 = vmul.f32 %v3669_v14, %v2078_v46  ;;  %v2085_v38 = vmul.f32 %v3671_v4, %v2050_v0  ;;  %vm2091_vm11 = vweird.f32 %v3671_v4 }
 0x6ec   :  { %3672 = vrsqrt.f32 %v2051_v48  ;;  %3359 = vmatmul.msk.f32.vlgmr.msra.gmra.mxu3 %vm143_vm0, %v2262_v61  ;;  %v1977_v20 = vmul.f32 %v5266_v27, %v5266_v27  ;;  %vm2092_vm13 = vmor %vm2090_vm12, %vm2091_vm11  ;;  %vm2100_vm15 = vweird.f32 %v2051_v48 }
 0x6ed   :  { %v2083_v59 = vsel %vm2082_vm10, %v3669_v14, %v2079_v53  ;;  %v2086_v51 = vmul.f32 %v3671_v4, %v2085_v38 }
 0x6ee   :  { %v2225_v33 = vmul.f32 %v2083_v59, %v5141_v17  ;;  %v2011_v35 = vsel %vm143_vm0, %v1977_v20, 0.0 }
 0x6ef   :  { %v2087_v15 = vmul.f32 0.5, %v2086_v51  ;;  %v1998_v42 = vpop.xlane.xlu0 %1997  ;;  %v1920_v8 = vpop.xlane.xlu1 %1919  ;;  %2012 = vadd.xlane.f32.xlu1 %v2011_v35  ;;  %1934 = vadd.xlane.f32.xlu2 %v1933_v18 }
 0x6f0   :  { %v2036_v2 = vmul.f32 0.03125, %v1998_v42  ;;  %v1946_v56 = vmul.f32 0.03125, %v1920_v8  ;;  %v2244_v22 = vmul.f32 %v5244_v63, %v2225_v33 }
 0x6f1   :  { %v2088_v55 = vsub.f32 1.5, %v2087_v15 }
 0x6f2   :  { %v3673_v14 = vpop.eup %3672  ;;  %v2052_v11 = vadd.f32 1e-05, %v2036_v2  ;;  %v5277_v17 = vsub.f32 %v5180_v60, %v1946_v56  ;;  %v2263_v36 = vadd.f32 %v5254_v40, %v2244_v22 }
 0x6f3   :  { %v2089_v32 = vmul.f32 %v3671_v4, %v2088_v55  ;;  %v2095_v29 = vmul.f32 %v3673_v14, %v2051_v48  ;;  %vm2101_vm14 = vweird.f32 %v3673_v14 }
 0x6f4   :  { %3674 = vrsqrt.f32 %v2052_v11  ;;  %3360 = vmatmul.msk.f32.gmra.mxu3 %vm143_vm0, %v2263_v36  ;;  %v1978_v57 = vmul.f32 %v5277_v17, %v5277_v17  ;;  %vm2102_vm1 = vmor %vm2100_vm15, %vm2101_vm14  ;;  %vm2110_vm3 = vweird.f32 %v2052_v11 }
 0x6f5   :  { %v2093_v34 = vsel %vm2092_vm13, %v3671_v4, %v2089_v32  ;;  %v2096_v9 = vmul.f32 %v3673_v14, %v2095_v29 }
 0x6f6   :  { %v2226_v49 = vmul.f32 %v2093_v34, %v5155_v10  ;;  %v2014_v37 = vsel %vm143_vm0, %v1978_v57, 0.0 }
 0x6f7   :  { %v2097_v52 = vmul.f32 0.5, %v2096_v9  ;;  %v2001_v28 = vpop.xlane.xlu2 %2000  ;;  %v1923_v30 = vpop.xlane.xlu0 %1922  ;;  %2015 = vadd.xlane.f32.xlu0 %v2014_v37 }
 0x6f8   :  { %v2037_v50 = vmul.f32 0.03125, %v2001_v28  ;;  %v1947_v0 = vmul.f32 0.03125, %v1923_v30  ;;  %v2245_v21 = vmul.f32 %v5244_v63, %v2226_v49 }
 0x6f9   :  { %v2098_v31 = vsub.f32 1.5, %v2097_v52 }
 0x6fa   :  { %v3675_v45 = vpop.eup %3674  ;;  %v2053_v46 = vadd.f32 1e-05, %v2037_v50  ;;  %v5287_v61 = vsub.f32 %v5194_v54, %v1947_v0  ;;  %v2264_v4 = vadd.f32 %v5254_v40, %v2245_v21 }
 0x6fb   :  { %v2099_v10 = vmul.f32 %v3673_v14, %v2098_v31  ;;  %v2105_v53 = vmul.f32 %v3675_v45, %v2052_v11  ;;  %vm2111_vm2 = vweird.f32 %v3675_v45 }
 0x6fc   :  { %3676 = vrsqrt.f32 %v2053_v46  ;;  %3361 = vmatmul.msk.f32.gmra.mxu3 %vm143_vm0, %v2264_v4  ;;  %v1979_v38 = vmul.f32 %v5287_v61, %v5287_v61  ;;  %vm2112_vm4 = vmor %vm2110_vm3, %vm2111_vm2  ;;  %vm2120_vm6 = vweird.f32 %v2053_v46 }
 0x6fd   :  { %v2103_v20 = vsel %vm2102_vm1, %v3673_v14, %v2099_v10  ;;  %v2106_v59 = vmul.f32 %v3675_v45, %v2105_v53 }
 0x6fe   :  { %v2227_v51 = vmul.f32 %v2103_v20, %v5169_v44  ;;  %v2017_v33 = vsel %vm143_vm0, %v1979_v38, 0.0 }
 0x6ff   :  { %v2107_v35 = vmul.f32 0.5, %v2106_v59  ;;  %v2004_v18 = vpop.xlane.xlu1 %2003  ;;  %v1926_v15 = vpop.xlane.xlu2 %1925  ;;  %2018 = vadd.xlane.f32.xlu1 %v2017_v33 }
 0x700   :  { %v2038_v42 = vmul.f32 0.03125, %v2004_v18  ;;  %v1948_v48 = vmul.f32 0.03125, %v1926_v15  ;;  %v2246_v8 = vmul.f32 %v5244_v63, %v2227_v51  ;;  %v2558_v15 = vld [vmem:[%s5946_s15 + $0x78] sm:$0xff] }
 0x701   :  { %v2108_v2 = vsub.f32 1.5, %v2107_v35  ;;  %2559 = vmatpush.msra.mxu0 %v2558_v15  ;;  %v2544_v15 = vld [vmem:[%s5946_s15 + $0x8] sm:$0xff] }
 0x702   :  { %v3677_v56 = vpop.eup %3676  ;;  %v2054_v22 = vadd.f32 1e-05, %v2038_v42  ;;  %v5297_v55 = vsub.f32 %v5208_v41, %v1948_v48  ;;  %v2265_v14 = vadd.f32 %v5254_v40, %v2246_v8  ;;  %v2557_v42 = vld [vmem:[%s5946_s15 + $0x70] sm:$0xff]  ;;  %v2555_v48 = vld [vmem:[%s5946_s15 + $0x60] sm:$0xff] }
 0x703   :  { %v2109_v44 = vmul.f32 %v3675_v45, %v2108_v2  ;;  %v2115_v36 = vmul.f32 %v3677_v56, %v2053_v46  ;;  %vm2121_vm5 = vweird.f32 %v3677_v56  ;;  %2560 = vmatpush.msra.mxu0 %v2557_v42  ;;  %v2554_v2 = vld [vmem:[%s5946_s15 + $0x58] sm:$0xff] }
 0x704   :  { %3678 = vrsqrt.f32 %v2054_v22  ;;  %3362 = vmatmul.msk.f32.gmra.mxu3 %vm143_vm0, %v2265_v14  ;;  %v1980_v32 = vmul.f32 %v5297_v55, %v5297_v55  ;;  %vm2122_vm7 = vmor %vm2120_vm6, %vm2121_vm5  ;;  %vm2130_vm9 = vweird.f32 %v2054_v22 }
 0x705   :  { %v2113_v29 = vsel %vm2112_vm4, %v3675_v45, %v2109_v44  ;;  %v2116_v57 = vmul.f32 %v3677_v56, %v2115_v36  ;;  %v2552_v44 = vld [vmem:[%s5946_s15 + $0x48] sm:$0xff]  ;;  %v2551_v36 = vld [vmem:[%s5946_s15 + $0x40] sm:$0xff] }
 0x706   :  { %v2228_v34 = vmul.f32 %v2113_v29, %v5183_v16  ;;  %v2020_v9 = vsel %vm143_vm0, %v1980_v32, 0.0 }
 0x707   :  { %v2117_v49 = vmul.f32 0.5, %v2116_v57  ;;  %v1929_v37 = vpop.xlane.xlu1 %1928  ;;  %2021 = vadd.xlane.f32.xlu2 %v2020_v9  ;;  %v2550_v57 = vld [vmem:[%s5946_s15 + $0x38] sm:$0xff] }
 0x708   :  { %v1949_v52 = vmul.f32 0.03125, %v1929_v37  ;;  %v2247_v11 = vmul.f32 %v5244_v63, %v2228_v34 }
 0x709   :  { %v2118_v28 = vsub.f32 1.5, %v2117_v49  ;;  %v2549_v49 = vld [vmem:[%s5946_s15 + $0x30] sm:$0xff] }
 0x70a   :  { %v3679_v30 = vpop.eup %3678  ;;  %v5307_v50 = vsub.f32 %v5222_v12, %v1949_v52  ;;  %v2266_v0 = vadd.f32 %v5254_v40, %v2247_v11 }
 0x70b   :  { %v2119_v21 = vmul.f32 %v3677_v56, %v2118_v28  ;;  %v2125_v31 = vmul.f32 %v3679_v30, %v2054_v22  ;;  %vm2131_vm8 = vweird.f32 %v3679_v30  ;;  %v2553_v22 = vld [vmem:[%s5946_s15 + $0x50] sm:$0xff] }
 0x70c   :  { %3363 = vmatmul.msk.f32.gmra.mxu3 %vm143_vm0, %v2266_v0  ;;  %v1981_v16 = vmul.f32 %v5307_v50, %v5307_v50  ;;  %vm2132_vm10 = vmor %vm2130_vm9, %vm2131_vm8 }
 0x70d   :  { %v2123_v45 = vsel %vm2122_vm7, %v3677_v56, %v2119_v21  ;;  %v2126_v4 = vmul.f32 %v3679_v30, %v2125_v31  ;;  %v2547_v31 = vld [vmem:[%s5946_s15 + $0x20] sm:$0xff] }
 0x70e   :  { %v2229_v10 = vmul.f32 %v2123_v45, %v5197_v58  ;;  %v2023_v53 = vsel %vm143_vm0, %v1981_v16, 0.0 }
 0x70f   :  { %v2127_v38 = vmul.f32 0.5, %v2126_v4  ;;  %2024 = vadd.xlane.f32.xlu0 %v2023_v53  ;;  %v2546_v53 = vld [vmem:[%s5946_s15 + $0x18] sm:$0xff] }
 0x710   :  { %v2248_v20 = vmul.f32 %v5244_v63, %v2229_v10 }
 0x711   :  { %v2128_v59 = vsub.f32 1.5, %v2127_v38 }
 0x712   :  { %v2267_v46 = vadd.f32 %v5254_v40, %v2248_v20 }
 0x713   :  { %v2129_v51 = vmul.f32 %v3679_v30, %v2128_v59 }
 0x714   :  { %3364 = vmatmul.msk.f32.gmra.mxu3 %vm143_vm0, %v2267_v46  ;;  %v2545_v46 = vld [vmem:[%s5946_s15 + $0x10] sm:$0xff] }
 0x715   :  { %v2133_v33 = vsel %vm2132_vm10, %v3679_v30, %v2129_v51  ;;  %v2548_v30 = vld [vmem:[%s5946_s15 + $0x28] sm:$0xff] }
 0x716   :  { %v2230_v35 = vmul.f32 %v2133_v33, %v5211_v47  ;;  %v2556_v47 = vld [vmem:[%s5946_s15 + $0x68] sm:$0xff] }
 0x717   :  { %2561 = vmatpush.msra.mxu0 %v2556_v47 }
 0x718   :  { %v2249_v58 = vmul.f32 %v5244_v63, %v2230_v35 }
 0x719   :  { %2562 = vmatpush.msra.mxu0 %v2555_v48 }
 0x71a   :  { %v2268_v18 = vadd.f32 %v5254_v40, %v2249_v58 }
 0x71b   :  { %2563 = vmatpush.msra.mxu0 %v2554_v2 }
 0x71c   :  { %3365 = vmatmul.msk.f32.gmra.mxu3 %vm143_vm0, %v2268_v18 }
 0x71d   :  { %2564 = vmatpush.msra.mxu0 %v2553_v22 }
 0x71f   :  { %2565 = vmatpush.msra.mxu0 %v2552_v44 }
 0x721   :  { %2566 = vmatpush.msra.mxu0 %v2551_v36 }
 0x723   :  { %2567 = vmatpush.msra.mxu0 %v2550_v57 }
 0x725   :  { %2568 = vmatpush.msra.mxu0 %v2549_v49 }
 0x727   :  { %2569 = vmatpush.msra.mxu0 %v2548_v30 }
 0x729   :  { %2570 = vmatpush.msra.mxu0 %v2547_v31 }
 0x72b   :  { %2571 = vmatpush.msra.mxu0 %v2546_v53 }
 0x72d   :  { %2572 = vmatpush.msra.mxu0 %v2545_v46 }
 0x72f   :  { %2573 = vmatpush.msra.mxu0 %v2544_v15 }
 0x752   :  { %v2007_v8 = vpop.xlane.xlu0 %2006 }
 0x753   :  { %v2039_v56 = vmul.f32 0.03125, %v2007_v8  ;;  %v2543_v8 = vld [vmem:[%s5946_s15] sm:$0xff] }
 0x754   :  { %2574 = vmatpush.msra.mxu0 %v2543_v8 }
 0x755   :  { %v2055_v14 = vadd.f32 1e-05, %v2039_v56 }
 0x757   :  { %3680 = vrsqrt.f32 %v2055_v14  ;;  %vm2140_vm12 = vweird.f32 %v2055_v14 }
 0x75a   :  { %v2010_v32 = vpop.xlane.xlu2 %2009  ;;  %v1932_v29 = vpop.xlane.xlu0 %1931 }
 0x75b   :  { %v2040_v34 = vmul.f32 0.03125, %v2010_v32  ;;  %v1950_v9 = vmul.f32 0.03125, %v1932_v29  ;;  %v5387_v29 = vld [vmem:[%s5945_s14] ss:$0 sm:$0xff] }
 0x75d   :  { %v3681_v37 = vpop.eup %3680  ;;  %v2056_v52 = vadd.f32 1e-05, %v2040_v34  ;;  %v5353_v11 = vsub.f32 %v5236_v5, %v1950_v9 }
 0x75e   :  { %v2135_v28 = vmul.f32 %v3681_v37, %v2055_v14  ;;  %vm2141_vm11 = vweird.f32 %v3681_v37 }
 0x75f   :  { %3682 = vrsqrt.f32 %v2056_v52  ;;  %v1982_v0 = vmul.f32 %v5353_v11, %v5353_v11  ;;  %vm2142_vm13 = vmor %vm2140_vm12, %vm2141_vm11  ;;  %vm2150_vm15 = vweird.f32 %v2056_v52 }
 0x760   :  { %v2136_v21 = vmul.f32 %v3681_v37, %v2135_v28 }
 0x761   :  { %v2026_v16 = vsel %vm143_vm0, %v1982_v0, 0.0 }
 0x762   :  { %v2137_v45 = vmul.f32 0.5, %v2136_v21  ;;  %v2013_v4 = vpop.xlane.xlu1 %2012  ;;  %2027 = vadd.xlane.f32.xlu1 %v2026_v16  ;;  %v1935_v10 = vpop.xlane.xlu2 %1934 }
 0x763   :  { %v2041_v38 = vmul.f32 0.03125, %v2013_v4  ;;  %v1951_v20 = vmul.f32 0.03125, %v1935_v10 }
 0x764   :  { %v2138_v59 = vsub.f32 1.5, %v2137_v45 }
 0x765   :  { %v3683_v51 = vpop.eup %3682  ;;  %v2057_v33 = vadd.f32 1e-05, %v2041_v38  ;;  %v5371_v35 = vsub.f32 %v5262_v23, %v1951_v20 }
 0x766   :  { %v2139_v58 = vmul.f32 %v3681_v37, %v2138_v59  ;;  %v2145_v18 = vmul.f32 %v3683_v51, %v2056_v52  ;;  %vm2151_vm14 = vweird.f32 %v3683_v51 }
 0x767   :  { %3684 = vrsqrt.f32 %v2057_v33  ;;  %v1983_v42 = vmul.f32 %v5371_v35, %v5371_v35  ;;  %vm2152_vm1 = vmor %vm2150_vm15, %vm2151_vm14  ;;  %vm2160_vm3 = vweird.f32 %v2057_v33 }
 0x768   :  { %v2143_v47 = vsel %vm2142_vm13, %v3681_v37, %v2139_v58  ;;  %v2146_v48 = vmul.f32 %v3683_v51, %v2145_v18 }
 0x769   :  { %v2231_v2 = vmul.f32 %v2143_v47, %v5227_v1  ;;  %v2029_v56 = vsel %vm143_vm0, %v1983_v42, 0.0 }
 0x76a   :  { %v2147_v22 = vmul.f32 0.5, %v2146_v48  ;;  %v2016_v14 = vpop.xlane.xlu0 %2015  ;;  %2030 = vadd.xlane.f32.xlu2 %v2029_v56 }
 0x76b   :  { %v2042_v44 = vmul.f32 0.03125, %v2016_v14  ;;  %v2250_v36 = vmul.f32 %v5244_v63, %v2231_v2 }
 0x76c   :  { %v2148_v32 = vsub.f32 1.5, %v2147_v22 }
 0x76d   :  { %v3685_v57 = vpop.eup %3684  ;;  %v2058_v34 = vadd.f32 1e-05, %v2042_v44  ;;  %v2269_v1 = vadd.f32 %v5254_v40, %v2250_v36 }
 0x76e   :  { %v2149_v9 = vmul.f32 %v3683_v51, %v2148_v32  ;;  %v2155_v49 = vmul.f32 %v3685_v57, %v2057_v33  ;;  %vm2161_vm2 = vweird.f32 %v3685_v57 }
 0x76f   :  { %3686 = vrsqrt.f32 %v2058_v34  ;;  %v2351_v37 = vpop.f32.mrf.mxu3  ;;  %3366 = vmatmul.msk.f32.gmra.mxu3 %vm143_vm0, %v2269_v1  ;;  %vm2162_vm4 = vmor %vm2160_vm3, %vm2161_vm2  ;;  %vm2170_vm6 = vweird.f32 %v2058_v34 }
 0x770   :  { %v2153_v28 = vsel %vm2152_vm1, %v3683_v51, %v2149_v9  ;;  %v2156_v30 = vmul.f32 %v3685_v57, %v2155_v49  ;;  %v5392_v0 = vadd.f32 %v5387_v29, %v2351_v37 }
 0x771   :  { %v2232_v21 = vmul.f32 %v2153_v28, %v5239_v62 }
 0x772   :  { %v2157_v31 = vmul.f32 0.5, %v2156_v30  ;;  %v2399_v16 = vmul.f32 %v5392_v0, %v5392_v0  ;;  %v2019_v45 = vpop.xlane.xlu1 %2018 }
 0x773   :  { %v2043_v4 = vmul.f32 0.03125, %v2019_v45  ;;  %v2251_v52 = vmul.f32 %v5244_v63, %v2232_v21 }
 0x774   :  { %v2158_v10 = vsub.f32 1.5, %v2157_v31  ;;  %v2415_v53 = vmul.f32 %v2399_v16, %v5392_v0 }
 0x775   :  { %v3687_v38 = vpop.eup %3686  ;;  %v2059_v20 = vadd.f32 1e-05, %v2043_v4  ;;  %v2270_v59 = vadd.f32 %v5254_v40, %v2251_v52 }
 0x776   :  { %v2159_v46 = vmul.f32 %v3685_v57, %v2158_v10  ;;  %v2165_v51 = vmul.f32 %v3687_v38, %v2058_v34  ;;  %v2431_v62 = vmul.f32 0.044715, %v2415_v53  ;;  %vm2171_vm5 = vweird.f32 %v3687_v38 }
 0x777   :  { %3688 = vrsqrt.f32 %v2059_v20  ;;  %v2354_v58 = vpop.f32.mrf.mxu3  ;;  %3367 = vmatmul.msk.f32.gmra.mxu3 %vm143_vm0, %v2270_v59  ;;  %vm2172_vm7 = vmor %vm2170_vm6, %vm2171_vm5  ;;  %vm2180_vm9 = vweird.f32 %v2059_v20 }
 0x778   :  { %v2163_v18 = vsel %vm2162_vm4, %v3685_v57, %v2159_v46  ;;  %v2166_v15 = vmul.f32 %v3687_v38, %v2165_v51  ;;  %v2447_v42 = vadd.f32 %v2431_v62, %v5392_v0  ;;  %v5403_v47 = vadd.f32 %v5387_v29, %v2354_v58 }
 0x779   :  { %v2233_v48 = vmul.f32 %v2163_v18, %v5266_v27 }
 0x77a   :  { %v2167_v8 = vmul.f32 0.5, %v2166_v15  ;;  %v2463_v2 = vmul.f32 0.7978846, %v2447_v42  ;;  %v2400_v33 = vmul.f32 %v5403_v47, %v5403_v47  ;;  %v2022_v56 = vpop.xlane.xlu2 %2021 }
 0x77b   :  { %v2044_v22 = vmul.f32 0.03125, %v2022_v56  ;;  %v2252_v14 = vmul.f32 %v5244_v63, %v2233_v48 }
 0x77c   :  { %v2168_v44 = vsub.f32 1.5, %v2167_v8  ;;  %3690 = vtanh.f32 %v2463_v2  ;;  %v2416_v36 = vmul.f32 %v2400_v33, %v5403_v47 }
 0x77d   :  { %v3689_v32 = vpop.eup %3688  ;;  %v5410_v57 = vadd.f32 1e-05, %v2044_v22  ;;  %v2271_v1 = vadd.f32 %v5254_v40, %v2252_v14 }
 0x77e   :  { %v2169_v27 = vmul.f32 %v3687_v38, %v2168_v44  ;;  %v2175_v9 = vmul.f32 %v3689_v32, %v2059_v20  ;;  %v2432_v49 = vmul.f32 0.044715, %v2416_v36  ;;  %vm2181_vm8 = vweird.f32 %v3689_v32 }
 0x77f   :  { %3692 = vrsqrt.f32 %v5410_v57  ;;  %v2357_v37 = vpop.f32.mrf.mxu3  ;;  %3368 = vmatmul.msk.f32.gmra.mxu3 %vm143_vm0, %v2271_v1  ;;  %vm2182_vm10 = vmor %vm2180_vm9, %vm2181_vm8  ;;  %vm2190_vm12 = vweird.f32 %v5410_v57 }
 0x780   :  { %v2173_v28 = vsel %vm2172_vm7, %v3687_v38, %v2169_v27  ;;  %v2176_v30 = vmul.f32 %v3689_v32, %v2175_v9  ;;  %v5416_v21 = vadd.f32 %v5387_v29, %v2357_v37  ;;  %v2448_v31 = vadd.f32 %v2432_v49, %v5403_v47 }
 0x781   :  { %v2234_v16 = vmul.f32 %v2173_v28, %v5277_v17 }
 0x782   :  { %v3691_v45 = vpop.eup %3690  ;;  %v2177_v4 = vmul.f32 0.5, %v2176_v30  ;;  %v2401_v34 = vmul.f32 %v5416_v21, %v5416_v21  ;;  %v2025_v52 = vpop.xlane.xlu0 %2024  ;;  %v2464_v10 = vmul.f32 0.7978846, %v2448_v31 }
 0x783   :  { %v2045_v53 = vmul.f32 0.03125, %v2025_v52  ;;  %v2253_v59 = vmul.f32 %v5244_v63, %v2234_v16  ;;  %v2495_v46 = vadd.f32 1.0, %v3691_v45 }
 0x784   :  { %v2178_v38 = vsub.f32 1.5, %v2177_v4  ;;  %v2417_v51 = vmul.f32 %v2401_v34, %v5416_v21  ;;  %3694 = vtanh.f32 %v2464_v10 }
 0x785   :  { %v3693_v62 = vpop.eup %3692  ;;  %v2061_v58 = vadd.f32 1e-05, %v2045_v53  ;;  %v2272_v17 = vadd.f32 %v5254_v40, %v2253_v59  ;;  %v2511_v18 = vmul.f32 0.5, %v2495_v46 }
 0x786   :  { %v2179_v15 = vmul.f32 %v3689_v32, %v2178_v38  ;;  %v2185_v42 = vmul.f32 %v3693_v62, %v5410_v57  ;;  %v2433_v48 = vmul.f32 0.044715, %v2417_v51  ;;  %vm2191_vm11 = vweird.f32 %v3693_v62 }
 0x787   :  { %3696 = vrsqrt.f32 %v2061_v58  ;;  %v2360_v8 = vpop.f32.mrf.mxu3  ;;  %3369 = vmatmul.msk.f32.gmra.mxu3 %vm143_vm0, %v2272_v17  ;;  %v2527_v2 = vmul.f32 %v2511_v18, %v5392_v0  ;;  %vm2192_vm13 = vmor %vm2190_vm12, %vm2191_vm11  ;;  %vm2200_vm15 = vweird.f32 %v2061_v58 }
 0x788   :  { %v2183_v33 = vsel %vm2182_vm10, %v3689_v32, %v2179_v15  ;;  %v2186_v56 = vmul.f32 %v3693_v62, %v2185_v42  ;;  %v5429_v22 = vadd.f32 %v5387_v29, %v2360_v8  ;;  %v2449_v14 = vadd.f32 %v2433_v48, %v5416_v21 }
 0x789   :  { %v2235_v44 = vmul.f32 %v2183_v33, %v5287_v61  ;;  %2575 = vmatmul.f32.vlgmr.msra.gmra.mxu0 %v2527_v2 }
 0x78a   :  { %v3695_v20 = vpop.eup %3694  ;;  %v2187_v36 = vmul.f32 0.5, %v2186_v56  ;;  %v2402_v1 = vmul.f32 %v5429_v22, %v5429_v22  ;;  %v2465_v27 = vmul.f32 0.7978846, %v2449_v14 }
 0x78b   :  { %v2254_v9 = vmul.f32 %v5244_v63, %v2235_v44  ;;  %v2496_v49 = vadd.f32 1.0, %v3695_v20 }
 0x78c   :  { %v2188_v0 = vsub.f32 1.5, %v2187_v36  ;;  %v2418_v32 = vmul.f32 %v2402_v1, %v5429_v22  ;;  %3698 = vtanh.f32 %v2465_v27 }
 0x78d   :  { %v3697_v37 = vpop.eup %3696  ;;  %v2273_v28 = vadd.f32 %v5254_v40, %v2254_v9  ;;  %v2512_v30 = vmul.f32 0.5, %v2496_v49 }
 0x78e   :  { %v2189_v61 = vmul.f32 %v3693_v62, %v2188_v0  ;;  %v2195_v31 = vmul.f32 %v3697_v37, %v2061_v58  ;;  %v2434_v16 = vmul.f32 0.044715, %v2418_v32  ;;  %vm2201_vm14 = vweird.f32 %v3697_v37 }
 0x78f   :  { %v2363_v45 = vpop.f32.mrf.mxu3  ;;  %3370 = vmatmul.msk.f32.gmra.mxu3 %vm143_vm0, %v2273_v28  ;;  %v2528_v4 = vmul.f32 %v2512_v30, %v5403_v47  ;;  %vm2202_vm1 = vmor %vm2200_vm15, %vm2201_vm14 }
 0x790   :  { %v2193_v34 = vsel %vm2192_vm13, %v3693_v62, %v2189_v61  ;;  %v2196_v52 = vmul.f32 %v3697_v37, %v2195_v31  ;;  %v2364_v10 = vadd.f32 %v5387_v29, %v2363_v45  ;;  %v2450_v53 = vadd.f32 %v2434_v16, %v5429_v22 }
 0x791   :  { %v2236_v59 = vmul.f32 %v2193_v34, %v5297_v55  ;;  %2578 = vmatmul.f32.gmra.mxu0 %v2528_v4 }
 0x792   :  { %v3699_v46 = vpop.eup %3698  ;;  %v2197_v38 = vmul.f32 0.5, %v2196_v52  ;;  %v2403_v57 = vmul.f32 %v2364_v10, %v2364_v10  ;;  %v2466_v51 = vmul.f32 0.7978846, %v2450_v53 }
 0x793   :  { %v2255_v17 = vmul.f32 %v5244_v63, %v2236_v59  ;;  %v2497_v18 = vadd.f32 1.0, %v3699_v46 }
 0x794   :  { %v2198_v15 = vsub.f32 1.5, %v2197_v38  ;;  %v2419_v42 = vmul.f32 %v2403_v57, %v2364_v10  ;;  %3700 = vtanh.f32 %v2466_v51 }
 0x795   :  { %v2274_v47 = vadd.f32 %v5254_v40, %v2255_v17  ;;  %v2513_v62 = vmul.f32 0.5, %v2497_v18 }
 0x796   :  { %v2199_v48 = vmul.f32 %v3697_v37, %v2198_v15  ;;  %v2435_v8 = vmul.f32 0.044715, %v2419_v42 }
 0x797   :  { %v2366_v55 = vpop.f32.mrf.mxu3  ;;  %3371 = vmatmul.msk.f32.gmra.mxu3 %vm143_vm0, %v2274_v47  ;;  %v2529_v2 = vmul.f32 %v2513_v62, %v5416_v21 }
 0x798   :  { %v2203_v33 = vsel %vm2202_vm1, %v3697_v37, %v2199_v48  ;;  %v2451_v56 = vadd.f32 %v2435_v8, %v2364_v10  ;;  %v2367_v14 = vadd.f32 %v5387_v29, %v2366_v55 }
 0x799   :  { %v2237_v44 = vmul.f32 %v2203_v33, %v5307_v50  ;;  %2581 = vmatmul.f32.gmra.mxu0 %v2529_v2 }
 0x79a   :  { %v3701_v20 = vpop.eup %3700  ;;  %v2404_v36 = vmul.f32 %v2367_v14, %v2367_v14  ;;  %v2467_v1 = vmul.f32 0.7978846, %v2451_v56 }
 0x79b   :  { %v2256_v27 = vmul.f32 %v5244_v63, %v2237_v44  ;;  %v2498_v58 = vadd.f32 1.0, %v3701_v20 }
 0x79c   :  { %v2420_v9 = vmul.f32 %v2404_v36, %v2367_v14  ;;  %3702 = vtanh.f32 %v2467_v1 }
 0x79d   :  { %v2275_v49 = vadd.f32 %v5254_v40, %v2256_v27  ;;  %v2514_v0 = vmul.f32 0.5, %v2498_v58 }
 0x79e   :  { %v2436_v32 = vmul.f32 0.044715, %v2420_v9 }
 0x79f   :  { %v2369_v21 = vpop.f32.mrf.mxu3  ;;  %3372 = vmatmul.msk.f32.gmra.mxu3 %vm143_vm0, %v2275_v49  ;;  %v2530_v37 = vmul.f32 %v2514_v0, %v5429_v22 }
 0x7a0   :  { %v2452_v28 = vadd.f32 %v2436_v32, %v2367_v14  ;;  %v2370_v50 = vadd.f32 %v5387_v29, %v2369_v21 }
 0x7a1   :  { %2584 = vmatmul.f32.gmra.mxu0 %v2530_v37 }
 0x7a2   :  { %v3703_v30 = vpop.eup %3702  ;;  %v2405_v61 = vmul.f32 %v2370_v50, %v2370_v50  ;;  %v2468_v31 = vmul.f32 0.7978846, %v2452_v28 }
 0x7a3   :  { %v2499_v16 = vadd.f32 1.0, %v3703_v30 }
 0x7a4   :  { %v2421_v45 = vmul.f32 %v2405_v61, %v2370_v50  ;;  %3704 = vtanh.f32 %v2468_v31 }
 0x7a5   :  { %v2515_v4 = vmul.f32 0.5, %v2499_v16 }
 0x7a6   :  { %v2437_v34 = vmul.f32 0.044715, %v2421_v45 }
 0x7a7   :  { %v2531_v52 = vmul.f32 %v2515_v4, %v2364_v10 }
 0x7a8   :  { %v2453_v53 = vadd.f32 %v2437_v34, %v2370_v50 }
 0x7a9   :  { %2587 = vmatmul.f32.gmra.mxu0 %v2531_v52 }
 0x7aa   :  { %v3705_v59 = vpop.eup %3704  ;;  %v2469_v46 = vmul.f32 0.7978846, %v2453_v53 }
 0x7ab   :  { %v2500_v38 = vadd.f32 1.0, %v3705_v59 }
 0x7ac   :  { %3706 = vtanh.f32 %v2469_v46 }
 0x7ad   :  { %v2516_v22 = vmul.f32 0.5, %v2500_v38 }
 0x7af   :  { %v2532_v57 = vmul.f32 %v2516_v22, %v2367_v14 }
 0x7b1   :  { %2590 = vmatmul.f32.gmra.mxu0 %v2532_v57 }
 0x7b2   :  { %v3707_v51 = vpop.eup %3706 }
 0x7b3   :  { %v2501_v17 = vadd.f32 1.0, %v3707_v51 }
 0x7b5   :  { %v2517_v18 = vmul.f32 0.5, %v2501_v17 }
 0x7b7   :  { %v2533_v15 = vmul.f32 %v2517_v18, %v2370_v50 }
 0x7b9   :  { %2593 = vmatmul.f32.gmra.mxu0 %v2533_v15 }
 0x7d5   :  { %v2028_v42 = vpop.xlane.xlu1 %2027 }
 0x7d6   :  { %v2046_v47 = vmul.f32 0.03125, %v2028_v42 }
 0x7d8   :  { %v2062_v62 = vadd.f32 1e-05, %v2046_v47 }
 0x7da   :  { %3708 = vrsqrt.f32 %v2062_v62  ;;  %vm2210_vm3 = vweird.f32 %v2062_v62 }
 0x7dd   :  { %v2031_v48 = vpop.xlane.xlu2 %2030 }
 0x7de   :  { %v2047_v10 = vmul.f32 0.03125, %v2031_v48 }
 0x7e0   :  { %v3709_v8 = vpop.eup %3708  ;;  %v2063_v55 = vadd.f32 1e-05, %v2047_v10 }
 0x7e1   :  { %v2205_v2 = vmul.f32 %v3709_v8, %v2062_v62  ;;  %vm2211_vm2 = vweird.f32 %v3709_v8 }
 0x7e2   :  { %3710 = vrsqrt.f32 %v2063_v55  ;;  %vm2212_vm4 = vmor %vm2210_vm3, %vm2211_vm2  ;;  %vm2220_vm6 = vweird.f32 %v2063_v55 }
 0x7e3   :  { %v2206_v33 = vmul.f32 %v3709_v8, %v2205_v2 }
 0x7e5   :  { %v2207_v56 = vmul.f32 0.5, %v2206_v33 }
 0x7e7   :  { %v2208_v44 = vsub.f32 1.5, %v2207_v56 }
 0x7e8   :  { %v3711_v14 = vpop.eup %3710 }
 0x7e9   :  { %v2209_v20 = vmul.f32 %v3709_v8, %v2208_v44  ;;  %v2215_v36 = vmul.f32 %v3711_v14, %v2063_v55  ;;  %vm2221_vm5 = vweird.f32 %v3711_v14 }
 0x7ea   :  { %vm2222_vm7 = vmor %vm2220_vm6, %vm2221_vm5 }
 0x7eb   :  { %v2213_v1 = vsel %vm2212_vm4, %v3709_v8, %v2209_v20  ;;  %v2216_v27 = vmul.f32 %v3711_v14, %v2215_v36 }
 0x7ec   :  { %v2238_v58 = vmul.f32 %v2213_v1, %v5353_v11 }
 0x7ed   :  { %v2217_v9 = vmul.f32 0.5, %v2216_v27 }
 0x7ee   :  { %v2257_v49 = vmul.f32 %v5244_v63, %v2238_v58 }
 0x7ef   :  { %v2218_v0 = vsub.f32 1.5, %v2217_v9 }
 0x7f0   :  { %v2276_v32 = vadd.f32 %v5254_v40, %v2257_v49 }
 0x7f1   :  { %v2219_v21 = vmul.f32 %v3711_v14, %v2218_v0 }
 0x7f2   :  { %v2372_v37 = vpop.f32.mrf.mxu3  ;;  %3373 = vmatmul.msk.f32.gmra.mxu3 %vm143_vm0, %v2276_v32 }
 0x7f3   :  { %v2223_v28 = vsel %vm2222_vm7, %v3711_v14, %v2219_v21  ;;  %v2373_v50 = vadd.f32 %v5387_v29, %v2372_v37 }
 0x7f4   :  { %v2239_v30 = vmul.f32 %v2223_v28, %v5371_v35 }
 0x7f5   :  { %v2406_v61 = vmul.f32 %v2373_v50, %v2373_v50 }
 0x7f6   :  { %v2258_v11 = vmul.f32 %v5244_v63, %v2239_v30 }
 0x7f7   :  { %v2422_v31 = vmul.f32 %v2406_v61, %v2373_v50 }
 0x7f8   :  { %v2277_v16 = vadd.f32 %v5254_v40, %v2258_v11 }
 0x7f9   :  { %v2438_v45 = vmul.f32 0.044715, %v2422_v31 }
 0x7fa   :  { %v2375_v4 = vpop.f32.mrf.mxu3  ;;  %3374 = vmatmul.msk.f32.gmra.mxu3 %vm143_vm0, %v2277_v16 }
 0x7fb   :  { %v2454_v34 = vadd.f32 %v2438_v45, %v2373_v50  ;;  %v2376_v52 = vadd.f32 %v5387_v29, %v2375_v4 }
 0x7fd   :  { %v2407_v53 = vmul.f32 %v2376_v52, %v2376_v52  ;;  %v2470_v59 = vmul.f32 0.7978846, %v2454_v34 }
 0x7ff   :  { %v2423_v46 = vmul.f32 %v2407_v53, %v2376_v52  ;;  %3712 = vtanh.f32 %v2470_v59 }
 0x801   :  { %v2439_v38 = vmul.f32 0.044715, %v2423_v46 }
 0x802   :  { %v2378_v22 = vpop.f32.mrf.mxu3 }
 0x803   :  { %v2455_v35 = vadd.f32 %v2439_v38, %v2376_v52  ;;  %v2379_v57 = vadd.f32 %v5387_v29, %v2378_v22 }
 0x805   :  { %v3713_v63 = vpop.eup %3712  ;;  %v2408_v51 = vmul.f32 %v2379_v57, %v2379_v57  ;;  %v2471_v17 = vmul.f32 0.7978846, %v2455_v35 }
 0x806   :  { %v2502_v40 = vadd.f32 1.0, %v3713_v63 }
 0x807   :  { %v2424_v18 = vmul.f32 %v2408_v51, %v2379_v57  ;;  %3714 = vtanh.f32 %v2471_v17 }
 0x808   :  { %v2518_v15 = vmul.f32 0.5, %v2502_v40 }
 0x809   :  { %v2440_v42 = vmul.f32 0.044715, %v2424_v18 }
 0x80a   :  { %v2381_v47 = vpop.f32.mrf.mxu3  ;;  %v2534_v62 = vmul.f32 %v2518_v15, %v2373_v50 }
 0x80b   :  { %v2456_v48 = vadd.f32 %v2440_v42, %v2379_v57  ;;  %v2382_v10 = vadd.f32 %v5387_v29, %v2381_v47 }
 0x80c   :  { %2596 = vmatmul.f32.gmra.mxu0 %v2534_v62 }
 0x80d   :  { %v3715_v8 = vpop.eup %3714  ;;  %v2409_v55 = vmul.f32 %v2382_v10, %v2382_v10  ;;  %v2472_v2 = vmul.f32 0.7978846, %v2456_v48 }
 0x80e   :  { %v2503_v33 = vadd.f32 1.0, %v3715_v8 }
 0x80f   :  { %v2425_v56 = vmul.f32 %v2409_v55, %v2382_v10  ;;  %3716 = vtanh.f32 %v2472_v2 }
 0x810   :  { %v2519_v44 = vmul.f32 0.5, %v2503_v33 }
 0x811   :  { %v2441_v14 = vmul.f32 0.044715, %v2425_v56  ;;  %v5470_v56 = vpop.f32.mrf.mxu0 }
 0x812   :  { %v2384_v20 = vpop.f32.mrf.mxu3  ;;  %v2535_v36 = vmul.f32 %v2519_v44, %v2376_v52 }
 0x813   :  { %v2457_v1 = vadd.f32 %v2441_v14, %v2382_v10  ;;  %v2385_v27 = vadd.f32 %v5387_v29, %v2384_v20 }
 0x814   :  { %2599 = vmatmul.f32.gmra.mxu0 %v2535_v36 }
 0x815   :  { %v3717_v58 = vpop.eup %3716  ;;  %v2410_v9 = vmul.f32 %v2385_v27, %v2385_v27  ;;  %v2473_v49 = vmul.f32 0.7978846, %v2457_v1 }
 0x816   :  { %v2504_v0 = vadd.f32 1.0, %v3717_v58 }
 0x817   :  { %v2426_v32 = vmul.f32 %v2410_v9, %v2385_v27  ;;  %3718 = vtanh.f32 %v2473_v49 }
 0x818   :  { %v2520_v21 = vmul.f32 0.5, %v2504_v0 }
 0x819   :  { %v2442_v37 = vmul.f32 0.044715, %v2426_v32  ;;  %v5472_v44 = vpop.f32.mrf.mxu0 }
 0x81a   :  { %v2387_v28 = vpop.f32.mrf.mxu3  ;;  %v2536_v50 = vmul.f32 %v2520_v21, %v2379_v57 }
 0x81b   :  { %v2458_v30 = vadd.f32 %v2442_v37, %v2385_v27  ;;  %v2388_v61 = vadd.f32 %v5387_v29, %v2387_v28 }
 0x81c   :  { %2602 = vmatmul.f32.gmra.mxu0 %v2536_v50 }
 0x81d   :  { %v3719_v11 = vpop.eup %3718  ;;  %v2411_v31 = vmul.f32 %v2388_v61, %v2388_v61  ;;  %v2474_v16 = vmul.f32 0.7978846, %v2458_v30 }
 0x81e   :  { %v2505_v45 = vadd.f32 1.0, %v3719_v11 }
 0x81f   :  { %v2427_v4 = vmul.f32 %v2411_v31, %v2388_v61  ;;  %3720 = vtanh.f32 %v2474_v16 }
 0x820   :  { %v2521_v34 = vmul.f32 0.5, %v2505_v45 }
 0x821   :  { %v2443_v52 = vmul.f32 0.044715, %v2427_v4  ;;  %v5474_v14 = vpop.f32.mrf.mxu0 }
 0x822   :  { %v2390_v53 = vpop.f32.mrf.mxu3  ;;  %v2537_v59 = vmul.f32 %v2521_v34, %v2382_v10 }
 0x823   :  { %v2459_v46 = vadd.f32 %v2443_v52, %v2388_v61  ;;  %v2391_v38 = vadd.f32 %v5387_v29, %v2390_v53 }
 0x824   :  { %2605 = vmatmul.f32.gmra.mxu0 %v2537_v59 }
 0x825   :  { %v3721_v22 = vpop.eup %3720  ;;  %v2412_v35 = vmul.f32 %v2391_v38, %v2391_v38  ;;  %v2475_v57 = vmul.f32 0.7978846, %v2459_v46 }
 0x826   :  { %v2506_v63 = vadd.f32 1.0, %v3721_v22 }
 0x827   :  { %v2428_v51 = vmul.f32 %v2412_v35, %v2391_v38  ;;  %3722 = vtanh.f32 %v2475_v57 }
 0x828   :  { %v2522_v17 = vmul.f32 0.5, %v2506_v63 }
 0x829   :  { %v2444_v40 = vmul.f32 0.044715, %v2428_v51  ;;  %v5476_v20 = vpop.f32.mrf.mxu0 }
 0x82a   :  { %v2538_v18 = vmul.f32 %v2522_v17, %v2385_v27 }
 0x82b   :  { %v2460_v15 = vadd.f32 %v2444_v40, %v2391_v38  ;;  %v5487_v40 = vld [vmem:[%s5947_s16] ss:$0 sm:$0xff] }
 0x82c   :  { %2608 = vmatmul.f32.gmra.mxu0 %v2538_v18 }
 0x82d   :  { %v3723_v42 = vpop.eup %3722  ;;  %v2476_v47 = vmul.f32 0.7978846, %v2460_v15 }
 0x82e   :  { %v2507_v62 = vadd.f32 1.0, %v3723_v42 }
 0x82f   :  { %3724 = vtanh.f32 %v2476_v47 }
 0x830   :  { %v2523_v48 = vmul.f32 0.5, %v2507_v62 }
 0x831   :  { %v2588_v36 = vpop.f32.mrf.mxu0 }
 0x832   :  { %v2539_v10 = vmul.f32 %v2523_v48, %v2388_v61 }
 0x834   :  { %2611 = vmatmul.f32.gmra.mxu0 %v2539_v10 }
 0x835   :  { %v3725_v8 = vpop.eup %3724 }
 0x836   :  { %v2508_v55 = vadd.f32 1.0, %v3725_v8 }
 0x838   :  { %v2524_v2 = vmul.f32 0.5, %v2508_v55 }
 0x839   :  { %v5479_v58 = vpop.f32.mrf.mxu0 }
 0x83a   :  { %v2540_v33 = vmul.f32 %v2524_v2, %v2391_v38 }
 0x83c   :  { %2614 = vmatmul.f32.gmra.mxu0 %v2540_v33 }
 0x841   :  { %v5482_v30 = vpop.f32.mrf.mxu0 }
 0x875   :  { %v2393_v1 = vpop.f32.mrf.mxu3 }
 0x876   :  { %v2394_v27 = vadd.f32 %v5387_v29, %v2393_v1 }
 0x878   :  { %v2413_v9 = vmul.f32 %v2394_v27, %v2394_v27 }
 0x87a   :  { %v2429_v49 = vmul.f32 %v2413_v9, %v2394_v27 }
 0x87c   :  { %v2445_v0 = vmul.f32 0.044715, %v2429_v49 }
 0x87d   :  { %v2396_v32 = vpop.f32.mrf.mxu3 }
 0x87e   :  { %v2461_v21 = vadd.f32 %v2445_v0, %v2394_v27  ;;  %v2397_v37 = vadd.f32 %v5387_v29, %v2396_v32 }
 0x880   :  { %v2414_v28 = vmul.f32 %v2397_v37, %v2397_v37  ;;  %v2477_v50 = vmul.f32 0.7978846, %v2461_v21 }
 0x882   :  { %v2430_v61 = vmul.f32 %v2414_v28, %v2397_v37  ;;  %3726 = vtanh.f32 %v2477_v50  ;;  %v2629_v50 = vadd.f32 %v5479_v58, %v5115_v7 }
 0x884   :  { %v2446_v11 = vmul.f32 0.044715, %v2430_v61 }
 0x886   :  { %v2462_v31 = vadd.f32 %v2446_v11, %v2397_v37 }
 0x888   :  { %v3727_v16 = vpop.eup %3726  ;;  %v2478_v45 = vmul.f32 0.7978846, %v2462_v31  ;;  %v2627_v31 = vadd.f32 %v5476_v20, %v5099_v24 }
 0x889   :  { %v2597_v4 = vpop.f32.mrf.mxu0  ;;  %v2509_v34 = vadd.f32 1.0, %v3727_v16  ;;  %v2630_v16 = vadd.f32 %v5482_v30, %v5124_v39 }
 0x88a   :  { %3728 = vtanh.f32 %v2478_v45  ;;  %v2631_v48 = vadd.f32 %v2597_v4, %v5138_v3  ;;  %v5540_v58 = vadd.f32 %v5487_v40, %v2627_v31 }
 0x88b   :  { %v2525_v52 = vmul.f32 0.5, %v2509_v34  ;;  %v5543_v45 = vadd.f32 %v5487_v40, %v2630_v16 }
 0x88c   :  { %v5500_v8 = vadd.f32 %v5487_v40, %v2631_v48  ;;  %v2671_v4 = vsel %vm143_vm0, %v5540_v58, 0.0 }
 0x88d   :  { %v2541_v53 = vmul.f32 %v2525_v52, %v2394_v27  ;;  %v2680_v24 = vsel %vm143_vm0, %v5543_v45, 0.0  ;;  %v2624_v52 = vadd.f32 %v5470_v56, %v5075_v25  ;;  %v2625_v25 = vadd.f32 %v5472_v44, %v5083_v13 }
 0x88f   :  { %2617 = vmatmul.f32.gmra.mxu0 %v2541_v53 }
 0x890   :  { %v3729_v59 = vpop.eup %3728 }
 0x891   :  { %v2600_v46 = vpop.f32.mrf.mxu0  ;;  %v2510_v38 = vadd.f32 1.0, %v3729_v59  ;;  %v5557_v59 = vadd.f32 %v5487_v40, %v2624_v52 }
 0x892   :  { %v2632_v32 = vadd.f32 %v2600_v46, %v5152_v19 }
 0x893   :  { %v2526_v29 = vmul.f32 0.5, %v2510_v38  ;;  %v2662_v46 = vsel %vm143_vm0, %v5557_v59, 0.0 }
 0x895   :  { %v2542_v22 = vmul.f32 %v2526_v29, %v2397_v37 }
 0x897   :  { %2620 = vmatmul.f32.gmra.mxu0 %v2542_v22 }
 0x899   :  { %v2603_v35 = vpop.f32.mrf.mxu0 }
 0x8a1   :  { %v2606_v57 = vpop.f32.mrf.mxu0 }
 0x8a2   :  { %v2634_v42 = vadd.f32 %v2606_v57, %v5180_v60  ;;  %v2683_v60 = vsel %vm143_vm0, %v5500_v8, 0.0 }
 0x8a4   :  { %v5494_v62 = vadd.f32 %v5487_v40, %v2634_v42 }
 0x8a6   :  { %v2692_v10 = vsel %vm143_vm0, %v5494_v62, 0.0 }
 0x8a9   :  { %v2609_v63 = vpop.f32.mrf.mxu0 }
 0x8aa   :  { %v2635_v27 = vadd.f32 %v2609_v63, %v5194_v54  ;;  %v2652_v54 = vadd.f32 %v5487_v40, %v2632_v32 }
 0x8ac   :  { %v2655_v9 = vadd.f32 %v5487_v40, %v2635_v27  ;;  %v2686_v61 = vsel %vm143_vm0, %v2652_v54, 0.0 }
 0x8b1   :  { %v2612_v51 = vpop.f32.mrf.mxu0 }
 0x8b2   :  { %v2636_v21 = vadd.f32 %v2612_v51, %v5208_v41  ;;  %v5529_v41 = vadd.f32 %v5487_v40, %v2629_v50 }
 0x8b4   :  { %v2656_v28 = vadd.f32 %v5487_v40, %v2636_v21  ;;  %v2677_v7 = vsel %vm143_vm0, %v5529_v41, 0.0 }
 0x8b6   :  { %v2698_v19 = vsel %vm143_vm0, %v2656_v28, 0.0 }
 0x8b9   :  { %v2615_v17 = vpop.f32.mrf.mxu0 }
 0x8ba   :  { %v2637_v18 = vadd.f32 %v2615_v17, %v5222_v12  ;;  %v2628_v12 = vadd.f32 %v2588_v36, %v5107_v43  ;;  %v5569_v17 = vadd.f32 %v5487_v40, %v2625_v25 }
 0x8bc   :  { %v2657_v15 = vadd.f32 %v5487_v40, %v2637_v18  ;;  %v5506_v55 = vadd.f32 %v5487_v40, %v2628_v12  ;;  %v2665_v13 = vsel %vm143_vm0, %v5569_v17, 0.0 }
 0x8be   :  { %v2701_v47 = vsel %vm143_vm0, %v2657_v15, 0.0  ;;  %v2674_v2 = vsel %vm143_vm0, %v5506_v55, 0.0 }
 0x8bf   :  { %2702 = vadd.xlane.f32.xlu2 %v2701_v47  ;;  %v2626_v47 = vadd.f32 %v5474_v14, %v5091_v26 }
 0x8c7   :  { %2693 = vadd.xlane.f32.xlu2 %v2692_v10 }
 0x8cf   :  { %2684 = vadd.xlane.f32.xlu2 %v2683_v60  ;;  %v5583_v60 = vadd.f32 %v5487_v40, %v2626_v47 }
 0x8d7   :  { %2675 = vadd.xlane.f32.xlu2 %v2674_v2 }
 0x90c   :  { %v2618_v3 = vpop.f32.mrf.mxu0 }
 0x90d   :  { %v2638_v33 = vadd.f32 %v2618_v3, %v5236_v5  ;;  %v2695_v5 = vsel %vm143_vm0, %v2655_v9, 0.0 }
 0x90f   :  { %v2658_v1 = vadd.f32 %v5487_v40, %v2638_v33 }
 0x911   :  { %v2704_v43 = vsel %vm143_vm0, %v2658_v1, 0.0 }
 0x912   :  { %2705 = vadd.xlane.f32.xlu1 %v2704_v43  ;;  %v2668_v43 = vsel %vm143_vm0, %v5583_v60, 0.0 }
 0x914   :  { %v2621_v36 = vpop.f32.mrf.mxu0 }
 0x915   :  { %v2639_v49 = vadd.f32 %v2621_v36, %v5262_v23  ;;  %v2633_v23 = vadd.f32 %v2603_v35, %v5166_v6 }
 0x917   :  { %v2659_v0 = vadd.f32 %v5487_v40, %v2639_v49  ;;  %v2653_v11 = vadd.f32 %v5487_v40, %v2633_v23 }
 0x919   :  { %v2707_v37 = vsel %vm143_vm0, %v2659_v0, 0.0  ;;  %v2689_v6 = vsel %vm143_vm0, %v2653_v11, 0.0 }
 0x91a   :  { %2696 = vadd.xlane.f32.xlu1 %v2695_v5  ;;  %2708 = vadd.xlane.f32.xlu0 %v2707_v37 }
 0x922   :  { %2687 = vadd.xlane.f32.xlu1 %v2686_v61  ;;  %2699 = vadd.xlane.f32.xlu0 %v2698_v19 }
 0x92a   :  { %2678 = vadd.xlane.f32.xlu1 %v2677_v7  ;;  %2690 = vadd.xlane.f32.xlu0 %v2689_v6 }
 0x932   :  { %2672 = vadd.xlane.f32.xlu1 %v2671_v4  ;;  %2681 = vadd.xlane.f32.xlu0 %v2680_v24  ;;  %v2703_v39 = vpop.xlane.xlu2 %2702 }
 0x933   :  { %v2723_v20 = vmul.f32 0.03125, %v2703_v39 }
 0x935   :  { %v5549_v30 = vsub.f32 %v2657_v15, %v2723_v20 }
 0x937   :  { %v2755_v34 = vmul.f32 %v5549_v30, %v5549_v30 }
 0x939   :  { %v2797_v53 = vsel %vm143_vm0, %v2755_v34, 0.0 }
 0x93a   :  { %2798 = vadd.xlane.f32.xlu1 %v2797_v53  ;;  %v2694_v26 = vpop.xlane.xlu2 %2693 }
 0x93b   :  { %v2720_v49 = vmul.f32 0.03125, %v2694_v26 }
 0x942   :  { %2663 = vadd.xlane.f32.xlu1 %v2662_v46 }
 0x985   :  { %v2706_v38 = vpop.xlane.xlu1 %2705 }
 0x986   :  { %v2724_v29 = vmul.f32 0.03125, %v2706_v38 }
 0x988   :  { %v5561_v22 = vsub.f32 %v2658_v1, %v2724_v29 }
 0x98a   :  { %v2756_v35 = vmul.f32 %v5561_v22, %v5561_v22 }
 0x98c   :  { %v2800_v56 = vsel %vm143_vm0, %v2756_v35, 0.0 }
 0x98d   :  { %2801 = vadd.xlane.f32.xlu2 %v2800_v56  ;;  %v2697_v57 = vpop.xlane.xlu1 %2696  ;;  %v2709_v63 = vpop.xlane.xlu0 %2708 }
 0x98e   :  { %v2725_v51 = vmul.f32 0.03125, %v2709_v63  ;;  %v2721_v18 = vmul.f32 0.03125, %v2697_v57 }
 0x990   :  { %v5571_v15 = vsub.f32 %v2659_v0, %v2725_v51  ;;  %v5577_v48 = vsub.f32 %v2655_v9, %v2721_v18 }
 0x992   :  { %v2757_v42 = vmul.f32 %v5571_v15, %v5571_v15  ;;  %v2753_v33 = vmul.f32 %v5577_v48, %v5577_v48 }
 0x994   :  { %v2803_v44 = vsel %vm143_vm0, %v2757_v42, 0.0  ;;  %v2791_v27 = vsel %vm143_vm0, %v2753_v33, 0.0 }
 0x995   :  { %2666 = vadd.xlane.f32.xlu2 %v2665_v13  ;;  %v2688_v10 = vpop.xlane.xlu1 %2687  ;;  %2804 = vadd.xlane.f32.xlu0 %v2803_v44  ;;  %v2700_v12 = vpop.xlane.xlu0 %2699 }
 0x996   :  { %v2718_v2 = vmul.f32 0.03125, %v2688_v10  ;;  %v2722_v3 = vmul.f32 0.03125, %v2700_v12 }
 0x998   :  { %v5587_v14 = vsub.f32 %v2652_v54, %v2718_v2  ;;  %v5589_v1 = vsub.f32 %v2656_v28, %v2722_v3  ;;  %v5603_v54 = vsub.f32 %v5494_v62, %v2720_v49  ;;  %v2685_v28 = vpop.xlane.xlu2 %2684 }
 0x999   :  { %v2717_v7 = vmul.f32 0.03125, %v2685_v28 }
 0x99a   :  { %v2750_v21 = vmul.f32 %v5587_v14, %v5587_v14  ;;  %v2754_v5 = vmul.f32 %v5589_v1, %v5589_v1  ;;  %v2752_v6 = vmul.f32 %v5603_v54, %v5603_v54 }
 0x99b   :  { %v5621_v39 = vsub.f32 %v5500_v8, %v2717_v7 }
 0x99c   :  { %v2782_v23 = vsel %vm143_vm0, %v2750_v21, 0.0  ;;  %v2794_v61 = vsel %vm143_vm0, %v2754_v5, 0.0 }
 0x99d   :  { %2792 = vadd.xlane.f32.xlu2 %v2791_v27  ;;  %v2679_v36 = vpop.xlane.xlu1 %2678  ;;  %2669 = vadd.xlane.f32.xlu0 %v2668_v43  ;;  %v2691_v40 = vpop.xlane.xlu0 %2690  ;;  %v2749_v29 = vmul.f32 %v5621_v39, %v5621_v39 }
 0x99e   :  { %v2719_v9 = vmul.f32 0.03125, %v2691_v40  ;;  %v2715_v0 = vmul.f32 0.03125, %v2679_v36 }
 0x99f   :  { %v2779_v25 = vsel %vm143_vm0, %v2749_v29, 0.0 }
 0x9a0   :  { %v5594_v32 = vsub.f32 %v2653_v11, %v2719_v9  ;;  %v5606_v50 = vsub.f32 %v5529_v41, %v2715_v0  ;;  %v2676_v52 = vpop.xlane.xlu2 %2675 }
 0x9a1   :  { %v2714_v38 = vmul.f32 0.03125, %v2676_v52 }
 0x9a2   :  { %v2751_v37 = vmul.f32 %v5594_v32, %v5594_v32  ;;  %v2747_v41 = vmul.f32 %v5606_v50, %v5606_v50 }
 0x9a3   :  { %v5634_v35 = vsub.f32 %v5506_v55, %v2714_v38 }
 0x9a4   :  { %v2785_v19 = vsel %vm143_vm0, %v2751_v37, 0.0  ;;  %v2773_v20 = vsel %vm143_vm0, %v2747_v41, 0.0 }
 0x9a5   :  { %2783 = vadd.xlane.f32.xlu2 %v2782_v23  ;;  %v2673_v11 = vpop.xlane.xlu1 %2672  ;;  %2795 = vadd.xlane.f32.xlu0 %v2794_v61  ;;  %v2682_v31 = vpop.xlane.xlu0 %2681  ;;  %v2746_v51 = vmul.f32 %v5634_v35, %v5634_v35 }
 0x9a6   :  { %v2716_v16 = vmul.f32 0.03125, %v2682_v31  ;;  %2786 = vadd.xlane.f32.xlu1 %v2785_v19  ;;  %v2713_v4 = vmul.f32 0.03125, %v2673_v11 }
 0x9a7   :  { %v2770_v42 = vsel %vm143_vm0, %v2746_v51, 0.0 }
 0x9a8   :  { %v5612_v62 = vsub.f32 %v5543_v45, %v2716_v16  ;;  %v2788_v45 = vsel %vm143_vm0, %v2752_v6, 0.0  ;;  %v5627_v53 = vsub.f32 %v5540_v58, %v2713_v4 }
 0x9aa   :  { %v2748_v24 = vmul.f32 %v5612_v62, %v5612_v62  ;;  %v2745_v8 = vmul.f32 %v5627_v53, %v5627_v53 }
 0x9ac   :  { %v2776_v34 = vsel %vm143_vm0, %v2748_v24, 0.0  ;;  %v2767_v56 = vsel %vm143_vm0, %v2745_v8, 0.0 }
 0x9ad   :  { %2774 = vadd.xlane.f32.xlu2 %v2773_v20  ;;  %v2799_v46 = vpop.xlane.xlu1 %2798  ;;  %2789 = vadd.xlane.f32.xlu0 %v2788_v45 }
 0x9ae   :  { %2777 = vadd.xlane.f32.xlu1 %v2776_v34  ;;  %v2819_v47 = vmul.f32 0.03125, %v2799_v46 }
 0x9b0   :  { %v5647_v13 = vadd.f32 1e-05, %v2819_v47 }
 0x9b2   :  { %3730 = vrsqrt.f32 %v5647_v13  ;;  %vm2974_vm15 = vweird.f32 %v5647_v13 }
 0x9b5   :  { %v2664_v58 = vpop.xlane.xlu1 %2663  ;;  %2780 = vadd.xlane.f32.xlu0 %v2779_v25 }
 0x9b6   :  { %2768 = vadd.xlane.f32.xlu1 %v2767_v56  ;;  %v2710_v57 = vmul.f32 0.03125, %v2664_v58 }
 0x9b8   :  { %v5639_v63 = vsub.f32 %v5557_v59, %v2710_v57  ;;  %v5650_v12 = vpop.eup %3730 }
 0x9b9   :  { %v2969_v43 = vmul.f32 %v5650_v12, %v5647_v13  ;;  %vm2975_vm9 = vweird.f32 %v5650_v12 }
 0x9ba   :  { %v2742_v18 = vmul.f32 %v5639_v63, %v5639_v63  ;;  %vm5695_vm1 = vmor %vm2974_vm15, %vm2975_vm9 }
 0x9bb   :  { %v2970_v21 = vmul.f32 %v5650_v12, %v2969_v43 }
 0x9bc   :  { %v2758_v55 = vsel %vm143_vm0, %v2742_v18, 0.0 }
 0x9bd   :  { %2771 = vadd.xlane.f32.xlu0 %v2770_v42  ;;  %v2971_v31 = vmul.f32 0.5, %v2970_v21  ;;  %v5714_v21 = vld [vmem:[%s5949_s18] ss:$0 sm:$0xff] }
 0x9be   :  { %2759 = vadd.xlane.f32.xlu1 %v2758_v55 }
 0x9bf   :  { %v2972_v24 = vsub.f32 1.5, %v2971_v31 }
 0x9c1   :  { %v2973_v58 = vmul.f32 %v5650_v12, %v2972_v24 }
 0xa00   :  { %v2802_v44 = vpop.xlane.xlu2 %2801 }
 0xa01   :  { %v2820_v10 = vmul.f32 0.03125, %v2802_v44 }
 0xa03   :  { %v2836_v59 = vadd.f32 1e-05, %v2820_v10 }
 0xa05   :  { %3732 = vrsqrt.f32 %v2836_v59  ;;  %vm2984_vm10 = vweird.f32 %v2836_v59 }
 0xa08   :  { %v2805_v2 = vpop.xlane.xlu0 %2804  ;;  %v2667_v3 = vpop.xlane.xlu2 %2666 }
 0xa09   :  { %v2821_v33 = vmul.f32 0.03125, %v2805_v2  ;;  %v2711_v26 = vmul.f32 0.03125, %v2667_v3 }
 0xa0b   :  { %v3733_v27 = vpop.eup %3732  ;;  %v2837_v36 = vadd.f32 1e-05, %v2821_v33  ;;  %v5655_v40 = vsub.f32 %v5569_v17, %v2711_v26  ;;  %v5703_v33 = vld [vmem:[%s5948_s17] ss:$0 sm:$0xff]  ;;  %v2977_v26 = vsel %vm5695_vm1, %v5650_v12, %v2973_v58 }
 0xa0c   :  { %v2979_v9 = vmul.f32 %v3733_v27, %v2836_v59  ;;  %vm2985_vm8 = vweird.f32 %v3733_v27 }
 0xa0d   :  { %3734 = vrsqrt.f32 %v2837_v36  ;;  %v2743_v49 = vmul.f32 %v5655_v40, %v5655_v40  ;;  %vm5675_vm12 = vmor %vm2984_vm10, %vm2985_vm8  ;;  %vm2994_vm13 = vweird.f32 %v2837_v36 }
 0xa0e   :  { %v2980_v0 = vmul.f32 %v3733_v27, %v2979_v9 }
 0xa0f   :  { %v2761_v5 = vsel %vm143_vm0, %v2743_v49, 0.0 }
 0xa10   :  { %v2981_v37 = vmul.f32 0.5, %v2980_v0  ;;  %v2670_v28 = vpop.xlane.xlu0 %2669  ;;  %2762 = vadd.xlane.f32.xlu0 %v2761_v5  ;;  %v2793_v23 = vpop.xlane.xlu2 %2792 }
 0xa11   :  { %v2712_v61 = vmul.f32 0.03125, %v2670_v28  ;;  %v2817_v19 = vmul.f32 0.03125, %v2793_v23 }
 0xa12   :  { %v2982_v7 = vsub.f32 1.5, %v2981_v37  ;;  %v3011_v37 = vmul.f32 %v2977_v26, %v5549_v30 }
 0xa13   :  { %v3735_v11 = vpop.eup %3734  ;;  %v5662_v17 = vsub.f32 %v5583_v60, %v2712_v61  ;;  %v5664_v16 = vadd.f32 1e-05, %v2817_v19 }
 0xa14   :  { %v2989_v41 = vmul.f32 %v3735_v11, %v2837_v36  ;;  %v2983_v34 = vmul.f32 %v3733_v27, %v2982_v7  ;;  %vm2995_vm11 = vweird.f32 %v3735_v11 }
 0xa15   :  { %3736 = vrsqrt.f32 %v5664_v16  ;;  %v2744_v6 = vmul.f32 %v5662_v17, %v5662_v17  ;;  %vm2996_vm14 = vmor %vm2994_vm13, %vm2995_vm11  ;;  %vm2954_vm4 = vweird.f32 %v5664_v16 }
 0xa16   :  { %v2990_v4 = vmul.f32 %v3735_v11, %v2989_v41  ;;  %v2987_v55 = vsel %vm5675_vm12, %v3733_v27, %v2983_v34  ;;  %v3030_v34 = vmul.f32 %v5703_v33, %v3011_v37 }
 0xa17   :  { %v2764_v20 = vsel %vm143_vm0, %v2744_v6, 0.0  ;;  %v3012_v3 = vmul.f32 %v2987_v55, %v5561_v22 }
 0xa18   :  { %v2991_v45 = vmul.f32 0.5, %v2990_v4  ;;  %2765 = vadd.xlane.f32.xlu2 %v2764_v20  ;;  %v2796_v52 = vpop.xlane.xlu0 %2795  ;;  %v2784_v60 = vpop.xlane.xlu2 %2783 }
 0xa19   :  { %v2818_v46 = vmul.f32 0.03125, %v2796_v52  ;;  %v2787_v38 = vpop.xlane.xlu1 %2786  ;;  %v2814_v29 = vmul.f32 0.03125, %v2784_v60  ;;  %v3031_v23 = vmul.f32 %v5703_v33, %v3012_v3 }
 0xa1a   :  { %v2992_v8 = vsub.f32 1.5, %v2991_v45  ;;  %v2815_v25 = vmul.f32 0.03125, %v2787_v38 }
 0xa1b   :  { %v5671_v56 = vpop.eup %3736  ;;  %v5679_v51 = vadd.f32 1e-05, %v2818_v46  ;;  %v5681_v18 = vadd.f32 1e-05, %v2814_v29  ;;  %v3050_v20 = vadd.f32 %v5714_v21, %v3031_v23 }
 0xa1c   :  { %v2993_v42 = vmul.f32 %v3735_v11, %v2992_v8  ;;  %v2949_v47 = vmul.f32 %v5671_v56, %v5664_v16  ;;  %v5687_v44 = vadd.f32 1e-05, %v2815_v25  ;;  %vm2955_vm2 = vweird.f32 %v5671_v56 }
 0xa1d   :  { %3738 = vrsqrt.f32 %v5679_v51  ;;  %vm5751_vm5 = vmor %vm2954_vm4, %vm2955_vm2  ;;  %vm2964_vm6 = vweird.f32 %v5679_v51  ;;  %vm2924_vm15 = vweird.f32 %v5681_v18 }
 0xa1e   :  { %v2997_v10 = vsel %vm2996_vm14, %v3735_v11, %v2993_v42  ;;  %v2950_v59 = vmul.f32 %v5671_v56, %v2949_v47  ;;  %3740 = vrsqrt.f32 %v5687_v44  ;;  %v3049_v42 = vadd.f32 %v5714_v21, %v3030_v34 }
 0xa1f   :  { %v3013_v13 = vmul.f32 %v2997_v10, %v5571_v15  ;;  %3742 = vrsqrt.f32 %v5681_v18  ;;  %vm2934_vm9 = vweird.f32 %v5687_v44 }
 0xa20   :  { %v2790_v27 = vpop.xlane.xlu0 %2789  ;;  %v2775_v43 = vpop.xlane.xlu2 %2774  ;;  %v2951_v9 = vmul.f32 0.5, %v2950_v59 }
 0xa21   :  { %v3032_v36 = vmul.f32 %v5703_v33, %v3013_v13  ;;  %v2778_v49 = vpop.xlane.xlu1 %2777  ;;  %v2816_v22 = vmul.f32 0.03125, %v2790_v27  ;;  %v2811_v0 = vmul.f32 0.03125, %v2775_v43 }
 0xa22   :  { %v2812_v15 = vmul.f32 0.03125, %v2778_v49  ;;  %v2952_v7 = vsub.f32 1.5, %v2951_v9 }
 0xa23   :  { %v3739_v5 = vpop.eup %3738  ;;  %v5717_v28 = vadd.f32 1e-05, %v2816_v22  ;;  %v3051_v12 = vadd.f32 %v5714_v21, %v3032_v36  ;;  %v5731_v30 = vadd.f32 1e-05, %v2811_v0 }
 0xa24   :  { %v5721_v61 = vpop.eup %3740  ;;  %v2959_v19 = vmul.f32 %v3739_v5, %v5679_v51  ;;  %v5724_v11 = vadd.f32 1e-05, %v2812_v15  ;;  %v2953_v60 = vmul.f32 %v5671_v56, %v2952_v7  ;;  %vm2965_vm3 = vweird.f32 %v3739_v5 }
 0xa25   :  { %v5726_v31 = vpop.eup %3742  ;;  %v2929_v41 = vmul.f32 %v5721_v61, %v5687_v44  ;;  %3744 = vrsqrt.f32 %v5717_v28  ;;  %3375 = vmatpush.xpose.msk.msrb.mxu2 %vm143_vm0, %v3051_v12  ;;  %vm2966_vm7 = vmor %vm2964_vm6, %vm2965_vm3  ;;  %vm2935_vm8 = vweird.f32 %v5721_v61  ;;  %vm2944_vm12 = vweird.f32 %v5717_v28 }
 0xa26   :  { %v2960_v6 = vmul.f32 %v3739_v5, %v2959_v19  ;;  %v2919_v4 = vmul.f32 %v5726_v31, %v5681_v18  ;;  %3746 = vrsqrt.f32 %v5724_v11  ;;  %v2957_v16 = vsel %vm5751_vm5, %v5671_v56, %v2953_v60  ;;  %vm5786_vm13 = vmor %vm2934_vm9, %vm2935_vm8 }
 0xa27   :  { %v2930_v24 = vmul.f32 %v5721_v61, %v2929_v41  ;;  %3748 = vrsqrt.f32 %v5731_v30  ;;  %v3009_v56 = vmul.f32 %v2957_v16, %v5577_v48  ;;  %vm2925_vm11 = vweird.f32 %v5726_v31 }
 0xa28   :  { %v2961_v45 = vmul.f32 0.5, %v2960_v6  ;;  %v2781_v52 = vpop.xlane.xlu0 %2780  ;;  %v2920_v46 = vmul.f32 %v5726_v31, %v2919_v4  ;;  %vm5805_vm1 = vmor %vm2924_vm15, %vm2925_vm11  ;;  %vm2904_vm6 = vweird.f32 %v5724_v11  ;;  %vm2894_vm9 = vweird.f32 %v5731_v30 }
 0xa29   :  { %v2769_v38 = vpop.xlane.xlu1 %2768  ;;  %v2813_v29 = vmul.f32 0.03125, %v2781_v52  ;;  %3376 = vmatpush.xpose.msk.msrb.mxu2 %vm143_vm0, %v3050_v20  ;;  %v2931_v25 = vmul.f32 0.5, %v2930_v24  ;;  %v3028_v7 = vmul.f32 %v5703_v33, %v3009_v56 }
 0xa2a   :  { %v2962_v8 = vsub.f32 1.5, %v2961_v45  ;;  %v2809_v58 = vmul.f32 0.03125, %v2769_v38  ;;  %v2921_v3 = vmul.f32 0.5, %v2920_v46 }
 0xa2b   :  { %v3745_v57 = vpop.eup %3744  ;;  %v5746_v55 = vadd.f32 1e-05, %v2813_v29  ;;  %v2932_v27 = vsub.f32 1.5, %v2931_v25 }
 0xa2c   :  { %v2963_v10 = vmul.f32 %v3739_v5, %v2962_v8  ;;  %v2939_v59 = vmul.f32 %v3745_v57, %v5717_v28  ;;  %v5757_v2 = vpop.eup %3746  ;;  %v5762_v13 = vadd.f32 1e-05, %v2809_v58  ;;  %v2922_v22 = vsub.f32 1.5, %v2921_v3 }
 0xa2d   :  { %3750 = vrsqrt.f32 %v5746_v55  ;;  %3377 = vmatpush.xpose.msk.msrb.mxu2 %vm143_vm0, %v3049_v42  ;;  %v2899_v51 = vmul.f32 %v5757_v2, %v5724_v11  ;;  %v5768_v43 = vpop.eup %3748  ;;  %v2933_v15 = vmul.f32 %v5721_v61, %v2932_v27  ;;  %vm2945_vm10 = vweird.f32 %v3745_v57 }
 0xa2e   :  { %v2967_v26 = vsel %vm2966_vm7, %v3739_v5, %v2963_v10  ;;  %v2940_v9 = vmul.f32 %v3745_v57, %v2939_v59  ;;  %3752 = vrsqrt.f32 %v5762_v13  ;;  %v2889_v37 = vmul.f32 %v5768_v43, %v5731_v30  ;;  %vm2946_vm14 = vmor %vm2944_vm12, %vm2945_vm10 }
 0xa2f   :  { %v3010_v36 = vmul.f32 %v2967_v26, %v5589_v1  ;;  %v2900_v5 = vmul.f32 %v5757_v2, %v2899_v51  ;;  %v2923_v44 = vmul.f32 %v5726_v31, %v2922_v22  ;;  %v2937_v28 = vsel %vm5786_vm13, %v5721_v61, %v2933_v15 }
 0xa30   :  { %v2772_v49 = vpop.xlane.xlu0 %2771  ;;  %v2941_v0 = vmul.f32 0.5, %v2940_v9  ;;  %v2890_v34 = vmul.f32 %v5768_v43, %v2889_v37  ;;  %v3007_v38 = vmul.f32 %v2937_v28, %v5594_v32  ;;  %v3047_v8 = vadd.f32 %v5714_v21, %v3028_v7 }
 0xa31   :  { %v2810_v12 = vmul.f32 0.03125, %v2772_v49  ;;  %v3029_v48 = vmul.f32 %v5703_v33, %v3010_v36  ;;  %v2901_v20 = vmul.f32 0.5, %v2900_v5  ;;  %v2927_v29 = vsel %vm5805_vm1, %v5726_v31, %v2923_v44 }
 0xa32   :  { %v2942_v1 = vsub.f32 1.5, %v2941_v0  ;;  %v2891_v58 = vmul.f32 0.5, %v2890_v34  ;;  %vm2914_vm3 = vweird.f32 %v5746_v55  ;;  %v3006_v31 = vmul.f32 %v2927_v29, %v5587_v14 }
 0xa33   :  { %v3751_v23 = vpop.eup %3750  ;;  %v5791_v4 = vadd.f32 1e-05, %v2810_v12  ;;  %v3048_v24 = vadd.f32 %v5714_v21, %v3029_v48  ;;  %v2902_v25 = vsub.f32 1.5, %v2901_v20  ;;  %vm2905_vm4 = vweird.f32 %v5757_v2 }
 0xa34   :  { %v2909_v19 = vmul.f32 %v3751_v23, %v5746_v55  ;;  %v2943_v6 = vmul.f32 %v3745_v57, %v2942_v1  ;;  %v5798_v52 = vpop.eup %3752  ;;  %vm2915_vm2 = vweird.f32 %v3751_v23  ;;  %v3026_v59 = vmul.f32 %v5703_v33, %v3007_v38  ;;  %vm2906_vm7 = vmor %vm2904_vm6, %vm2905_vm4 }
 0xa35   :  { %3754 = vrsqrt.f32 %v5791_v4  ;;  %3378 = vmatpush.xpose.msk.msrb.mxu2 %vm143_vm0, %v3048_v24  ;;  %v2903_v16 = vmul.f32 %v5757_v2, %v2902_v25  ;;  %v2892_v3 = vsub.f32 1.5, %v2891_v58  ;;  %vm2916_vm5 = vmor %vm2914_vm3, %vm2915_vm2  ;;  %vm2895_vm8 = vweird.f32 %v5768_v43  ;;  %v2760_v24 = vpop.xlane.xlu1 %2759 }
 0xa36   :  { %v2910_v45 = vmul.f32 %v3751_v23, %v2909_v19  ;;  %v2947_v60 = vsel %vm2946_vm14, %v3745_v57, %v2943_v6  ;;  %v2869_v57 = vmul.f32 %v5798_v52, %v5762_v13  ;;  %v3045_v36 = vadd.f32 %v5714_v21, %v3026_v59  ;;  %vm2896_vm10 = vmor %vm2894_vm9, %vm2895_vm8  ;;  %v3170_v59 = vld [vmem:[%s5989_s6 + $0x60] sm:$0xff] }
 0xa37   :  { %v3008_v61 = vmul.f32 %v2947_v60, %v5603_v54  ;;  %v3025_v9 = vmul.f32 %v5703_v33, %v3006_v31  ;;  %v2907_v56 = vsel %vm2906_vm7, %v5757_v2, %v2903_v16  ;;  %v2893_v49 = vmul.f32 %v5768_v43, %v2892_v3  ;;  %v3169_v3 = vld [vmem:[%s5989_s6 + $0x58] sm:$0xff] }
 0xa38   :  { %v2911_v18 = vmul.f32 0.5, %v2910_v45  ;;  %v2870_v26 = vmul.f32 %v5798_v52, %v2869_v57  ;;  %v3004_v15 = vmul.f32 %v2907_v56, %v5612_v62  ;;  %vm2884_vm12 = vweird.f32 %v5791_v4  ;;  %v3173_v57 = vld [vmem:[%s5989_s6 + $0x78] sm:$0xff] }
 0xa39   :  { %v3027_v42 = vmul.f32 %v5703_v33, %v3008_v61  ;;  %3379 = vmatpush.xpose.msk.msrb.mxu2 %vm143_vm0, %v3047_v8  ;;  %v2897_v37 = vsel %vm2896_vm10, %v5768_v43, %v2893_v49  ;;  %vm2875_vm14 = vweird.f32 %v5798_v52  ;;  %vm2874_vm15 = vweird.f32 %v5762_v13  ;;  %3174 = vmatpush.msrb.mxu0 %v3173_v57 }
 0xa3a   :  { %v2912_v47 = vsub.f32 1.5, %v2911_v18  ;;  %v2871_v22 = vmul.f32 0.5, %v2870_v26  ;;  %v3023_v62 = vmul.f32 %v5703_v33, %v3004_v15  ;;  %vm2876_vm1 = vmor %vm2874_vm15, %vm2875_vm14  ;;  %v2806_v28 = vmul.f32 0.03125, %v2760_v24 }
 0xa3b   :  { %v3046_v32 = vadd.f32 %v5714_v21, %v3027_v42  ;;  %v3755_v54 = vpop.eup %3754  ;;  %v3172_v42 = vld [vmem:[%s5989_s6 + $0x70] sm:$0xff] }
 0xa3c   :  { %v2913_v10 = vmul.f32 %v3751_v23, %v2912_v47  ;;  %v2879_v27 = vmul.f32 %v3755_v54, %v5791_v4  ;;  %v2872_v12 = vsub.f32 1.5, %v2871_v22  ;;  %vm2885_vm11 = vweird.f32 %v3755_v54  ;;  %v3171_v47 = vld [vmem:[%s5989_s6 + $0x68] sm:$0xff]  ;;  %3175 = vmatpush.msrb.mxu0 %v3172_v42  ;;  %v3166_v22 = vld [vmem:[%s5989_s6 + $0x40] sm:$0xff] }
 0xa3d   :  { %3380 = vmatpush.xpose.msk.msrb.mxu2 %vm143_vm0, %v3046_v32  ;;  %vm2886_vm13 = vmor %vm2884_vm12, %vm2885_vm11  ;;  %v3042_v19 = vadd.f32 %v5714_v21, %v3023_v62  ;;  %v2822_v20 = vadd.f32 1e-05, %v2806_v28 }
 0xa3e   :  { %v2917_v51 = vsel %vm2916_vm5, %v3751_v23, %v2913_v10  ;;  %v2880_v55 = vmul.f32 %v3755_v54, %v2879_v27  ;;  %v3003_v23 = vmul.f32 %v2897_v37, %v5606_v50  ;;  %v2873_v1 = vmul.f32 %v5798_v52, %v2872_v12  ;;  %3176 = vmatpush.msrb.mxu0 %v3171_v47 }
 0xa3f   :  { %v3005_v14 = vmul.f32 %v2917_v51, %v5621_v39  ;;  %v3044_v39 = vadd.f32 %v5714_v21, %v3025_v9  ;;  %3756 = vrsqrt.f32 %v2822_v20  ;;  %vm2844_vm9 = vweird.f32 %v2822_v20 }
 0xa40   :  { %v2881_v0 = vmul.f32 0.5, %v2880_v55  ;;  %v3022_v50 = vmul.f32 %v5703_v33, %v3003_v23  ;;  %v2877_v7 = vsel %vm2876_vm1, %v5798_v52, %v2873_v1  ;;  %3177 = vmatpush.msrb.mxu0 %v3170_v59  ;;  %v3168_v55 = vld [vmem:[%s5989_s6 + $0x50] sm:$0xff]  ;;  %v3165_v1 = vld [vmem:[%s5989_s6 + $0x38] sm:$0xff] }
 0xa41   :  { %3381 = vmatpush.xpose.msk.msrb.mxu2 %vm143_vm0, %v3045_v36  ;;  %v3024_v5 = vmul.f32 %v5703_v33, %v3005_v14  ;;  %v3001_v41 = vmul.f32 %v2877_v7, %v5627_v53  ;;  %v3167_v36 = vld [vmem:[%s5989_s6 + $0x48] sm:$0xff] }
 0xa42   :  { %v2882_v11 = vsub.f32 1.5, %v2881_v0  ;;  %v3041_v44 = vadd.f32 %v5714_v21, %v3022_v50  ;;  %3178 = vmatpush.msrb.mxu0 %v3169_v3  ;;  %v3160_v50 = vld [vmem:[%s5989_s6 + $0x10] sm:$0xff] }
 0xa43   :  { %v3043_v30 = vadd.f32 %v5714_v21, %v3024_v5 }
 0xa44   :  { %v2883_v2 = vmul.f32 %v3755_v54, %v2882_v11  ;;  %3179 = vmatpush.msrb.mxu0 %v3168_v55 }
 0xa45   :  { %3382 = vmatpush.xpose.msk.msrb.mxu2 %vm143_vm0, %v3044_v39  ;;  %v3757_v60 = vpop.eup %3756 }
 0xa46   :  { %v2887_v48 = vsel %vm2886_vm13, %v3755_v54, %v2883_v2  ;;  %v2839_v29 = vmul.f32 %v3757_v60, %v2822_v20  ;;  %vm2845_vm5 = vweird.f32 %v3757_v60  ;;  %3180 = vmatpush.msrb.mxu0 %v3167_v36 }
 0xa47   :  { %v3002_v43 = vmul.f32 %v2887_v48, %v5634_v35  ;;  %v3020_v35 = vmul.f32 %v5703_v33, %v3001_v41  ;;  %vm2846_vm10 = vmor %vm2844_vm9, %vm2845_vm5  ;;  %v3164_v48 = vld [vmem:[%s5989_s6 + $0x30] sm:$0xff]  ;;  %v3159_v41 = vld [vmem:[%s5989_s6 + $0x8] sm:$0xff] }
 0xa48   :  { %v2840_v25 = vmul.f32 %v3757_v60, %v2839_v29  ;;  %3181 = vmatpush.msrb.mxu0 %v3166_v22 }
 0xa49   :  { %3383 = vmatpush.xpose.msk.msrb.mxu2 %vm143_vm0, %v3043_v30  ;;  %v3021_v6 = vmul.f32 %v5703_v33, %v3002_v43  ;;  %v3039_v4 = vadd.f32 %v5714_v21, %v3020_v35  ;;  %v3162_v43 = vld [vmem:[%s5989_s6 + $0x20] sm:$0xff] }
 0xa4a   :  { %v2841_v54 = vmul.f32 0.5, %v2840_v25  ;;  %3182 = vmatpush.msrb.mxu0 %v3165_v1 }
 0xa4b   :  { %v3040_v13 = vadd.f32 %v5714_v21, %v3021_v6  ;;  %v3158_v6 = vld [vmem:[%s5989_s6] sm:$0xff] }
 0xa4c   :  { %v2842_v26 = vsub.f32 1.5, %v2841_v54  ;;  %3183 = vmatpush.msrb.mxu0 %v3164_v48 }
 0xa4d   :  { %3384 = vmatpush.xpose.msk.msrb.mxu2 %vm143_vm0, %v3042_v19  ;;  %v3161_v19 = vld [vmem:[%s5989_s6 + $0x18] sm:$0xff] }
 0xa4e   :  { %v2843_v9 = vmul.f32 %v3757_v60, %v2842_v26 }
 0xa50   :  { %v2847_v39 = vsel %vm2846_vm10, %v3757_v60, %v2843_v9 }
 0xa51   :  { %3385 = vmatpush.xpose.msk.msrb.mxu2 %vm143_vm0, %v3041_v44  ;;  %v2998_v37 = vmul.f32 %v2847_v39, %v5639_v63 }
 0xa53   :  { %v3017_v30 = vmul.f32 %v5703_v33, %v2998_v37 }
 0xa55   :  { %3386 = vmatpush.xpose.msk.msrb.mxu2 %vm143_vm0, %v3040_v13 }
 0xa59   :  { %3387 = vmatpush.xpose.msk.msrb.mxu2 %vm143_vm0, %v3039_v4 }
 0xa83   :  { %v2763_v53 = vpop.xlane.xlu0 %2762 }
 0xa84   :  { %v2807_v34 = vmul.f32 0.03125, %v2763_v53 }
 0xa86   :  { %v2823_v45 = vadd.f32 1e-05, %v2807_v34 }
 0xa88   :  { %3758 = vrsqrt.f32 %v2823_v45  ;;  %vm2854_vm3 = vweird.f32 %v2823_v45 }
 0xa8b   :  { %v2766_v52 = vpop.xlane.xlu2 %2765 }
 0xa8c   :  { %v2808_v46 = vmul.f32 0.03125, %v2766_v52 }
 0xa8e   :  { %v3759_v61 = vpop.eup %3758  ;;  %v2824_v38 = vadd.f32 1e-05, %v2808_v46 }
 0xa8f   :  { %v2849_v18 = vmul.f32 %v3759_v61, %v2823_v45  ;;  %vm2855_vm2 = vweird.f32 %v3759_v61  ;;  %v3143_v45 = vld [vmem:[#allocation2] sm:$0x1] }
 0xa90   :  { %3760 = vrsqrt.f32 %v2824_v38  ;;  %vm2856_vm6 = vmor %vm2854_vm3, %vm2855_vm2  ;;  %vm2864_vm7 = vweird.f32 %v2824_v38 }
 0xa91   :  { %v2850_v8 = vmul.f32 %v3759_v61, %v2849_v18 }
 0xa93   :  { %v2851_v58 = vmul.f32 0.5, %v2850_v8 }
 0xa95   :  { %v2852_v31 = vsub.f32 1.5, %v2851_v58 }
 0xa96   :  { %v3761_v32 = vpop.eup %3760 }
 0xa97   :  { %v2859_v10 = vmul.f32 %v3761_v32, %v2824_v38  ;;  %v2853_v27 = vmul.f32 %v3759_v61, %v2852_v31  ;;  %vm2865_vm4 = vweird.f32 %v3761_v32 }
 0xa98   :  { %vm2866_vm8 = vmor %vm2864_vm7, %vm2865_vm4 }
 0xa99   :  { %v2860_v16 = vmul.f32 %v3761_v32, %v2859_v10  ;;  %v2857_v56 = vsel %vm2856_vm6, %v3759_v61, %v2853_v27 }
 0xa9a   :  { %v2999_v11 = vmul.f32 %v2857_v56, %v5655_v40  ;;  %v3036_v40 = vadd.f32 %v5714_v21, %v3017_v30 }
 0xa9b   :  { %v2861_v51 = vmul.f32 0.5, %v2860_v16 }
 0xa9c   :  { %v3018_v2 = vmul.f32 %v5703_v33, %v2999_v11 }
 0xa9d   :  { %v2862_v14 = vsub.f32 1.5, %v2861_v51 }
 0xa9e   :  { %v3037_v23 = vadd.f32 %v5714_v21, %v3018_v2 }
 0xa9f   :  { %v2863_v49 = vmul.f32 %v3761_v32, %v2862_v14 }
 0xaa1   :  { %v2867_v0 = vsel %vm2866_vm8, %v3761_v32, %v2863_v49  ;;  %v3194_v32 = vld [vmem:[#allocation5] sm:$0x1] }
 0xaa2   :  { %v3000_v15 = vmul.f32 %v2867_v0, %v5662_v17  ;;  %v3951_v17 = vmov 1.0   ;;  %vm3200_vm1 = vweird.f32 %v3194_v32  ;;  %v3206_v16 = vand.u32 2147483648, %v3194_v32 }
 0xaa3   :  { %v3204_v26 = vand.u32 2147483647, %v3194_v32 }
 0xaa4   :  { %v3019_v5 = vmul.f32 %v5703_v33, %v3000_v15  ;;  %v3207_v27 = vor.u32 1.1754944e-38, %v3206_v16 }
 0xaa5   :  { %vm3205_vm4 = vcmp.eq.f32.partialorder %v3204_v26, 8.507059e+37 }
 0xaa6   :  { %v3038_v12 = vadd.f32 %v5714_v21, %v3019_v5  ;;  %v3163_v21 = vld [vmem:[%s5989_s6 + $0x28] sm:$0xff] }
 0xaa7   :  { %3184 = vmatpush.msrb.mxu0 %v3163_v21 }
 0xaa8   :  { %3388 = vmatpush.xpose.msk.msrb.mxu2 %vm143_vm0, %v3038_v12 }
 0xaa9   :  { %3185 = vmatpush.msrb.mxu0 %v3162_v43 }
 0xaab   :  { %3186 = vmatpush.msrb.mxu0 %v3161_v19 }
 0xaac   :  { %3389 = vmatpush.xpose.msk.msrb.mxu2 %vm143_vm0, %v3037_v23 }
 0xaad   :  { %3187 = vmatpush.msrb.mxu0 %v3160_v50 }
 0xaaf   :  { %3188 = vmatpush.msrb.mxu0 %v3159_v41 }
 0xab0   :  { %3390 = vmatpush.xpose.msk.msrb.mxu2 %vm143_vm0, %v3036_v40 }
 0xab1   :  { %3189 = vmatpush.msrb.mxu0 %v3158_v6 }
 0xab3   :  { %3391 = vmatmul.msk.f32.vlgmr.msrb.gmra.mxu2 %vm143_vm0, %v3951_v17 }
 0xb36   :  { %v3120_v63 = vpop.f32.mrf.mxu2 }
 0xb37   :  { %v3392_v62 = vmul.f32 -0.03125, %v3120_v63 }
 0xb39   :  { %v3125_v33 = vmul.f32 1.442695, %v3392_v62 }
 0xb3b   :  { %3762 = vpow2.f32 %v3125_v33 }
 0xb41   :  { %v3763_v7 = vpop.eup %3762 }
 0xb42   :  { %v3127_v44 = vadd.f32 1.0, %v3763_v7 }
 0xb44   :  { %3764 = vrcp.f32 %v3127_v44  ;;  %v3139_v24 = vand.u32 2147483648, %v3127_v44  ;;  %v3137_v20 = vand.u32 2147483647, %v3127_v44  ;;  %vm3133_vm11 = vweird.f32 %v3127_v44 }
 0xb46   :  { %v3140_v34 = vor.u32 1.1754944e-38, %v3139_v24  ;;  %vm3138_vm13 = vcmp.eq.f32.partialorder %v3137_v20, 8.507059e+37 }
 0xb4a   :  { %v3765_v13 = vpop.eup %3764 }
 0xb4b   :  { %v3129_v35 = vmul.f32 %v3765_v13, %v3127_v44  ;;  %vm3134_vm0 = vweird.f32 %v3765_v13 }
 0xb4c   :  { %vm3135_vm12 = vmor %vm3133_vm11, %vm3134_vm0 }
 0xb4d   :  { %v3130_v4 = vsub.f32 1.0, %v3129_v35 }
 0xb4f   :  { %v3131_v28 = vmul.f32 %v3765_v13, %v3130_v4 }
 0xb51   :  { %v3132_v53 = vadd.f32 %v3765_v13, %v3131_v28 }
 0xb53   :  { %v3136_v52 = vsel %vm3135_vm12, %v3765_v13, %v3132_v53 }
 0xb54   :  { %v3141_v60 = vsel %vm3138_vm13, %v3140_v34, %v3136_v52 }
 0xb55   :  { %v3144_v46 = vmul.f32 %v3143_v45, %v3141_v60 }
 0xb57   :  { %3145 = vst [vmem:[#allocation10] sm:$0x1] %v3144_v46  ;;  %3766 = vrsqrt.f32 %v3144_v46  ;;  %vm3153_vm14 = vcmp.eq.f32.partialorder %v3144_v46, inf  ;;  %v3156_v57 = vand.u32 2147483648, %v3144_v46  ;;  %vm3155_vm15 = vcmp.eq.f32.partialorder %v3144_v46, 0.0 }
 0xb58   :  { %3222 = dma.vmem_to_hbm [thread:$0]  %s3218_s23, 16, %s3220_s10, [#allocation4]   ;;  %3768 = vrcp.f32 %v3194_v32 }
 0xb5d   :  { %v3767_v61 = vpop.eup %3766 }
 0xb5e   :  { %v3147_v38 = vmul.f32 %v3767_v61, %v3144_v46  ;;  %v3769_v54 = vpop.eup %3768 }
 0xb5f   :  { %v3196_v31 = vmul.f32 %v3769_v54, %v3194_v32  ;;  %vm3201_vm2 = vweird.f32 %v3769_v54 }
 0xb60   :  { %v3148_v29 = vmul.f32 %v3767_v61, %v3147_v38  ;;  %vm3202_vm3 = vmor %vm3200_vm1, %vm3201_vm2 }
 0xb61   :  { %v3197_v10 = vsub.f32 1.0, %v3196_v31 }
 0xb62   :  { %v3149_v18 = vmul.f32 0.5, %v3148_v29 }
 0xb63   :  { %v3198_v59 = vmul.f32 %v3769_v54, %v3197_v10 }
 0xb64   :  { %v3150_v8 = vsub.f32 1.5, %v3149_v18 }
 0xb65   :  { %v3199_v3 = vadd.f32 %v3769_v54, %v3198_v59 }
 0xb66   :  { %v3151_v25 = vmul.f32 %v3767_v61, %v3150_v8 }
 0xb67   :  { %v3203_v51 = vsel %vm3202_vm3, %v3769_v54, %v3199_v3 }
 0xb68   :  { %v3152_v58 = vmul.f32 %v3151_v25, %v3144_v46  ;;  %v3208_v55 = vsel %vm3205_vm4, %v3207_v27, %v3203_v51 }
 0xb6a   :  { %v3154_v42 = vsel %vm3153_vm14, %v3144_v46, %v3152_v58 }
 0xb6b   :  { %v3157_v47 = vsel %vm3155_vm15, %v3156_v57, %v3154_v42 }
 0xb6c   :  { %3190 = vmatmul.f32.vlgmr.msrb.gmra.mxu0 %v3157_v47 }
 0xbe9   :  { %v3191_v14 = vpop.f32.mrf.mxu0 }
 0xbea   :  { %v3209_v36 = vmul.f32 %v3208_v55, %v3191_v14 }
 0xbec   :  { %v3393_v9 = vadd.f32 -1.0, %v3209_v36 }
 0xbee   :  { %3211 = vst [vmem:[#allocation11] sm:$0x1] %v3393_v9 }
 0xbef   :  { %3233 = dma.vmem_to_hbm [thread:$0]  %s3229_s2, 16, %s3231_s9, [#allocation12]  }
 0xbf0   :  { %3936 = dma.done.wait [#allocation4], 16  }
 0xbf1   :  { %3937 = vsyncadd [#allocation4], 4294967280 }
 0xbf2   :  { %3938 = dma.done.wait [#allocation12], 16  }
 0xbf3   :  { %3939 = vsyncadd [#allocation12], 4294967280 }
 0xbf4   :  { %3242 = vsyncpa [#allocation3], 1 }
 0xbf5   :  { %3243 = vsyncpa [#allocation6], 1 }
 0xbf6   :  { %3244 = vsyncpa [#allocation9], 1 }
 0xbf7   :  { %3245 = vsyncpa [#allocation4], 1 }
 0xbf8   :  { %3246 = vsyncpa [#allocation12], 1 }

</bundles_post_ra>
